<compile_context>
chip_gen: v6e
topology: v6e:2x2x1
jax: 0.10.0
libtpu: 0.0.40
codegen_flags: <defaults>
</compile_context>

<pallas_src>
from functools import partial

import jax
import jax.numpy as jnp
from jax.experimental import pallas as pl
from jax.experimental.pallas import tpu as pltpu

_HI = jax.lax.Precision.HIGHEST


def _ca_kernel(ph_ref, pw_ref, eh_ref, ew_ref, w1_ref, b1_ref, wh_ref, ww_ref,
               x_ref, o_ref, *, h, w, bt):
    """One block = `bt` batch elements, each with its full (C, H*W) feature map.

    ph_ref: (HW, H) one-hot, ph[p, i] = 1 iff p // W == i     (x.dtype)
    pw_ref: (HW, W) one-hot, pw[p, j] = 1 iff p %  W == j     (x.dtype)
    eh_ref: (H, HW) = ph.T,  ew_ref: (W, HW) = pw.T           (x.dtype)
    w1_ref: (mid, C) conv_1x1 weight with inference-BN scale folded (f32)
    b1_ref: (mid, 1) folded BN shift (f32)
    wh_ref: (C, mid) F_h weight (f32);  ww_ref: (C, mid) F_w weight (f32)
    x_ref / o_ref: (bt, C, HW) input / output tiles.
    """
    ph = ph_ref[...]
    pw = pw_ref[...]
    eh = eh_ref[...]
    ew = ew_ref[...]
    w1 = w1_ref[...]
    b1 = b1_ref[...]
    wh = wh_ref[...]
    ww = ww_ref[...]

    for i in range(bt):                      # static unroll -> clean 2-D MXU matmuls
        xb = x_ref[i]                        # (C, HW), input dtype

        # Coordinate pooling: mean over W per row h / mean over H per column w.
        # f32 accumulation on the MXU, no f32 copy of the whole tile.
        pool_h = jnp.dot(xb, ph, precision=_HI,
                         preferred_element_type=jnp.float32) * (1.0 / w)   # (C, H)
        pool_w = jnp.dot(xb, pw, precision=_HI,
                         preferred_element_type=jnp.float32) * (1.0 / h)   # (C, W)

        # Shared 1x1 conv (C -> mid) + folded inference BatchNorm + ReLU.
        mid_h = jnp.maximum(jnp.dot(w1, pool_h, precision=_HI) + b1, 0.0)  # (mid, H)
        mid_w = jnp.maximum(jnp.dot(w1, pool_w, precision=_HI) + b1, 0.0)  # (mid, W)

        # Per-direction 1x1 convs (mid -> C) + sigmoid gates.
        s_h = jax.nn.sigmoid(jnp.dot(wh, mid_h, precision=_HI))            # (C, H)
        s_w = jax.nn.sigmoid(jnp.dot(ww, mid_w, precision=_HI))            # (C, W)

        # Expand gates onto the flattened lane-dense spatial axis (MXU, no relayout):
        #   a_h[c, p] = s_h[c, p // W],  a_w[c, p] = s_w[c, p % W]
        a_h = jnp.dot(s_h.astype(xb.dtype), eh, precision=_HI)             # (C, HW)
        a_w = jnp.dot(s_w.astype(xb.dtype), ew, precision=_HI)             # (C, HW)

        # Gate the input in its native dtype; lane-dense store.
        o_ref[i] = (xb * a_h * a_w).astype(o_ref.dtype)


def _pick_batch_tile(b, per_batch_bytes, budget_bytes):
    """Largest batch tile that fits the VMEM budget, divides B, and keeps
    >= 2 grid steps when B >= 2 (so both TensorCores get work)."""
    bt = max(1, min(b, budget_bytes // max(per_batch_bytes, 1)))
    if b >= 2:
        bt = min(bt, max(1, b // 2))
    while b % bt:
        bt -= 1
    return bt


def _const_spec(arr):
    ndim = arr.ndim
    return pl.BlockSpec(arr.shape, lambda i: (0,) * ndim)


def ca_block(x, w1, bn_gamma, bn_beta, bn_mean, bn_var, w_fh, w_fw,
             *, eps=1e-5, block_budget_bytes=4 * 1024 * 1024):
    """Coordinate-attention forward.

    x: (B, C, H, W); w1: (mid, C) [conv_1x1 weight, 1x1 kernel squeezed];
    w_fh / w_fw: (C, mid) [F_h / F_w weights]; bn_*: (mid,) BatchNorm params.
    """
    b, c, h, w = x.shape
    mid = w1.shape[0]
    hw = h * w
    xr = x.reshape(b, c, hw)

    # Fold inference-mode BatchNorm into the shared 1x1 conv.
    # TODO(synk): training-mode BatchNorm (batch statistics) is not modeled.
    scale = (bn_gamma / jnp.sqrt(bn_var + eps)).astype(jnp.float32)          # (mid,)
    w1f = w1.astype(jnp.float32) * scale[:, None]                            # (mid, C)
    b1f = (bn_beta - bn_mean * scale).reshape(mid, 1).astype(jnp.float32)    # (mid, 1)

    # One-hot pooling maps (p -> h, p -> w) and their transposes (expansion).
    p_idx = jnp.arange(hw, dtype=jnp.int32)
    ph = (p_idx[:, None] // w == jnp.arange(h, dtype=jnp.int32)[None, :]).astype(x.dtype)  # (HW, H)
    pw = (p_idx[:, None] % w == jnp.arange(w, dtype=jnp.int32)[None, :]).astype(x.dtype)   # (HW, W)
    eh = ph.T                                                                              # (H, HW)
    ew = pw.T                                                                              # (W, HW)

    whm = w_fh.astype(jnp.float32)
    wwm = w_fw.astype(jnp.float32)

    per_batch_bytes = c * hw * x.dtype.itemsize
    bt = _pick_batch_tile(b, per_batch_bytes, block_budget_bytes)

    x_spec = pl.BlockSpec((bt, c, hw), lambda i: (i, 0, 0))
    o_spec = pl.BlockSpec((bt, c, hw), lambda i: (i, 0, 0))

    out = pl.pallas_call(
        partial(_ca_kernel, h=h, w=w, bt=bt),
        out_shape=jax.ShapeDtypeStruct((b, c, hw), x.dtype),
        grid_spec=pltpu.PrefetchScalarGridSpec(
            num_scalar_prefetch=0,
            grid=(b // bt,),
            in_specs=[
                _const_spec(ph), _const_spec(pw), _const_spec(eh), _const_spec(ew),
                _const_spec(w1f), _const_spec(b1f), _const_spec(whm), _const_spec(wwm),
                x_spec,
            ],
            out_specs=o_spec,
        ),
        compiler_params=pltpu.CompilerParams(
            dimension_semantics=("parallel",),
            vmem_limit_bytes=32 * 1024 * 1024,
        ),
        cost_estimate=pl.CostEstimate(
            flops=int(4 * b * c * hw * (h + w) + 2 * b * c * hw),
            transcendentals=int(b * c * (h + w)),
            bytes_accessed=int(2 * b * c * hw * x.dtype.itemsize),
        ),
    )(ph, pw, eh, ew, w1f, b1f, whm, wwm, xr)

    return out.reshape(b, c, h, w)


def ca_block_reference(x, w1, bn_gamma, bn_beta, bn_mean, bn_var, w_fh, w_fw, eps=1e-5):
    """Pure-JAX reference of the PyTorch forward (inference-mode BN)."""
    b, c, h, w = x.shape
    x_h = jnp.mean(x, axis=3)                                  # (B, C, H)
    x_w = jnp.mean(x, axis=2)                                  # (B, C, W)
    cat = jnp.concatenate([x_h, x_w], axis=-1)                 # (B, C, H+W)
    y = jnp.einsum('mc,bcp->bmp', w1, cat, precision='highest')
    y = (y - bn_mean[None, :, None]) / jnp.sqrt(bn_var[None, :, None] + eps)
    y = y * bn_gamma[None, :, None] + bn_beta[None, :, None]
    y = jax.nn.relu(y)
    y_h, y_w = y[:, :, :h], y[:, :, h:]
    s_h = jax.nn.sigmoid(jnp.einsum('cm,bmh->bch', w_fh, y_h, precision='highest'))
    s_w = jax.nn.sigmoid(jnp.einsum('cm,bmw->bcw', w_fw, y_w, precision='highest'))
    return x * s_h[:, :, :, None] * s_w[:, :, None, :]


if __name__ == "__main__":
    key = jax.random.PRNGKey(0)
    ks = jax.random.split(key, 8)

    # Small shapes consistent with the module: channel=64, default reduction=16 -> mid=4.
    B, C, H, W = 2, 64, 16, 16
    reduction = 16
    mid = C // reduction

    x = jax.random.normal(ks[0], (B, C, H, W), dtype=jnp.float32)
    w1 = 0.3 * jax.random.normal(ks[1], (mid, C), dtype=jnp.float32)    # conv_1x1 (bias=False)
    w_fh = 0.3 * jax.random.normal(ks[2], (C, mid), dtype=jnp.float32)  # F_h (bias=False)
    w_fw = 0.3 * jax.random.normal(ks[3], (C, mid), dtype=jnp.float32)  # F_w (bias=False)
    bn_gamma = 1.0 + 0.1 * jax.random.normal(ks[4], (mid,), dtype=jnp.float32)
    bn_beta = 0.1 * jax.random.normal(ks[5], (mid,), dtype=jnp.float32)
    bn_mean = 0.1 * jax.random.normal(ks[6], (mid,), dtype=jnp.float32)
    bn_var = jnp.abs(1.0 + 0.1 * jax.random.normal(ks[7], (mid,), dtype=jnp.float32))

    out = jax.block_until_ready(
        ca_block(x, w1, bn_gamma, bn_beta, bn_mean, bn_var, w_fh, w_fw))
    ref = ca_block_reference(x, w1, bn_gamma, bn_beta, bn_mean, bn_var, w_fh, w_fw)

    assert out.shape == x.shape and out.dtype == x.dtype
    err = float(jnp.max(jnp.abs(out - ref)))
    assert jnp.allclose(out, ref, atol=1e-4, rtol=1e-4), err
    print("KERNEL_OK")
</pallas_src>

<mosaic_0001>
module attributes {stable_mosaic.version = 11 : i64} {
  func.func @_ca_kernel(%arg0: i32, %arg1: memref<256x16xf32, #tpu.memory_space<vmem>>, %arg2: memref<256x16xf32, #tpu.memory_space<vmem>>, %arg3: memref<16x256xf32, #tpu.memory_space<vmem>>, %arg4: memref<16x256xf32, #tpu.memory_space<vmem>>, %arg5: memref<4x64xf32, #tpu.memory_space<vmem>>, %arg6: memref<4x1xf32, #tpu.memory_space<vmem>>, %arg7: memref<64x4xf32, #tpu.memory_space<vmem>>, %arg8: memref<64x4xf32, #tpu.memory_space<vmem>>, %arg9: memref<1x64x256xf32, #tpu.memory_space<vmem>>, %arg10: memref<1x64x256xf32, #tpu.memory_space<vmem>>) attributes {dimension_semantics = [#tpu.dimension_semantics<parallel>], iteration_bounds = array<i64: 2>, scalar_prefetch = 0 : i64, scratch_operands = 0 : i64, tpu.core_type = #tpu.core_type<tc>, window_params = [{pipeline_mode = #tpu.pipeline_mode<synchronous>, transform_indices = @transform_0, window_bounds = array<i64: 256, 16>}, {pipeline_mode = #tpu.pipeline_mode<synchronous>, transform_indices = @transform_1, window_bounds = array<i64: 256, 16>}, {pipeline_mode = #tpu.pipeline_mode<synchronous>, transform_indices = @transform_2, window_bounds = array<i64: 16, 256>}, {pipeline_mode = #tpu.pipeline_mode<synchronous>, transform_indices = @transform_3, window_bounds = array<i64: 16, 256>}, {pipeline_mode = #tpu.pipeline_mode<synchronous>, transform_indices = @transform_4, window_bounds = array<i64: 4, 64>}, {pipeline_mode = #tpu.pipeline_mode<synchronous>, transform_indices = @transform_5, window_bounds = array<i64: 4, 1>}, {pipeline_mode = #tpu.pipeline_mode<synchronous>, transform_indices = @transform_6, window_bounds = array<i64: 64, 4>}, {pipeline_mode = #tpu.pipeline_mode<synchronous>, transform_indices = @transform_7, window_bounds = array<i64: 64, 4>}, {transform_indices = @transform_8, window_bounds = array<i64: 1, 64, 256>}, {transform_indices = @transform_9, window_bounds = array<i64: 1, 64, 256>}]} {
    %c0 = arith.constant 0 : index
    %c0_0 = arith.constant 0 : index
    %0 = vector.load %arg1[%c0, %c0_0] : memref<256x16xf32, #tpu.memory_space<vmem>>, vector<256x16xf32>
    %c0_1 = arith.constant 0 : index
    %c0_2 = arith.constant 0 : index
    %1 = vector.load %arg2[%c0_1, %c0_2] : memref<256x16xf32, #tpu.memory_space<vmem>>, vector<256x16xf32>
    %c0_3 = arith.constant 0 : index
    %c0_4 = arith.constant 0 : index
    %2 = vector.load %arg3[%c0_3, %c0_4] : memref<16x256xf32, #tpu.memory_space<vmem>>, vector<16x256xf32>
    %c0_5 = arith.constant 0 : index
    %c0_6 = arith.constant 0 : index
    %3 = vector.load %arg4[%c0_5, %c0_6] : memref<16x256xf32, #tpu.memory_space<vmem>>, vector<16x256xf32>
    %c0_7 = arith.constant 0 : index
    %c0_8 = arith.constant 0 : index
    %4 = vector.load %arg5[%c0_7, %c0_8] : memref<4x64xf32, #tpu.memory_space<vmem>>, vector<4x64xf32>
    %c0_9 = arith.constant 0 : index
    %c0_10 = arith.constant 0 : index
    %5 = vector.load %arg6[%c0_9, %c0_10] : memref<4x1xf32, #tpu.memory_space<vmem>>, vector<4x1xf32>
    %c0_11 = arith.constant 0 : index
    %c0_12 = arith.constant 0 : index
    %6 = vector.load %arg7[%c0_11, %c0_12] : memref<64x4xf32, #tpu.memory_space<vmem>>, vector<64x4xf32>
    %c0_13 = arith.constant 0 : index
    %c0_14 = arith.constant 0 : index
    %7 = vector.load %arg8[%c0_13, %c0_14] : memref<64x4xf32, #tpu.memory_space<vmem>>, vector<64x4xf32>
    %c0_15 = arith.constant 0 : index
    %c0_16 = arith.constant 0 : index
    %c0_17 = arith.constant 0 : index
    %8 = vector.load %arg9[%c0_15, %c0_16, %c0_17] : memref<1x64x256xf32, #tpu.memory_space<vmem>>, vector<1x64x256xf32>
    %9 = vector.shape_cast %8 : vector<1x64x256xf32> to vector<64x256xf32>
    %cst = arith.constant dense<0.000000e+00> : vector<64x16xf32>
    %10 = tpu.matmul %9, %0, %cst {dimension_numbers = #tpu.dot_dimension_numbers<[1], [0], [0], [1], [0, 0, 1, 1], [], []>, precision = #tpu.contract_precision<fp32>} : vector<64x256xf32>, vector<256x16xf32>, vector<64x16xf32> -> vector<64x16xf32>
    %cst_18 = arith.constant 6.250000e-02 : f32
    %11 = vector.broadcast %cst_18 : f32 to vector<64x16xf32>
    %12 = arith.mulf %10, %11 : vector<64x16xf32>
    %cst_19 = arith.constant dense<0.000000e+00> : vector<64x16xf32>
    %13 = tpu.matmul %9, %1, %cst_19 {dimension_numbers = #tpu.dot_dimension_numbers<[1], [0], [0], [1], [0, 0, 1, 1], [], []>, precision = #tpu.contract_precision<fp32>} : vector<64x256xf32>, vector<256x16xf32>, vector<64x16xf32> -> vector<64x16xf32>
    %cst_20 = arith.constant 6.250000e-02 : f32
    %14 = vector.broadcast %cst_20 : f32 to vector<64x16xf32>
    %15 = arith.mulf %13, %14 : vector<64x16xf32>
    %cst_21 = arith.constant dense<0.000000e+00> : vector<4x16xf32>
    %16 = tpu.matmul %4, %12, %cst_21 {dimension_numbers = #tpu.dot_dimension_numbers<[1], [0], [0], [1], [0, 0, 1, 1], [], []>, precision = #tpu.contract_precision<fp32>} : vector<4x64xf32>, vector<64x16xf32>, vector<4x16xf32> -> vector<4x16xf32>
    %17 = vector.broadcast %5 : vector<4x1xf32> to vector<4x16xf32>
    %18 = arith.addf %16, %17 : vector<4x16xf32>
    %cst_22 = arith.constant 0.000000e+00 : f32
    %19 = vector.broadcast %cst_22 : f32 to vector<4x16xf32>
    %20 = arith.maximumf %18, %19 : vector<4x16xf32>
    %cst_23 = arith.constant dense<0.000000e+00> : vector<4x16xf32>
    %21 = tpu.matmul %4, %15, %cst_23 {dimension_numbers = #tpu.dot_dimension_numbers<[1], [0], [0], [1], [0, 0, 1, 1], [], []>, precision = #tpu.contract_precision<fp32>} : vector<4x64xf32>, vector<64x16xf32>, vector<4x16xf32> -> vector<4x16xf32>
    %22 = vector.broadcast %5 : vector<4x1xf32> to vector<4x16xf32>
    %23 = arith.addf %21, %22 : vector<4x16xf32>
    %cst_24 = arith.constant 0.000000e+00 : f32
    %24 = vector.broadcast %cst_24 : f32 to vector<4x16xf32>
    %25 = arith.maximumf %23, %24 : vector<4x16xf32>
    %cst_25 = arith.constant dense<0.000000e+00> : vector<64x16xf32>
    %26 = tpu.matmul %6, %20, %cst_25 {dimension_numbers = #tpu.dot_dimension_numbers<[1], [0], [0], [1], [0, 0, 1, 1], [], []>, precision = #tpu.contract_precision<fp32>} : vector<64x4xf32>, vector<4x16xf32>, vector<64x16xf32> -> vector<64x16xf32>
    %27 = arith.negf %26 : vector<64x16xf32>
    %28 = math.exp %27 : vector<64x16xf32>
    %cst_26 = arith.constant 1.000000e+00 : f32
    %29 = vector.broadcast %cst_26 : f32 to vector<64x16xf32>
    %30 = arith.addf %29, %28 : vector<64x16xf32>
    %31 = arith.divf %29, %30 : vector<64x16xf32>
    %cst_27 = arith.constant dense<0.000000e+00> : vector<64x16xf32>
    %32 = tpu.matmul %7, %25, %cst_27 {dimension_numbers = #tpu.dot_dimension_numbers<[1], [0], [0], [1], [0, 0, 1, 1], [], []>, precision = #tpu.contract_precision<fp32>} : vector<64x4xf32>, vector<4x16xf32>, vector<64x16xf32> -> vector<64x16xf32>
    %33 = arith.negf %32 : vector<64x16xf32>
    %34 = math.exp %33 : vector<64x16xf32>
    %cst_28 = arith.constant 1.000000e+00 : f32
    %35 = vector.broadcast %cst_28 : f32 to vector<64x16xf32>
    %36 = arith.addf %35, %34 : vector<64x16xf32>
    %37 = arith.divf %35, %36 : vector<64x16xf32>
    %cst_29 = arith.constant dense<0.000000e+00> : vector<64x256xf32>
    %38 = tpu.matmul %31, %2, %cst_29 {dimension_numbers = #tpu.dot_dimension_numbers<[1], [0], [0], [1], [0, 0, 1, 1], [], []>, precision = #tpu.contract_precision<fp32>} : vector<64x16xf32>, vector<16x256xf32>, vector<64x256xf32> -> vector<64x256xf32>
    %cst_30 = arith.constant dense<0.000000e+00> : vector<64x256xf32>
    %39 = tpu.matmul %37, %3, %cst_30 {dimension_numbers = #tpu.dot_dimension_numbers<[1], [0], [0], [1], [0, 0, 1, 1], [], []>, precision = #tpu.contract_precision<fp32>} : vector<64x16xf32>, vector<16x256xf32>, vector<64x256xf32> -> vector<64x256xf32>
    %40 = arith.mulf %9, %38 : vector<64x256xf32>
    %41 = arith.mulf %40, %39 : vector<64x256xf32>
    %c0_31 = arith.constant 0 : index
    %c0_32 = arith.constant 0 : index
    %c0_33 = arith.constant 0 : index
    %42 = vector.load %arg10[%c0_31, %c0_32, %c0_33] : memref<1x64x256xf32, #tpu.memory_space<vmem>>, vector<1x64x256xf32>
    %43 = vector.shape_cast %42 : vector<1x64x256xf32> to vector<64x256xf32>
    %44 = vector.shape_cast %41 : vector<64x256xf32> to vector<1x64x256xf32>
    tpu.vector_store %arg10[%c0_31, %c0_32, %c0_33], %44 {strides = array<i32>} : memref<1x64x256xf32, #tpu.memory_space<vmem>>, vector<1x64x256xf32>,
    return
  }
  func.func @transform_0(%arg0: i32) -> (i32, i32) {
    %c0_i32 = arith.constant 0 : i32
    %c0_i32_0 = arith.constant 0 : i32
    %c0_i32_1 = arith.constant 0 : i32
    return %c0_i32, %c0_i32_0 : i32, i32
  }
  func.func @transform_1(%arg0: i32) -> (i32, i32) {
    %c0_i32 = arith.constant 0 : i32
    %c0_i32_0 = arith.constant 0 : i32
    %c0_i32_1 = arith.constant 0 : i32
    return %c0_i32, %c0_i32_0 : i32, i32
  }
  func.func @transform_2(%arg0: i32) -> (i32, i32) {
    %c0_i32 = arith.constant 0 : i32
    %c0_i32_0 = arith.constant 0 : i32
    %c0_i32_1 = arith.constant 0 : i32
    return %c0_i32, %c0_i32_0 : i32, i32
  }
  func.func @transform_3(%arg0: i32) -> (i32, i32) {
    %c0_i32 = arith.constant 0 : i32
    %c0_i32_0 = arith.constant 0 : i32
    %c0_i32_1 = arith.constant 0 : i32
    return %c0_i32, %c0_i32_0 : i32, i32
  }
  func.func @transform_4(%arg0: i32) -> (i32, i32) {
    %c0_i32 = arith.constant 0 : i32
    %c0_i32_0 = arith.constant 0 : i32
    %c0_i32_1 = arith.constant 0 : i32
    return %c0_i32, %c0_i32_0 : i32, i32
  }
  func.func @transform_5(%arg0: i32) -> (i32, i32) {
    %c0_i32 = arith.constant 0 : i32
    %c0_i32_0 = arith.constant 0 : i32
    %c0_i32_1 = arith.constant 0 : i32
    return %c0_i32, %c0_i32_0 : i32, i32
  }
  func.func @transform_6(%arg0: i32) -> (i32, i32) {
    %c0_i32 = arith.constant 0 : i32
    %c0_i32_0 = arith.constant 0 : i32
    %c0_i32_1 = arith.constant 0 : i32
    return %c0_i32, %c0_i32_0 : i32, i32
  }
  func.func @transform_7(%arg0: i32) -> (i32, i32) {
    %c0_i32 = arith.constant 0 : i32
    %c0_i32_0 = arith.constant 0 : i32
    %c0_i32_1 = arith.constant 0 : i32
    return %c0_i32, %c0_i32_0 : i32, i32
  }
  func.func @transform_8(%arg0: i32) -> (i32, i32, i32) {
    %c0_i32 = arith.constant 0 : i32
    %c0_i32_0 = arith.constant 0 : i32
    %c0_i32_1 = arith.constant 0 : i32
    return %arg0, %c0_i32, %c0_i32_0 : i32, i32, i32
  }
  func.func @transform_9(%arg0: i32) -> (i32, i32, i32) {
    %c0_i32 = arith.constant 0 : i32
    %c0_i32_0 = arith.constant 0 : i32
    %c0_i32_1 = arith.constant 0 : i32
    return %arg0, %c0_i32, %c0_i32_0 : i32, i32, i32
  }
}

</mosaic_0001>

<bundles_post_ra>
// kernel: tpu_custom_call.1
= control target key start
LH: loop header
LB: loop body
LE: loop exit
PB: predicated region body
PF: predicated region fallthrough
CT: control target
= control target key end

     0   :  { %14 = vsyncpa [#allocation3], 0  ;;  %s12500_s0 = inlined_call_operand.vmem [shape: f32[256,16], index: 0, kind: input, shape index: {}]   ;;  %s12501_s1 = inlined_call_operand.vmem [shape: f32[256,16], index: 1, kind: input, shape index: {}]   ;;  %s12502_s2 = inlined_call_operand.vmem [shape: f32[16,256], index: 2, kind: input, shape index: {}]   ;;  %s12503_s3 = inlined_call_operand.vmem [shape: f32[16,256], index: 3, kind: input, shape index: {}]   ;;  %s12504_s4 = inlined_call_operand.vmem [shape: f32[4,64], index: 4, kind: input, shape index: {}]   ;;  %s12505_s5 = inlined_call_operand.vmem [shape: f32[4,1], index: 5, kind: input, shape index: {}]   ;;  %s12506_s6 = inlined_call_operand.vmem [shape: f32[64,4], index: 6, kind: input, shape index: {}]   ;;  %s12507_s7 = inlined_call_operand.vmem [shape: f32[64,4], index: 7, kind: input, shape index: {}]   ;;  %s12508_s8 = inlined_call_operand.vmem [shape: f32[2,64,256], index: 8, kind: input, shape index: {}]   ;;  %s12509_s9 = inlined_call_operand.hbm [shape: f32[2,64,256], index: 9, kind: output, shape index: {}]  }
   0x1   :  { %16 = vsyncpa [#allocation3 + $0x1], 0  ;;  %s9090_s30 = smov 0   ;;  %s9092_s10 = smov 0  }
   0x2   :  { %s9094_s11 = smov 0   ;;  %s9096_s12 = smov 0  }
   0x3 LB: > { %s9111_s13 = sadd.s32 4294967295, %s9032_s12   ;;  %s7533_s14 = sadd.s32 4294967294, %s9032_s12   ;;  %s9032_s12 = sphi %s9096_s12, %s13280_s12   ;;  %s9028_s11 = sphi %s9094_s11, %s13279_s11   ;;  %s9024_s10 = sphi %s9092_s10, %s13278_s10   ;;  %s9020_s30 = sphi %s9090_s30, %s13277_s30  }
   0x4   : > { %s9115_s15 = sadd.s32 1, %s9032_s12   ;;  %s223_s16 = sadd.s32 1, %s9028_s11 }
   0x5   : > { %s220_s17 = ssub.s32 %s9032_s12, %s9115_s15  ;;  %p233_p0 = scmp.ne.s32.totalorder %s9028_s11, %s9024_s10 }
   0x6   : > { %p221_p1 = scmp.eq.s32.totalorder %s220_s17, 0  ;;  %p234_p2 = scmp.eq.s32.totalorder %s9111_s13, 1 }
   0x7   : > { %p239_p3 = scmp.ne.s32.totalorder %s9024_s10, %s9020_s30  ;;  %p240_p4 = scmp.eq.s32.totalorder %s7533_s14, 1 }
   0x8   : > { %s9126_s18 = scalar_select %p221_p1, %s9028_s11, %s223_s16  }
   0x9   : > { %p9128_p5 = por %p234_p2, %p233_p0  ;;  %p9132_p6 = por %p240_p4, %p239_p3 }
   0xa   : > { %p7536_p7 = scmp.ge.s32.totalorder %s9032_s12, 1  ;;  %p290_p8 = scmp.lt.s32.totalorder %s9032_s12, 3 }
   0xc   : > { %p291_p9 = pnand %p7536_p7, %p290_p8 }
   0xe   : > { %294 = sbr.rel (%p291_p9) target bundleno = 1388 (0x56c), region = 56 }
  0x13   : > { %v362_v0 = vld [vmem:[%s12500_s0 + $0xf8] sm:$0xff]  ;;  %v361_v2 = vld [vmem:[%s12500_s0 + $0xf0] sm:$0xff]  ;;  %v360_v7 = vld [vmem:[%s12500_s0 + $0xe8] sm:$0xff]  ;;  %p326_p10 = scmp.lt.s32.totalorder %s9111_s13, 1  ;;  %vm9035_vm0 = vmmov 0   ;;  %vm2966_vm1 = vcmask 523264  }
  0x14   : > { %v346_v1 = vld [vmem:[%s12500_s0 + $0x78] sm:$0xff]  ;;  %v9147_v3 = vand.u32 4294901760, %v362_v0  ;;  %v9151_v5 = vand.u32 4294901760, %v361_v2  ;;  %v345_v6 = vld [vmem:[%s12500_s0 + $0x70] sm:$0xff]  ;;  %v344_v8 = vld [vmem:[%s12500_s0 + $0x68] sm:$0xff]  ;;  %v9164_v10 = vand.u32 4294901760, %v360_v7 }
  0x15   : > { %v9149_v4 = vand.u32 4294901760, %v346_v1  ;;  %v9162_v9 = vand.u32 4294901760, %v345_v6  ;;  %v9166_v11 = vand.u32 4294901760, %v344_v8  ;;  %v359_v12 = vld [vmem:[%s12500_s0 + $0xe0] sm:$0xff]  ;;  %v358_v14 = vld [vmem:[%s12500_s0 + $0xd8] sm:$0xff]  ;;  %v9195_v20 = vld [vmem:[%s12500_s0 + $0xd0] sm:$0xff] }
  0x16   : > { %v343_v13 = vld [vmem:[%s12500_s0 + $0x60] sm:$0xff]  ;;  %7563 = vmatprep.subr.mxu0 %v9147_v3  ;;  %v9178_v15 = vand.u32 4294901760, %v359_v12  ;;  %v9182_v17 = vand.u32 4294901760, %v358_v14  ;;  %v9185_v18 = vsub.f32 %v362_v0, %v9147_v3  ;;  %v9190_v19 = vld [vmem:[%s12500_s0 + $0x58] sm:$0xff]  ;;  %v9200_v21 = vld [vmem:[%s12500_s0 + $0x50] sm:$0xff]  ;;  %v9210_v24 = vand.u32 4294901760, %v9195_v20 }
  0x17   : > { %v9180_v16 = vand.u32 4294901760, %v343_v13  ;;  %7564 = vmatpush3.msra.mxu0 %v9149_v4  ;;  %v9204_v22 = vand.u32 4294901760, %v9190_v19  ;;  %v9207_v23 = vsub.f32 %v346_v1, %v9149_v4  ;;  %v9213_v25 = vsub.f32 %v361_v2, %v9151_v5  ;;  %v9218_v26 = vld [vmem:[%s12500_s0 + $0xc8] sm:$0xff]  ;;  %v9228_v28 = vld [vmem:[%s12500_s0 + $0xc0] sm:$0xff]  ;;  %v9280_v46 = vld [vmem:[%s12500_s0 + $0xb8] sm:$0xff]  ;;  %s9405_s21 = scalar_select %p326_p10, %s9111_s13, 1 }
  0x18   : > { %12777 = vst [vmem:[#allocation5_spill] sm:$0xff] %v9185_v18  ;;  %12779 = vst [vmem:[#allocation7_spill] sm:$0xff] %v9210_v24  ;;  %v9223_v27 = vld [vmem:[%s12500_s0 + $0x48] sm:$0xff]  ;;  %7565 = vmatprep.subr.mxu0 %v9151_v5  ;;  %v12523_v29 = vand.u32 4294901760, %v9185_v18  ;;  %v9233_v30 = vand.u32 4294901760, %v9200_v21  ;;  %v9236_v31 = vsub.f32 %v345_v6, %v9162_v9  ;;  %v9239_v32 = vand.u32 4294901760, %v9218_v26 }
  0x19   : > { %12778 = vst [vmem:[#allocation6_spill] sm:$0xff] %v9207_v23  ;;  %12780 = vst [vmem:[#allocation8_spill] sm:$0xff] %v9213_v25  ;;  %7566 = vmatpush3.msra.mxu0 %v9162_v9  ;;  %v12522_v33 = vand.u32 4294901760, %v9207_v23  ;;  %v12521_v34 = vand.u32 4294901760, %v9213_v25  ;;  %v9245_v35 = vsub.f32 %v360_v7, %v9164_v10  ;;  %v9248_v36 = vand.u32 4294901760, %v9223_v27  ;;  %v9253_v37 = vld [vmem:[%s12500_s0 + $0x40] sm:$0xff] }
  0x1a   : > { %12781 = vst [vmem:[#allocation9_spill] sm:$0xff] %v9233_v30  ;;  %12782 = vst [vmem:[#allocation10_spill] sm:$0xff] %v9236_v31  ;;  %7567 = vmatprep.subr.mxu0 %v9164_v10  ;;  %v770_v38 = vsub.f32 %v9185_v18, %v12523_v29  ;;  %v12519_v39 = vand.u32 4294901760, %v9236_v31  ;;  %v9261_v40 = vsub.f32 %v344_v8, %v9166_v11  ;;  %v9264_v41 = vand.u32 4294901760, %v9228_v28  ;;  %v9293_v51 = vld [vmem:[%s12500_s0 + $0x38] sm:$0xff]  ;;  %v9303_v56 = vld [vmem:[%s12500_s0 + $0xb0] sm:$0xff] }
  0x1b   : > { %12783 = vst [vmem:[#allocation11_spill] sm:$0xff] %v9239_v32  ;;  %12784 = vst [vmem:[#allocation12_spill] sm:$0xff] %v9248_v36  ;;  %7568 = vmatpush3.msra.mxu0 %v9166_v11  ;;  %v658_v42 = vsub.f32 %v9207_v23, %v12522_v33  ;;  %v777_v43 = vsub.f32 %v9213_v25, %v12521_v34  ;;  %v12517_v44 = vand.u32 4294901760, %v9245_v35  ;;  %v9288_v50 = vand.u32 4294901760, %v9253_v37  ;;  %v9318_v61 = vld [vmem:[%s12500_s0 + $0x30] sm:$0xff]  ;;  %v9333_v2 = vld [vmem:[%s12500_s0 + $0xa8] sm:$0xff] }
  0x1c   : > { %12785 = vst [vmem:[#allocation13_spill] sm:$0xff] %v9264_v41  ;;  %v9275_v45 = vsub.f32 %v359_v12, %v9178_v15  ;;  %7569 = vmatprep.subr.mxu0 %v9178_v15  ;;  %v771_v47 = vand.u32 4294901760, %v770_v38  ;;  %v665_v48 = vsub.f32 %v9236_v31, %v12519_v39  ;;  %v12515_v49 = vand.u32 4294901760, %v9261_v40  ;;  %s7561_s14 = sshll.u32 %s9405_s21, 7  ;;  %v9476_v33 = vld [vmem:[%s12500_s0 + $0x88] sm:$0xff]  ;;  %s323_s24 = sand.u32 1, %s9024_s10  }
  0x1d   : > { %12786 = vst [vmem:[#allocation14_spill] sm:$0xff] %v9288_v50  ;;  %7570 = vmatpush3.msra.mxu0 %v9180_v16  ;;  %v659_v52 = vand.u32 4294901760, %v658_v42  ;;  %v778_v53 = vand.u32 4294901760, %v777_v43  ;;  %v784_v54 = vsub.f32 %v9245_v35, %v12517_v44  ;;  %v9310_v59 = vsub.f32 %v343_v13, %v9180_v16  ;;  %v9347_v13 = vld [vmem:[%s12500_s0 + $0x28] sm:$0xff]  ;;  %v9448_v44 = vld [vmem:[%s12500_s0 + $0x90] sm:$0xff]  ;;  %s9509_s25 = scalar_lea.vmem %s12508_s8, %s7561_s14  ;;  %s7537_s26 = sshll.u32 %s323_s24, 7 }
  0x1e   : > { %v12514_v55 = vand.u32 4294901760, %v9275_v45  ;;  %7571 = vmatprep.subr.mxu0 %v9182_v17  ;;  %7619 = vmatprep.subr.mxu1 %v771_v47  ;;  %v666_v57 = vand.u32 4294901760, %v665_v48  ;;  %v672_v58 = vsub.f32 %v9261_v40, %v12515_v49  ;;  %v9313_v60 = vand.u32 4294901760, %v9280_v46  ;;  %v9432_v49 = vld [vmem:[%s12500_s0 + $0x18] sm:$0xff]  ;;  %s12369_s27 = scalar_lea.vmem [#allocation2], %s7537_s26  ;;  %s7562_s28 = sshll.u32 %s9111_s13, 11 }
  0x1f   : > { %12787 = vst [vmem:[#allocation15_spill] sm:$0xff] %v9310_v59  ;;  %7572 = vmatpush3.msra.mxu0 %v9204_v22  ;;  %7620 = vmatpush3.msra.mxu1 %v659_v52  ;;  %v785_v62 = vand.u32 4294901760, %v784_v54  ;;  %v9325_v0 = vsub.f32 %v358_v14, %v9182_v17  ;;  %v9328_v1 = vand.u32 4294901760, %v9293_v51  ;;  %v12512_v7 = vand.u32 4294901760, %v9310_v59  ;;  %v9374_v52 = vld [vmem:[%s12500_s0 + $0xa0] sm:$0xff]  ;;  %s7471_s29 = sshll.u32 %s12369_s27, 4  ;;  %s12452_s17 = scalar_lea.hbm %s12509_s9, %s7562_s28  ;;  %s12454_s29 = int_to_ptr.vmem [resolvable:$true] %s7471_s29 }
  0x20   : > { %12788 = vst [vmem:[#allocation16_spill] sm:$0xff] %v9313_v60  ;;  %v791_v63 = vsub.f32 %v9275_v45, %v12514_v55  ;;  %7573 = vmatprep.subr.mxu0 %v9210_v24  ;;  %7621 = vmatprep.subr.mxu1 %v778_v53  ;;  %v673_v6 = vand.u32 4294901760, %v672_v58  ;;  %v9339_v8 = vsub.f32 %v9190_v19, %v9204_v22  ;;  %v9342_v12 = vand.u32 4294901760, %v9303_v56  ;;  %s12460_s13 = scalar_lea.sflag [#allocation3], %s323_s24  ;;  %s9037_s21 = smov [#allocation2]  }
  0x21   : > { %12789 = vst [vmem:[#allocation17_spill] sm:$0xff] %v9328_v1  ;;  %7574 = vmatpush3.msra.mxu0 %v9233_v30  ;;  %7622 = vmatpush3.msra.mxu1 %v666_v57  ;;  %v12511_v38 = vand.u32 4294901760, %v9325_v0  ;;  %v9354_v42 = vsub.f32 %v9195_v20, %v9210_v24  ;;  %v9357_v19 = vand.u32 4294901760, %v9318_v61  ;;  %v679_v43 = vsub.f32 %v9310_v59, %v12512_v7  ;;  %s8976_s22 = sshll.u32 %s9037_s21, 4  ;;  %s8977_s22 = int_to_ptr.vmem [resolvable:$false] %s8976_s22 }
  0x22   : > { %12790 = vst [vmem:[#allocation18_spill] sm:$0xff] %v9342_v12  ;;  %v792_v14 = vand.u32 4294901760, %v791_v63  ;;  %7575 = vmatprep.subr.mxu0 %v9239_v32  ;;  %7623 = vmatprep.subr.mxu1 %v785_v62  ;;  %v12510_v47 = vand.u32 4294901760, %v9339_v8  ;;  %v9366_v48 = vsub.f32 %v9200_v21, %v9233_v30  ;;  %v9369_v20 = vand.u32 4294901760, %v9333_v2  ;;  %v421_v30 = vld [vmem:[%s9509_s25] sm:$0xff]  ;;  %s8978_s23 = scalar_lea.vmem %s8977_s22, 4096  ;;  %p8979_p0 = scmp.lt.s32.totalorder %s12454_s29, %s8977_s22 }
  0x23   : > { %12791 = vst [vmem:[#allocation19_spill] sm:$0xff] %v9357_v19  ;;  %7576 = vmatpush3.msra.mxu0 %v9248_v36  ;;  %7624 = vmatpush3.msra.mxu1 %v673_v6  ;;  %v798_v53 = vsub.f32 %v9325_v0, %v12511_v38  ;;  %v12513_v21 = vand.u32 4294901760, %v9354_v42  ;;  %v9383_v54 = vsub.f32 %v9218_v26, %v9239_v32  ;;  %v9386_v57 = vand.u32 4294901760, %v9347_v13  ;;  %v9400_v26 = vld [vmem:[%s12500_s0 + $0x20] sm:$0xff]  ;;  %v9418_v38 = vld [vmem:[%s12500_s0 + $0x98] sm:$0xff] }
  0x24   : > { %12792 = vst [vmem:[#allocation20_spill] sm:$0xff] %v9369_v20  ;;  %7577 = vmatprep.subr.mxu0 %v9264_v41  ;;  %7625 = vmatprep.subr.mxu1 %v792_v14  ;;  %v680_v58 = vand.u32 4294901760, %v679_v43  ;;  %v686_v62 = vsub.f32 %v9339_v8, %v12510_v47  ;;  %v12516_v63 = vand.u32 4294901760, %v9366_v48  ;;  %v9395_v6 = vsub.f32 %v9223_v27, %v9248_v36 }
  0x25   : > { %12793 = vst [vmem:[#allocation21_spill] sm:$0xff] %v9383_v54  ;;  %12794 = vst [vmem:[#allocation22_spill] sm:$0xff] %v9386_v57  ;;  %7578 = vmatpush3.msra.mxu0 %v9288_v50  ;;  %v799_v14 = vand.u32 4294901760, %v798_v53  ;;  %v805_v43 = vsub.f32 %v9354_v42, %v12513_v21  ;;  %v12518_v47 = vand.u32 4294901760, %v9383_v54  ;;  %v9413_v27 = vand.u32 4294901760, %v9374_v52 }
  0x26   : > { %7626 = vmatpush3.msra.mxu1 %v680_v58  ;;  %7579 = vmatprep.subr.mxu0 %v9313_v60  ;;  %v687_v7 = vand.u32 4294901760, %v686_v62  ;;  %v693_v53 = vsub.f32 %v9366_v48, %v12516_v63  ;;  %v12520_v21 = vand.u32 4294901760, %v9395_v6  ;;  %v9427_v55 = vsub.f32 %v9228_v28, %v9264_v41 }
  0x27   : > { %12795 = vst [vmem:[#allocation23_spill] sm:$0xff] %v9413_v27  ;;  %7627 = vmatprep.subr.mxu1 %v799_v14  ;;  %7580 = vmatpush3.msra.mxu0 %v9328_v1  ;;  %v806_v58 = vand.u32 4294901760, %v805_v43  ;;  %v812_v62 = vsub.f32 %v9383_v54, %v12518_v47  ;;  %v9439_v63 = vand.u32 4294901760, %v9400_v26  ;;  %v9443_v28 = vsub.f32 %v9253_v37, %v9288_v50  ;;  %v9461_v37 = vld [vmem:[%s12500_s0 + $0x10] sm:$0xff] }
  0x28   : > { %7628 = vmatpush3.msra.mxu1 %v687_v7  ;;  %7581 = vmatprep.subr.mxu0 %v9342_v12  ;;  %v694_v14 = vand.u32 4294901760, %v693_v53  ;;  %v700_v43 = vsub.f32 %v9395_v6, %v12520_v21  ;;  %v12526_v47 = vand.u32 4294901760, %v9427_v55  ;;  %v9456_v39 = vand.u32 4294901760, %v9418_v38 }
  0x29   : > { %12796 = vst [vmem:[#allocation24_spill] sm:$0xff] %v9439_v63  ;;  %7629 = vmatprep.subr.mxu1 %v806_v58  ;;  %7582 = vmatpush3.msra.mxu0 %v9357_v19  ;;  %v813_v7 = vand.u32 4294901760, %v812_v62  ;;  %v12527_v53 = vand.u32 4294901760, %v9443_v28  ;;  %v9468_v21 = vsub.f32 %v9280_v46, %v9313_v60  ;;  %v9471_v34 = vand.u32 4294901760, %v9432_v49 }
  0x2a   : > { %12797 = vst [vmem:[#allocation25_spill] sm:$0xff] %v9456_v39  ;;  %7630 = vmatpush3.msra.mxu1 %v694_v14  ;;  %7583 = vmatprep.subr.mxu0 %v9369_v20  ;;  %v701_v58 = vand.u32 4294901760, %v700_v43  ;;  %v819_v62 = vsub.f32 %v9427_v55, %v12526_v47  ;;  %v9484_v46 = vsub.f32 %v9293_v51, %v9328_v1  ;;  %v9487_v29 = vand.u32 4294901760, %v9448_v44  ;;  %v9504_v51 = vld [vmem:[%s12500_s0 + $0x8] sm:$0xff] }
  0x2b   : > { %12798 = vst [vmem:[#allocation26_spill] sm:$0xff] %v9471_v34  ;;  %7631 = vmatprep.subr.mxu1 %v813_v7  ;;  %7584 = vmatpush3.msra.mxu0 %v9386_v57  ;;  %v707_v14 = vsub.f32 %v9443_v28, %v12527_v53  ;;  %v9496_v60 = vsub.f32 %v9303_v56, %v9342_v12  ;;  %v9499_v47 = vand.u32 4294901760, %v9461_v37  ;;  %v9518_v43 = vand.u32 4294901760, %v9476_v33  ;;  %v9523_v12 = vld [vmem:[%s12500_s0 + $0x80] sm:$0xff] }
  0x2c   : > { %12799 = vst [vmem:[#allocation27_spill] sm:$0xff] %v9487_v29  ;;  %7632 = vmatpush3.msra.mxu1 %v701_v58  ;;  %7585 = vmatprep.subr.mxu0 %v9413_v27  ;;  %v820_v7 = vand.u32 4294901760, %v819_v62  ;;  %v9515_v53 = vsub.f32 %v9318_v61, %v9357_v19  ;;  %v12802_v62 = vand.u32 4294901760, %v9468_v21  ;;  %v9532_v61 = vsub.f32 %v9333_v2, %v9369_v20  ;;  %v9549_v2 = vld [vmem:[%s12500_s0] sm:$0xff] }
  0x2d   : > { %12800 = vst [vmem:[#allocation28_spill] sm:$0xff] %v9499_v47  ;;  %12801 = vst [vmem:[#allocation29_spill] sm:$0xff] %v9518_v43  ;;  %7586 = vmatpush3.msra.mxu0 %v9439_v63  ;;  %v708_v58 = vand.u32 4294901760, %v707_v14  ;;  %v12804_v19 = vand.u32 4294901760, %v9484_v46  ;;  %v9540_v14 = vand.u32 4294901760, %v9504_v51  ;;  %v9558_v36 = vand.u32 4294901760, %v9523_v12 }
  0x2e   : > { %v826_v56 = vsub.f32 %v9468_v21, %v12802_v62  ;;  %12803 = vst [vmem:[#allocation30_spill] sm:$0xff] %v9532_v61  ;;  %7633 = vmatprep.subr.mxu1 %v820_v7  ;;  %7587 = vmatprep.subr.mxu0 %v9456_v39  ;;  %v9544_v62 = vsub.f32 %v9347_v13, %v9386_v57  ;;  %v422_v7 = vld [vmem:[%s9509_s25 + $0x8] sm:$0xff]  ;;  %v12552_v20 = vand.u32 4294901760, %v9532_v61  ;;  %v12808_v57 = vand.u32 4294901760, %v9515_v53 }
  0x2f   : > { %v714_v50 = vsub.f32 %v9484_v46, %v12804_v19  ;;  %12805 = vst [vmem:[#allocation31_spill] sm:$0xff] %v9540_v14  ;;  %7634 = vmatpush3.msra.mxu1 %v708_v58  ;;  %7588 = vmatpush3.msra.mxu0 %v9471_v34  ;;  %v12806_v19 = vand.u32 4294901760, %v9496_v60  ;;  %12807 = vst [vmem:[#allocation32_spill] sm:$0xff] %v9558_v36  ;;  %v9567_v58 = vsub.f32 %v9374_v52, %v9413_v27  ;;  %vm4046_vm2 = vcmask 31744  }
  0x30   : > { %v827_v1 = vand.u32 4294901760, %v826_v56  ;;  %7589 = vmatprep.subr.mxu0 %v9487_v29  ;;  %v721_v32 = vsub.f32 %v9515_v53, %v12808_v57  ;;  %v9575_v24 = vand.u32 4294901760, %v9549_v2  ;;  %v9577_v57 = vand.u32 4294901760, %v422_v7 }
  0x31   : > { %v833_v41 = vsub.f32 %v9496_v60, %v12806_v19  ;;  %v715_v13 = vand.u32 4294901760, %v714_v50  ;;  %7590 = vmatpush3.msra.mxu0 %v9499_v47  ;;  %v840_v50 = vsub.f32 %v9532_v61, %v12552_v20  ;;  %v12811_v52 = vand.u32 4294901760, %v9544_v62 }
  0x32   : > { %7635 = vmatprep.subr.mxu1 %v827_v1  ;;  %12809 = vst [vmem:[#allocation33_spill] sm:$0xff] %v9575_v24  ;;  %12810 = vst [vmem:[#allocation34_spill] sm:$0xff] %v9577_v57  ;;  %v722_v56 = vand.u32 4294901760, %v721_v32  ;;  %7591 = vmatprep.subr.mxu0 %v9518_v43  ;;  %v9586_v27 = vsub.f32 %v9400_v26, %v9439_v63  ;;  %v9590_v61 = vsub.f32 %v422_v7, %v9577_v57  ;;  %vm4071_vm3 = vcmask 1043456  }
  0x33   : > { %v834_v19 = vand.u32 4294901760, %v833_v41  ;;  %7636 = vmatpush3.msra.mxu1 %v715_v13  ;;  %v728_v41 = vsub.f32 %v9544_v62, %v12811_v52  ;;  %v841_v20 = vand.u32 4294901760, %v840_v50  ;;  %7592 = vmatpush3.msra.mxu0 %v9540_v14  ;;  %v9592_v32 = vand.u32 4294901760, %v421_v30  ;;  %v424_v52 = vld [vmem:[%s9509_s25 + $0x18] sm:$0xff] }
  0x34   : > { %12812 = vst [vmem:[#allocation35_spill] sm:$0xff] %v9590_v61  ;;  %v9596_v13 = vsub.f32 %v9418_v38, %v9456_v39  ;;  %7593 = vmatprep.subr.mxu0 %v9558_v36  ;;  %v12814_v26 = vand.u32 4294901760, %v9567_v58  ;;  %v9606_v7 = vsub.f32 %v9432_v49, %v9471_v34  ;;  %v9610_v38 = vand.u32 4294901760, %v9590_v61  ;;  %879 = vmatprep.mubr.f32.mxu1 %v9577_v57 }
  0x35   : > { %7637 = vmatprep.subr.mxu1 %v834_v19  ;;  %12813 = vst [vmem:[#allocation36_spill] sm:$0xff] %v9592_v32  ;;  %v729_v1 = vand.u32 4294901760, %v728_v41  ;;  %7594 = vmatpush3.msra.mxu0 %v9575_v24  ;;  %v12818_v49 = vand.u32 4294901760, %v9586_v27  ;;  %v9625_v39 = vand.u32 4294901760, %v424_v52  ;;  %v9646_v63 = vsub.f32 %v9461_v37, %v9499_v47  ;;  %v426_v37 = vld [vmem:[%s9509_s25 + $0x28] sm:$0xff] }
  0x36   : > { %7638 = vmatpush3.msra.mxu1 %v722_v56  ;;  %v847_v19 = vsub.f32 %v9567_v58, %v12814_v26  ;;  %12815 = vst [vmem:[#allocation37_spill] sm:$0xff] %v9606_v7  ;;  %12816 = vst [vmem:[#allocation38_spill] sm:$0xff] %v9610_v38  ;;  %v9613_v56 = vsub.f32 %v421_v30, %v9592_v32  ;;  %v9618_v26 = vsub.f32 %v9448_v44, %v9487_v29  ;;  %v423_v29 = vld [vmem:[%s9509_s25 + $0x10] sm:$0xff]  ;;  %vm5692_vm4 = vcmask 130048  }
  0x37   : > { %7639 = vmatprep.subr.mxu1 %v841_v20  ;;  %v735_v20 = vsub.f32 %v9586_v27, %v12818_v49  ;;  %7675 = vmatprep.subr.mxu0 %v9185_v18  ;;  %v12570_v34 = vand.u32 4294901760, %v9606_v7  ;;  %12819 = vst [vmem:[#allocation40_spill] sm:$0xff] %v9625_v39  ;;  %v536_v30 = vsub.f32 %v9590_v61, %v9610_v38  ;;  %v12821_v44 = vand.u32 4294901760, %v9596_v13 }
  0x38   : > { %12817 = vst [vmem:[#allocation39_spill] sm:$0xff] %v9613_v56  ;;  %7640 = vmatpush3.msra.mxu1 %v729_v1  ;;  %v848_v50 = vand.u32 4294901760, %v847_v19  ;;  %v9630_v41 = vand.u32 4294901760, %v9613_v56  ;;  %v9642_v38 = vsub.f32 %v424_v52, %v9625_v39  ;;  %v12574_v52 = vand.u32 4294901760, %v9646_v63 }
  0x39   : > { %v854_v1 = vsub.f32 %v9596_v13, %v12821_v44  ;;  %v736_v49 = vand.u32 4294901760, %v735_v20  ;;  %v742_v18 = vsub.f32 %v9606_v7, %v12570_v34  ;;  %v9648_v44 = vand.u32 4294901760, %v536_v30 }
  0x3a   : > { %12820 = vst [vmem:[#allocation41_spill] sm:$0xff] %v9630_v41  ;;  %7641 = vmatprep.subr.mxu1 %v848_v50  ;;  %12822 = vst [vmem:[#allocation42_spill] sm:$0xff] %v9642_v38  ;;  %v542_v19 = vsub.f32 %v9613_v56, %v9630_v41  ;;  %v12824_v50 = vand.u32 4294901760, %v9618_v26  ;;  %v9656_v34 = vand.u32 4294901760, %v9642_v38  ;;  %v9659_v7 = vand.u32 4294901760, %v423_v29 }
  0x3b   : > { %12823 = vst [vmem:[#allocation43_spill] sm:$0xff] %v9648_v44  ;;  %v855_v61 = vand.u32 4294901760, %v854_v1  ;;  %7642 = vmatpush3.msra.mxu1 %v736_v49  ;;  %v743_v57 = vand.u32 4294901760, %v742_v18  ;;  %538 = vmatprep.mubr.f32.mxu0 %v9648_v44  ;;  %v9667_v49 = vsub.f32 %v9476_v33, %v9518_v43  ;;  %v9671_v18 = vsub.f32 %v9504_v51, %v9540_v14  ;;  %v430_v14 = vld [vmem:[%s9509_s25 + $0x48] sm:$0xff] }
  0x3c   : > { %v861_v20 = vsub.f32 %v9618_v26, %v12824_v50  ;;  %12825 = vst [vmem:[#allocation44_spill] sm:$0xff] %v9656_v34  ;;  %12826 = vst [vmem:[#allocation45_spill] sm:$0xff] %v9659_v7  ;;  %v9663_v30 = vand.u32 4294901760, %v542_v19  ;;  %v551_v50 = vsub.f32 %v9642_v38, %v9656_v34  ;;  %v749_v19 = vsub.f32 %v9646_v63, %v12574_v52  ;;  %v425_v52 = vld [vmem:[%s9509_s25 + $0x20] sm:$0xff] }
  0x3d   : > { %7643 = vmatprep.subr.mxu1 %v855_v61  ;;  %12828 = vst [vmem:[#allocation47_spill] sm:$0xff] %v9671_v18  ;;  %v9679_v61 = vsub.f32 %v423_v29, %v9659_v7  ;;  %v12582_v33 = vand.u32 4294901760, %v9667_v49  ;;  %v9692_v44 = vsub.f32 %v9549_v2, %v9575_v24  ;;  %v428_v29 = vld [vmem:[%s9509_s25 + $0x38] sm:$0xff]  ;;  %v12835_v34 = vand.u32 4294901760, %v9671_v18 }
  0x3e   : > { %12827 = vst [vmem:[#allocation46_spill] sm:$0xff] %v9663_v30  ;;  %v862_v1 = vand.u32 4294901760, %v861_v20  ;;  %7644 = vmatpush3.msra.mxu1 %v743_v57  ;;  %v9683_v20 = vsub.f32 %v9523_v12, %v9558_v36  ;;  %544 = vmatmul.mubr.f32.vlgmr.msra.gmra.mxu0 %v9663_v30  ;;  %v9688_v57 = vand.u32 4294901760, %v426_v37  ;;  %v9697_v12 = vand.u32 4294901760, %v551_v50 }
  0x3f   : > { %12829 = vst [vmem:[#allocation48_spill] sm:$0xff] %v9679_v61  ;;  %12832 = vst [vmem:[#allocation51_spill] sm:$0xff] %v9692_v44  ;;  %7676 = vmatpush3.msra.mxu0 %v9207_v23  ;;  %v750_v30 = vand.u32 4294901760, %v749_v19  ;;  %v868_v2 = vsub.f32 %v9667_v49, %v12582_v33  ;;  %v756_v41 = vsub.f32 %v9671_v18, %v12835_v34  ;;  %v9720_v36 = vand.u32 4294901760, %v425_v52 }
  0x40   : > { %12830 = vst [vmem:[#allocation49_spill] sm:$0xff] %v9683_v20  ;;  %7645 = vmatprep.subr.mxu1 %v862_v1  ;;  %12831 = vst [vmem:[#allocation50_spill] sm:$0xff] %v9688_v57  ;;  %v9700_v1 = vand.u32 4294901760, %v9679_v61  ;;  %7677 = vmatprep.subr.mxu0 %v9213_v25  ;;  %v9711_v50 = vsub.f32 %v426_v37, %v9688_v57  ;;  %v12837_v24 = vand.u32 4294901760, %v9683_v20  ;;  %v9722_v34 = vand.u32 4294901760, %v428_v29  ;;  %v427_v37 = vld [vmem:[%s9509_s25 + $0x30] sm:$0xff] }
  0x41   : > { %12833 = vst [vmem:[#allocation52_spill] sm:$0xff] %v9697_v12  ;;  %553 = vmatprep.mubr.f32.mxu0 %v9697_v12  ;;  %7646 = vmatpush3.msra.mxu1 %v750_v30  ;;  %12838 = vst [vmem:[#allocation55_spill] sm:$0xff] %v9720_v36  ;;  %v869_v19 = vand.u32 4294901760, %v868_v2  ;;  %v757_v43 = vand.u32 4294901760, %v756_v41  ;;  %v12841_v12 = vand.u32 4294901760, %v9692_v44  ;;  %v9739_v25 = vsub.f32 %v425_v52, %v9720_v36  ;;  %v431_v41 = vld [vmem:[%s9509_s25 + $0x50] sm:$0xff] }
  0x42   : > { %12834 = vst [vmem:[#allocation53_spill] sm:$0xff] %v9700_v1  ;;  %12836 = vst [vmem:[#allocation54_spill] sm:$0xff] %v9711_v50  ;;  %v557_v51 = vsub.f32 %v9679_v61, %v9700_v1  ;;  %v875_v33 = vsub.f32 %v9683_v20, %v12837_v24  ;;  %7678 = vmatpush3.msra.mxu0 %v9236_v31  ;;  %v9728_v30 = vand.u32 4294901760, %v9711_v50  ;;  %v429_v61 = vld [vmem:[%s9509_s25 + $0x40] sm:$0xff]  ;;  %v432_v24 = vld [vmem:[%s9509_s25 + $0x58] sm:$0xff]  ;;  %v9748_v23 = vand.u32 4294901760, %v427_v37 }
  0x43   : > { %12839 = vst [vmem:[#allocation56_spill] sm:$0xff] %v9722_v34  ;;  %v763_v1 = vsub.f32 %v9692_v44, %v12841_v12  ;;  %7679 = vmatprep.subr.mxu0 %v9245_v35  ;;  %12843 = vst [vmem:[#allocation59_spill] sm:$0xff] %v9739_v25  ;;  %v9742_v2 = vsub.f32 %v428_v29, %v9722_v34  ;;  %7647 = vmatprep.subr.mxu1 %v869_v19  ;;  %v9754_v52 = vand.u32 4294901760, %v9739_v25 }
  0x44   : > { %12840 = vst [vmem:[#allocation57_spill] sm:$0xff] %v9728_v30  ;;  %v9735_v47 = vand.u32 4294901760, %v557_v51  ;;  %v876_v38 = vand.u32 4294901760, %v875_v33  ;;  %7680 = vmatpush3.msra.mxu0 %v9261_v40  ;;  %v566_v12 = vsub.f32 %v9711_v50, %v9728_v30  ;;  %12845 = vst [vmem:[#allocation61_spill] sm:$0xff] %v9748_v23  ;;  %v9750_v51 = vand.u32 4294901760, %v430_v14  ;;  %7648 = vmatpush3.msra.mxu1 %v757_v43 }
  0x45   : > { %12844 = vst [vmem:[#allocation60_spill] sm:$0xff] %v9742_v2  ;;  %v764_v31 = vand.u32 4294901760, %v763_v1  ;;  %12847 = vst [vmem:[#allocation63_spill] sm:$0xff] %v9754_v52  ;;  %v9757_v33 = vand.u32 4294901760, %v9742_v2  ;;  %v9759_v29 = vand.u32 4294901760, %v429_v61  ;;  %v9761_v19 = vand.u32 4294901760, %v432_v24  ;;  %7681 = vmatprep.subr.mxu0 %v9275_v45 }
  0x46   : > { %12842 = vst [vmem:[#allocation58_spill] sm:$0xff] %v9735_v47  ;;  %12846 = vst [vmem:[#allocation62_spill] sm:$0xff] %v9750_v51  ;;  %559 = vmatmul.mubr.f32.gmra.mxu0 %v9735_v47  ;;  %7649 = vmatprep.subr.mxu1 %v876_v38  ;;  %v9764_v1 = vand.u32 4294901760, %v566_v12  ;;  %v9767_v30 = vsub.f32 %v427_v37, %v9748_v23  ;;  %v9770_v43 = vsub.f32 %v430_v14, %v9750_v51  ;;  %v434_v37 = vld [vmem:[%s9509_s25 + $0x68] sm:$0xff] }
  0x47   : > { %12848 = vst [vmem:[#allocation64_spill] sm:$0xff] %v9757_v33  ;;  %12849 = vst [vmem:[#allocation65_spill] sm:$0xff] %v9759_v29  ;;  %v9772_v47 = vand.u32 4294901760, %v431_v41  ;;  %7650 = vmatpush3.msra.mxu1 %v764_v31  ;;  %7682 = vmatpush3.msra.mxu0 %v9310_v59  ;;  %v572_v50 = vsub.f32 %v9739_v25, %v9754_v52  ;;  %v581_v38 = vsub.f32 %v9742_v2, %v9757_v33 }
  0x48   : > { %12850 = vst [vmem:[#allocation66_spill] sm:$0xff] %v9761_v19  ;;  %12851 = vst [vmem:[#allocation67_spill] sm:$0xff] %v9764_v1  ;;  %v9780_v12 = vsub.f32 %v429_v61, %v9759_v29  ;;  %568 = vmatprep.mubr.f32.mxu0 %v9764_v1  ;;  %881 = vmatmul.mubr.f32.vlgmr.msra.gmra.mxu1 %v9592_v32  ;;  %v9786_v14 = vand.u32 4294901760, %v9767_v30  ;;  %v9789_v31 = vand.u32 4294901760, %v9770_v43  ;;  %v433_v32 = vld [vmem:[%s9509_s25 + $0x60] sm:$0xff] }
  0x49   : > { %12852 = vst [vmem:[#allocation68_spill] sm:$0xff] %v9767_v30  ;;  %12853 = vst [vmem:[#allocation69_spill] sm:$0xff] %v9770_v43  ;;  %v9792_v59 = vsub.f32 %v432_v24, %v9761_v19  ;;  %v9794_v52 = vand.u32 4294901760, %v572_v50  ;;  %7683 = vmatprep.subr.mxu0 %v9325_v0  ;;  %7731 = vmatprep.subr.mxu1 %v9147_v3  ;;  %v9798_v61 = vand.u32 4294901760, %v581_v38  ;;  %v9813_v38 = vand.u32 4294901760, %v434_v37 }
  0x4a   : > { %12854 = vst [vmem:[#allocation70_spill] sm:$0xff] %v9772_v47  ;;  %12855 = vst [vmem:[#allocation71_spill] sm:$0xff] %v9780_v12  ;;  %v9801_v1 = vand.u32 4294901760, %v9780_v12  ;;  %7684 = vmatpush3.msra.mxu0 %v9339_v8  ;;  %7732 = vmatpush3.msra.mxu1 %v9149_v4  ;;  %v587_v24 = vsub.f32 %v9767_v30, %v9786_v14  ;;  %v596_v50 = vsub.f32 %v9770_v43, %v9789_v31 }
  0x4b   : > { %12856 = vst [vmem:[#allocation72_spill] sm:$0xff] %v9786_v14  ;;  %12857 = vst [vmem:[#allocation73_spill] sm:$0xff] %v9789_v31  ;;  %v9811_v33 = vsub.f32 %v431_v41, %v9772_v47  ;;  %574 = vmatmul.mubr.f32.gmra.mxu0 %v9794_v52  ;;  %7685 = vmatprep.subr.mxu0 %v9354_v42  ;;  %v9824_v31 = vand.u32 4294901760, %v9792_v59  ;;  %v9826_v41 = vand.u32 4294901760, %v433_v32 }
  0x4c   : > { %12858 = vst [vmem:[#allocation74_spill] sm:$0xff] %v9792_v59  ;;  %12859 = vst [vmem:[#allocation75_spill] sm:$0xff] %v9794_v52  ;;  %7733 = vmatprep.subr.mxu1 %v9151_v5  ;;  %583 = vmatprep.mubr.f32.mxu0 %v9798_v61  ;;  %v9819_v2 = vand.u32 4294901760, %v587_v24  ;;  %v602_v14 = vsub.f32 %v9780_v12, %v9801_v1  ;;  %v436_v52 = vld [vmem:[%s9509_s25 + $0x78] sm:$0xff] }
  0x4d   : > { %12860 = vst [vmem:[#allocation76_spill] sm:$0xff] %v9798_v61  ;;  %12861 = vst [vmem:[#allocation77_spill] sm:$0xff] %v9801_v1  ;;  %886 = vmatprep.mubr.f32.mxu1 %v9625_v39  ;;  %7686 = vmatpush3.msra.mxu0 %v9366_v48  ;;  %v9833_v61 = vand.u32 4294901760, %v596_v50  ;;  %v9836_v24 = vand.u32 4294901760, %v9811_v33  ;;  %v9839_v1 = vsub.f32 %v434_v37, %v9813_v38  ;;  %v435_v39 = vld [vmem:[%s9509_s25 + $0x70] sm:$0xff] }
  0x4e   : > { %12862 = vst [vmem:[#allocation78_spill] sm:$0xff] %v9811_v33  ;;  %12863 = vst [vmem:[#allocation79_spill] sm:$0xff] %v9813_v38  ;;  %7734 = vmatpush3.msra.mxu1 %v9162_v9  ;;  %7687 = vmatprep.subr.mxu0 %v9383_v54  ;;  %v9846_v12 = vand.u32 4294901760, %v602_v14  ;;  %v611_v50 = vsub.f32 %v9792_v59, %v9824_v31  ;;  %v9851_v43 = vsub.f32 %v433_v32, %v9826_v41 }
  0x4f   : > { %12864 = vst [vmem:[#allocation80_spill] sm:$0xff] %v9819_v2  ;;  %12865 = vst [vmem:[#allocation81_spill] sm:$0xff] %v9824_v31  ;;  %589 = vmatmul.mubr.f32.gmra.mxu0 %v9819_v2  ;;  %888 = vmatmul.mubr.f32.gmra.mxu1 %v9659_v7  ;;  %v9853_v54 = vand.u32 4294901760, %v436_v52  ;;  %v617_v37 = vsub.f32 %v9811_v33, %v9836_v24  ;;  %v9862_v14 = vand.u32 4294901760, %v9839_v1  ;;  %v9864_v2 = vand.u32 4294901760, %v435_v39 }
  0x50   : > { %12866 = vst [vmem:[#allocation82_spill] sm:$0xff] %v9826_v41  ;;  %12867 = vst [vmem:[#allocation83_spill] sm:$0xff] %v9833_v61  ;;  %7735 = vmatprep.subr.mxu1 %v9164_v10  ;;  %7688 = vmatpush3.msra.mxu0 %v9395_v6  ;;  %v9870_v32 = vand.u32 4294901760, %v611_v50 }
  0x51   : > { %12868 = vst [vmem:[#allocation84_spill] sm:$0xff] %v9836_v24  ;;  %12869 = vst [vmem:[#allocation85_spill] sm:$0xff] %v9839_v1  ;;  %7736 = vmatpush3.msra.mxu1 %v9166_v11  ;;  %7689 = vmatprep.subr.mxu0 %v9427_v55  ;;  %v9876_v7 = vsub.f32 %v436_v52, %v9853_v54  ;;  %v626_v50 = vsub.f32 %v9839_v1, %v9862_v14  ;;  %v12880_v52 = vld [vmem:[#allocation7_spill] sm:$0xff] }
  0x52   : > { %12870 = vst [vmem:[#allocation86_spill] sm:$0xff] %v9846_v12  ;;  %12871 = vst [vmem:[#allocation87_spill] sm:$0xff] %v9851_v43  ;;  %7737 = vmatprep.subr.mxu1 %v9178_v15  ;;  %598 = vmatprep.mubr.f32.mxu0 %v9833_v61  ;;  %v9873_v61 = vand.u32 4294901760, %v9851_v43 }
  0x53   : > { %12872 = vst [vmem:[#allocation88_spill] sm:$0xff] %v9853_v54  ;;  %12873 = vst [vmem:[#allocation89_spill] sm:$0xff] %v9862_v14  ;;  %893 = vmatprep.mubr.f32.mxu1 %v9688_v57  ;;  %7690 = vmatpush3.msra.mxu0 %v9443_v28  ;;  %v9882_v57 = vand.u32 4294901760, %v617_v37  ;;  %v9896_v37 = vand.u32 4294901760, %v9876_v7  ;;  %v9902_v14 = vand.u32 4294901760, %v626_v50  ;;  %v12889_v50 = vld [vmem:[#allocation13_spill] sm:$0xff] }
  0x54   : > { %12874 = vst [vmem:[#allocation90_spill] sm:$0xff] %v9864_v2  ;;  %7738 = vmatpush3.msra.mxu1 %v9180_v16  ;;  %604 = vmatmul.mubr.f32.gmra.mxu0 %v9846_v12  ;;  %12875 = vst [vmem:[#allocation91_spill] sm:$0xff] %v9870_v32  ;;  %v9887_v12 = vsub.f32 %v435_v39, %v9864_v2  ;;  %v12882_v39 = vld [vmem:[#allocation9_spill] sm:$0xff] }
  0x55   : > { %12876 = vst [vmem:[#allocation92_spill] sm:$0xff] %v9873_v61  ;;  %12877 = vst [vmem:[#allocation93_spill] sm:$0xff] %v9876_v7  ;;  %895 = vmatmul.mubr.f32.gmra.mxu1 %v9720_v36  ;;  %7691 = vmatprep.subr.mxu0 %v9468_v21  ;;  %v632_v36 = vsub.f32 %v9851_v43, %v9873_v61  ;;  %v12886_v61 = vld [vmem:[#allocation11_spill] sm:$0xff]  ;;  %v641_v31 = vsub.f32 %v9876_v7, %v9896_v37  ;;  %v12888_v43 = vld [vmem:[#allocation12_spill] sm:$0xff] }
  0x56   : > { %7739 = vmatprep.subr.mxu1 %v9182_v17  ;;  %7692 = vmatpush3.msra.mxu0 %v9484_v46  ;;  %12878 = vst [vmem:[#allocation94_spill] sm:$0xff] %v9882_v57  ;;  %12879 = vst [vmem:[#allocation95_spill] sm:$0xff] %v9887_v12  ;;  %v9905_v24 = vand.u32 4294901760, %v9887_v12 }
  0x57   : > { %7740 = vmatpush3.msra.mxu1 %v9204_v22  ;;  %7693 = vmatprep.subr.mxu0 %v9496_v60  ;;  %12881 = vst [vmem:[#allocation7_spill] sm:$0xff] %v9896_v37  ;;  %12883 = vst [vmem:[#allocation9_spill] sm:$0xff] %v9902_v14  ;;  %v12892_v37 = vld [vmem:[#allocation16_spill] sm:$0xff] }
  0x58   : > { %7741 = vmatprep.subr.mxu1 %v12880_v52  ;;  %613 = vmatprep.mubr.f32.mxu0 %v9870_v32  ;;  %12884 = vst [vmem:[#allocation96_spill] sm:$0xff] %v9905_v24  ;;  %v12885_v32 = vld [vmem:[#allocation30_spill] sm:$0xff] }
  0x59   : > { %900 = vmatprep.mubr.f32.mxu1 %v9722_v34  ;;  %7694 = vmatpush3.msra.mxu0 %v9515_v53  ;;  %v9911_v34 = vand.u32 4294901760, %v632_v36  ;;  %v12890_v36 = vld [vmem:[#allocation14_spill] sm:$0xff] }
  0x5a   : > { %7742 = vmatpush3.msra.mxu1 %v12882_v39  ;;  %619 = vmatmul.mubr.f32.gmra.mxu0 %v9882_v57  ;;  %v647_v57 = vsub.f32 %v9887_v12, %v9905_v24  ;;  %v12895_v24 = vld [vmem:[#allocation17_spill] sm:$0xff] }
  0x5b   : > { %902 = vmatmul.mubr.f32.gmra.mxu1 %v9748_v23  ;;  %7695 = vmatprep.subr.mxu0 %v12885_v32  ;;  %12887 = vst [vmem:[#allocation30_spill] sm:$0xff] %v9911_v34  ;;  %v9925_v23 = vand.u32 4294901760, %v641_v31  ;;  %v12897_v31 = vld [vmem:[#allocation19_spill] sm:$0xff] }
  0x5c   : > { %7743 = vmatprep.subr.mxu1 %v12886_v61  ;;  %7696 = vmatpush3.msra.mxu0 %v9544_v62  ;;  %v9931_v7 = vand.u32 4294901760, %v647_v57  ;;  %v12898_v57 = vld [vmem:[#allocation20_spill] sm:$0xff] }
  0x5d   : > { %7744 = vmatpush3.msra.mxu1 %v12888_v43  ;;  %7697 = vmatprep.subr.mxu0 %v9567_v58  ;;  %12891 = vst [vmem:[#allocation11_spill] sm:$0xff] %v9925_v23 }
  0x5e   : > { %7745 = vmatprep.subr.mxu1 %v12889_v50  ;;  %628 = vmatprep.mubr.f32.mxu0 %v9902_v14  ;;  %v12893_v14 = vld [vmem:[#allocation37_spill] sm:$0xff]  ;;  %12894 = vst [vmem:[#allocation12_spill] sm:$0xff] %v9931_v7 }
  0x5f   : > { %907 = vmatprep.mubr.f32.mxu1 %v9750_v51  ;;  %7698 = vmatpush3.msra.mxu0 %v9586_v27  ;;  %v12896_v51 = vld [vmem:[#allocation18_spill] sm:$0xff] }
  0x60   : > { %7746 = vmatpush3.msra.mxu1 %v12890_v36  ;;  %634 = vmatmul.mubr.f32.gmra.mxu0 %v9911_v34  ;;  %v12899_v34 = vld [vmem:[#allocation22_spill] sm:$0xff] }
  0x61   : > { %909 = vmatmul.mubr.f32.gmra.mxu1 %v9759_v29  ;;  %7699 = vmatprep.subr.mxu0 %v9596_v13  ;;  %v12904_v29 = vld [vmem:[#allocation5_spill] sm:$0xff] }
  0x62   : > { %7747 = vmatprep.subr.mxu1 %v12892_v37  ;;  %7700 = vmatpush3.msra.mxu0 %v12893_v14 }
  0x63   : > { %7748 = vmatpush3.msra.mxu1 %v12895_v24  ;;  %7701 = vmatprep.subr.mxu0 %v9618_v26 }
  0x64   : > { %7749 = vmatprep.subr.mxu1 %v12896_v51  ;;  %643 = vmatprep.mubr.f32.mxu0 %v9925_v23  ;;  %v12900_v23 = vld [vmem:[#allocation23_spill] sm:$0xff] }
  0x65   : > { %914 = vmatprep.mubr.f32.mxu1 %v9761_v19  ;;  %7702 = vmatpush3.msra.mxu0 %v9646_v63  ;;  %v12901_v19 = vld [vmem:[#allocation35_spill] sm:$0xff] }
  0x66   : > { %7750 = vmatpush3.msra.mxu1 %v12897_v31  ;;  %649 = vmatmul.mubr.f32.gmra.mxu0 %v9931_v7  ;;  %v12902_v7 = vld [vmem:[#allocation24_spill] sm:$0xff] }
  0x67   : > { %916 = vmatmul.mubr.f32.gmra.mxu1 %v9772_v47  ;;  %7703 = vmatprep.subr.mxu0 %v9667_v49  ;;  %v12903_v47 = vld [vmem:[#allocation25_spill] sm:$0xff] }
  0x68   : > { %7751 = vmatprep.subr.mxu1 %v12898_v57  ;;  %7704 = vmatpush3.msra.mxu0 %v9671_v18 }
  0x69   : > { %7752 = vmatpush3.msra.mxu1 %v12899_v34  ;;  %7705 = vmatprep.subr.mxu0 %v9683_v20  ;;  %v12905_v34 = vand.u32 4294901760, %v12904_v29  ;;  %v12906_v20 = vld [vmem:[#allocation26_spill] sm:$0xff]  ;;  %v12920_v29 = vand.u32 4294901760, %v9261_v40  ;;  %v12929_v40 = vand.u32 4294901760, %v9325_v0  ;;  %v12936_v0 = vld [vmem:[#allocation21_spill] sm:$0xff] }
  0x6a   : > { %7753 = vmatprep.subr.mxu1 %v12900_v23  ;;  %921 = vmatprep.mubr.f32.mxu1 %v9813_v38  ;;  %v12907_v23 = vld [vmem:[#allocation6_spill] sm:$0xff]  ;;  %v12909_v38 = vld [vmem:[#allocation27_spill] sm:$0xff] }
  0x6b   : > { %7706 = vmatpush3.msra.mxu0 %v9692_v44  ;;  %1065 = vmatprep.mubr.f32.mxu0 %v12901_v19  ;;  %v12908_v18 = vand.u32 4294901760, %v12907_v23  ;;  %v12910_v44 = vld [vmem:[#allocation8_spill] sm:$0xff]  ;;  %v12917_v23 = vld [vmem:[#allocation29_spill] sm:$0xff] }
  0x6c   : > { %7754 = vmatpush3.msra.mxu1 %v12902_v7  ;;  %1068 = vmatmul.mubr.f32.vlgmr.msra.gmra.mxu0 %v9613_v56  ;;  %v12911_v19 = vand.u32 4294901760, %v12910_v44  ;;  %v12912_v56 = vld [vmem:[#allocation42_spill] sm:$0xff]  ;;  %v12919_v44 = vld [vmem:[#allocation31_spill] sm:$0xff] }
  0x6d   : > { %923 = vmatmul.mubr.f32.gmra.mxu1 %v9826_v41  ;;  %7755 = vmatprep.subr.mxu1 %v12903_v47  ;;  %v12913_v41 = vld [vmem:[#allocation28_spill] sm:$0xff]  ;;  %v12914_v47 = vld [vmem:[#allocation10_spill] sm:$0xff] }
  0x6e   : > { %7787 = vmatprep.subr.mxu0 %v12905_v34  ;;  %7756 = vmatpush3.msra.mxu1 %v12906_v20  ;;  %v12915_v7 = vand.u32 4294901760, %v12914_v47  ;;  %v12916_v34 = vld [vmem:[#allocation48_spill] sm:$0xff]  ;;  %v12923_v47 = vld [vmem:[#allocation54_spill] sm:$0xff] }
  0x6f   : > { %7788 = vmatpush3.msra.mxu0 %v12908_v18  ;;  %7757 = vmatprep.subr.mxu1 %v12909_v38  ;;  %v12918_v18 = vand.u32 4294901760, %v9245_v35  ;;  %v12928_v35 = vld [vmem:[#allocation41_spill] sm:$0xff] }
  0x70   : > { %7789 = vmatprep.subr.mxu0 %v12911_v19  ;;  %928 = vmatprep.mubr.f32.mxu1 %v9853_v54  ;;  %v12921_v19 = vld [vmem:[#allocation32_spill] sm:$0xff] }
  0x71   : > { %1074 = vmatprep.mubr.f32.mxu0 %v12912_v56  ;;  %7758 = vmatpush3.msra.mxu1 %v12913_v41  ;;  %v12922_v56 = vand.u32 4294901760, %v9275_v45  ;;  %v12930_v45 = vand.u32 4294901760, %v9339_v8  ;;  %v12939_v8 = vand.u32 4294901760, %v9427_v55  ;;  %v12947_v55 = vand.u32 4294901760, %v9496_v60 }
  0x72   : > { %7790 = vmatpush3.msra.mxu0 %v12915_v7  ;;  %930 = vmatmul.mubr.f32.gmra.mxu1 %v9864_v2  ;;  %v12924_v7 = vld [vmem:[#allocation33_spill] sm:$0xff]  ;;  %v12926_v2 = vld [vmem:[#allocation15_spill] sm:$0xff]  ;;  %v12952_v60 = vand.u32 4294901760, %v9544_v62 }
  0x73   : > { %1077 = vmatmul.mubr.f32.gmra.mxu0 %v12916_v34  ;;  %7759 = vmatprep.subr.mxu1 %v12917_v23  ;;  %v12925_v34 = vld [vmem:[#allocation38_spill] sm:$0xff]  ;;  %v12927_v54 = vand.u32 4294901760, %v12926_v2  ;;  %v12933_v2 = vld [vmem:[#allocation44_spill] sm:$0xff]  ;;  %v12957_v62 = vld [vmem:[#allocation77_spill] sm:$0xff] }
  0x74   : > { %7791 = vmatprep.subr.mxu0 %v12918_v18  ;;  %7760 = vmatpush3.msra.mxu1 %v12919_v44  ;;  %v12934_v18 = vand.u32 4294901760, %v9366_v48  ;;  %v12942_v48 = vand.u32 4294901760, %v9443_v28  ;;  %v12949_v28 = vand.u32 4294901760, %v9515_v53  ;;  %v12954_v53 = vld [vmem:[#allocation73_spill] sm:$0xff] }
  0x75   : > { %7792 = vmatpush3.msra.mxu0 %v12920_v29  ;;  %7761 = vmatprep.subr.mxu1 %v12921_v19 }
  0x76   : > { %7793 = vmatprep.subr.mxu0 %v12922_v56  ;;  %1083 = vmatprep.mubr.f32.mxu0 %v12923_v47  ;;  %v12931_v56 = vand.u32 4294901760, %v9354_v42  ;;  %v12941_v42 = vld [vmem:[#allocation57_spill] sm:$0xff] }
  0x77   : > { %7762 = vmatpush3.msra.mxu1 %v12924_v7  ;;  %1235 = vmatprep.mubr.f32.mxu1 %v12925_v34  ;;  %v13014_v34 = vld [vmem:[#allocation65_spill] sm:$0xff] }
  0x78   : > { %7794 = vmatpush3.msra.mxu0 %v12927_v54  ;;  %1239 = vmatmul.mubr.f32.vlgmr.msra.gmra.mxu1 %v12928_v35  ;;  %v12932_v54 = vld [vmem:[#allocation60_spill] sm:$0xff]  ;;  %v368_v35 = vld [vmem:[%s12501_s1 + $0x28] sm:$0xff] }
  0x79   : > { %1086 = vmatmul.mubr.f32.gmra.mxu0 %v9739_v25  ;;  %7795 = vmatprep.subr.mxu0 %v12929_v40  ;;  %v12968_v40 = vld [vmem:[#allocation22_spill] sm:$0xff] }
  0x7a   : > { %7843 = vmatprep.subr.mxu1 %v9147_v3  ;;  %7796 = vmatpush3.msra.mxu0 %v12930_v45  ;;  %v12935_v3 = vld [vmem:[#allocation53_spill] sm:$0xff] }
  0x7b   : > { %7844 = vmatpush3.msra.mxu1 %v9149_v4  ;;  %7797 = vmatprep.subr.mxu0 %v12931_v56  ;;  %v12937_v4 = vand.u32 4294901760, %v12936_v0  ;;  %v12969_v45 = vld [vmem:[#allocation49_spill] sm:$0xff] }
  0x7c   : > { %7845 = vmatprep.subr.mxu1 %v9151_v5  ;;  %1092 = vmatprep.mubr.f32.mxu0 %v12932_v54  ;;  %v12938_v5 = vand.u32 4294901760, %v9395_v6  ;;  %v12944_v6 = vld [vmem:[#allocation63_spill] sm:$0xff]  ;;  %v12970_v56 = vand.u32 4294901760, %v12969_v45  ;;  %v12972_v0 = vld [vmem:[#allocation89_spill] sm:$0xff] }
  0x7d   : > { %1246 = vmatprep.mubr.f32.mxu1 %v12933_v2  ;;  %7798 = vmatpush3.msra.mxu0 %v12934_v18  ;;  %v12971_v18 = vld [vmem:[#allocation23_spill] sm:$0xff] }
  0x7e   : > { %7846 = vmatpush3.msra.mxu1 %v9162_v9  ;;  %1095 = vmatmul.mubr.f32.gmra.mxu0 %v9767_v30  ;;  %v12940_v9 = vld [vmem:[#allocation69_spill] sm:$0xff] }
  0x7f   : > { %1250 = vmatmul.mubr.f32.gmra.mxu1 %v12935_v3  ;;  %7799 = vmatprep.subr.mxu0 %v12937_v4 }
  0x80   : > { %7847 = vmatprep.subr.mxu1 %v9164_v10  ;;  %7800 = vmatpush3.msra.mxu0 %v12938_v5  ;;  %v12943_v10 = vld [vmem:[#allocation71_spill] sm:$0xff] }
  0x81   : > { %7848 = vmatpush3.msra.mxu1 %v9166_v11  ;;  %7801 = vmatprep.subr.mxu0 %v12939_v8  ;;  %v12945_v11 = vand.u32 4294901760, %v9468_v21  ;;  %v12953_v21 = vand.u32 4294901760, %v9567_v58  ;;  %v12959_v58 = vand.u32 4294901760, %v12893_v14  ;;  %v12963_v14 = vand.u32 4294901760, %v9646_v63  ;;  %v377_v63 = vld [vmem:[%s12501_s1 + $0x70] sm:$0xff] }
  0x82   : > { %7849 = vmatprep.subr.mxu1 %v9178_v15  ;;  %1101 = vmatprep.mubr.f32.mxu0 %v12940_v9  ;;  %v12946_v15 = vand.u32 4294901760, %v9484_v46  ;;  %v12955_v46 = vand.u32 4294901760, %v9586_v27  ;;  %v394_v27 = vld [vmem:[%s12501_s1 + $0xf8] sm:$0xff]  ;;  %v10097_v4 = vand.u32 4294901760, %v377_v63  ;;  %v12973_v8 = vld [vmem:[#allocation51_spill] sm:$0xff] }
  0x83   : > { %1257 = vmatprep.mubr.f32.mxu1 %v12941_v42  ;;  %7802 = vmatpush3.msra.mxu0 %v12942_v48  ;;  %v12974_v48 = vand.u32 4294901760, %v12973_v8 }
  0x84   : > { %7850 = vmatpush3.msra.mxu1 %v9180_v16  ;;  %1104 = vmatmul.mubr.f32.gmra.mxu0 %v12943_v10  ;;  %v12948_v16 = vld [vmem:[#allocation64_spill] sm:$0xff] }
  0x85   : > { %1261 = vmatmul.mubr.f32.gmra.mxu1 %v12944_v6  ;;  %7803 = vmatprep.subr.mxu0 %v12945_v11  ;;  %v12975_v11 = vld [vmem:[#allocation34_spill] sm:$0xff]  ;;  %v13002_v6 = vld [vmem:[#allocation61_spill] sm:$0xff] }
  0x86   : > { %7851 = vmatprep.subr.mxu1 %v9182_v17  ;;  %7804 = vmatpush3.msra.mxu0 %v12946_v15  ;;  %v12950_v17 = vld [vmem:[#allocation72_spill] sm:$0xff] }
  0x87   : > { %7852 = vmatpush3.msra.mxu1 %v9204_v22  ;;  %7805 = vmatprep.subr.mxu0 %v12947_v55  ;;  %v12951_v22 = vand.u32 4294901760, %v12885_v32  ;;  %v12960_v32 = vand.u32 4294901760, %v9618_v26  ;;  %v393_v26 = vld [vmem:[%s12501_s1 + $0xf0] sm:$0xff]  ;;  %v391_v55 = vld [vmem:[%s12501_s1 + $0xe0] sm:$0xff] }
  0x88   : > { %7853 = vmatprep.subr.mxu1 %v12880_v52  ;;  %1110 = vmatprep.mubr.f32.mxu0 %v9792_v59  ;;  %v12961_v52 = vld [vmem:[#allocation93_spill] sm:$0xff]  ;;  %v370_v59 = vld [vmem:[%s12501_s1 + $0x38] sm:$0xff] }
  0x89   : > { %1268 = vmatprep.mubr.f32.mxu1 %v12948_v16  ;;  %7806 = vmatpush3.msra.mxu0 %v12949_v28  ;;  %v12976_v28 = vld [vmem:[#allocation24_spill] sm:$0xff] }
  0x8a   : > { %7854 = vmatpush3.msra.mxu1 %v12882_v39  ;;  %1113 = vmatmul.mubr.f32.gmra.mxu0 %v9811_v33  ;;  %v12965_v39 = vand.u32 4294901760, %v9667_v49  ;;  %v392_v49 = vld [vmem:[%s12501_s1 + $0xe8] sm:$0xff] }
  0x8b   : > { %1272 = vmatmul.mubr.f32.gmra.mxu1 %v12950_v17  ;;  %7807 = vmatprep.subr.mxu0 %v12951_v22  ;;  %v12977_v22 = vld [vmem:[#allocation36_spill] sm:$0xff] }
  0x8c   : > { %7855 = vmatprep.subr.mxu1 %v12886_v61  ;;  %7808 = vmatpush3.msra.mxu0 %v12952_v60  ;;  %v12956_v61 = vld [vmem:[#allocation87_spill] sm:$0xff]  ;;  %v10116_v60 = vand.u32 4294901760, %v392_v49 }
  0x8d   : > { %7856 = vmatpush3.msra.mxu1 %v12888_v43  ;;  %7809 = vmatprep.subr.mxu0 %v12953_v21  ;;  %v12958_v43 = vand.u32 4294901760, %v9596_v13  ;;  %v378_v13 = vld [vmem:[%s12501_s1 + $0x78] sm:$0xff] }
  0x8e   : > { %7857 = vmatprep.subr.mxu1 %v12889_v50  ;;  %1119 = vmatprep.mubr.f32.mxu0 %v9839_v1  ;;  %v10079_v50 = vand.u32 4294901760, %v378_v13 }
  0x8f   : > { %1279 = vmatprep.mubr.f32.mxu1 %v12954_v53  ;;  %7810 = vmatpush3.msra.mxu0 %v12955_v46  ;;  %v12978_v46 = vld [vmem:[#allocation92_spill] sm:$0xff] }
  0x90   : > { %7858 = vmatpush3.msra.mxu1 %v12890_v36  ;;  %1122 = vmatmul.mubr.f32.gmra.mxu0 %v12956_v61  ;;  %v12966_v36 = vld [vmem:[#allocation47_spill] sm:$0xff]  ;;  %v10109_v15 = vsub.f32 %v378_v13, %v10079_v50  ;;  %v10133_v13 = vand.u32 4294901760, %v391_v55 }
  0x91   : > { %1283 = vmatmul.mubr.f32.gmra.mxu1 %v12957_v62  ;;  %7811 = vmatprep.subr.mxu0 %v12958_v43  ;;  %v12967_v29 = vand.u32 4294901760, %v12966_v36  ;;  %v12979_v43 = vld [vmem:[#allocation25_spill] sm:$0xff]  ;;  %v374_v36 = vld [vmem:[%s12501_s1 + $0x58] sm:$0xff] }
  0x92   : > { %7859 = vmatprep.subr.mxu1 %v12892_v37  ;;  %7812 = vmatpush3.msra.mxu0 %v12959_v58  ;;  %v12962_v37 = vld [vmem:[#allocation81_spill] sm:$0xff] }
  0x93   : > { %7860 = vmatpush3.msra.mxu1 %v12895_v24  ;;  %7813 = vmatprep.subr.mxu0 %v12960_v32  ;;  %v12964_v24 = vld [vmem:[#allocation84_spill] sm:$0xff]  ;;  %v375_v32 = vld [vmem:[%s12501_s1 + $0x60] sm:$0xff] }
  0x94   : > { %7861 = vmatprep.subr.mxu1 %v12896_v51  ;;  %1128 = vmatprep.mubr.f32.mxu0 %v12961_v52  ;;  %v10074_v51 = vand.u32 4294901760, %v394_v27  ;;  %v12993_v52 = vld [vmem:[#allocation55_spill] sm:$0xff] }
  0x95   : > { %1290 = vmatprep.mubr.f32.mxu1 %v12962_v37  ;;  %7814 = vmatpush3.msra.mxu0 %v12963_v14 }
  0x96   : > { %7862 = vmatpush3.msra.mxu1 %v12897_v31  ;;  %1131 = vmatmul.mubr.f32.gmra.mxu0 %v9887_v12  ;;  %v10087_v31 = vand.u32 4294901760, %v393_v26  ;;  %v10103_v5 = vsub.f32 %v394_v27, %v10074_v51  ;;  %v10131_v27 = vsub.f32 %v377_v63, %v10097_v4  ;;  %v10144_v63 = vand.u32 4294901760, %v375_v32 }
  0x97   : > { %1294 = vmatmul.mubr.f32.gmra.mxu1 %v12964_v24  ;;  %7815 = vmatprep.subr.mxu0 %v12965_v39  ;;  %v12687_v39 = vand.u32 4294901760, %v10109_v15 }
  0x98   : > { %7863 = vmatprep.subr.mxu1 %v12898_v57  ;;  %7816 = vmatpush3.msra.mxu0 %v12967_v29  ;;  %v376_v57 = vld [vmem:[%s12501_s1 + $0x68] sm:$0xff]  ;;  %v10119_v21 = vsub.f32 %v393_v26, %v10087_v31  ;;  %v12686_v14 = vand.u32 4294901760, %v10103_v5  ;;  %v390_v26 = vld [vmem:[%s12501_s1 + $0xd8] sm:$0xff] }
  0x99   : > { %7864 = vmatpush3.msra.mxu1 %v12968_v40  ;;  %7817 = vmatprep.subr.mxu0 %v12970_v56  ;;  %v10123_v58 = vand.u32 4294901760, %v376_v57  ;;  %v12981_v40 = vld [vmem:[#allocation40_spill] sm:$0xff]  ;;  %v389_v56 = vld [vmem:[%s12501_s1 + $0xd0] sm:$0xff]  ;;  %v10163_v8 = vand.u32 4294901760, %v390_v26  ;;  %v1920_v29 = vsub.f32 %v10109_v15, %v12687_v39  ;;  %v12989_v39 = vld [vmem:[#allocation50_spill] sm:$0xff] }
  0x9a   : > { %7865 = vmatprep.subr.mxu1 %v12971_v18  ;;  %1301 = vmatprep.mubr.f32.mxu1 %v12972_v0  ;;  %v12982_v18 = vld [vmem:[#allocation96_spill] sm:$0xff] }
  0x9b   : > { %7818 = vmatpush3.msra.mxu0 %v12974_v48  ;;  %1482 = vmatprep.mubr.f32.mxu0 %v12975_v11  ;;  %v10156_v45 = vsub.f32 %v376_v57, %v10123_v58  ;;  %12983 = vst [vmem:[#allocation13_spill] sm:$0xff] %v10163_v8  ;;  %v10173_v48 = vsub.f32 %v391_v55, %v10133_v13  ;;  %v10187_v57 = vand.u32 4294901760, %v389_v56  ;;  %v12987_v55 = vand.u32 4294901760, %v10119_v21 }
  0x9c   : > { %7866 = vmatpush3.msra.mxu1 %v12976_v28  ;;  %1484 = vmatmul.mubr.f32.vlgmr.msra.gmra.mxu0 %v12977_v22  ;;  %v12984_v28 = vld [vmem:[#allocation45_spill] sm:$0xff] }
  0x9d   : > { %1305 = vmatmul.mubr.f32.gmra.mxu1 %v12978_v46  ;;  %7867 = vmatprep.subr.mxu1 %v12979_v43  ;;  %v10177_v43 = vand.u32 4294901760, %v374_v36  ;;  %12986 = vst [vmem:[#allocation16_spill] sm:$0xff] %v10187_v57  ;;  %v10233_v37 = vsub.f32 %v389_v56, %v10187_v57  ;;  %v12997_v56 = vand.u32 4294901760, %v10173_v48 }
  0x9e   : > { %7899 = vmatprep.subr.mxu0 %v10074_v51  ;;  %7868 = vmatpush3.msra.mxu1 %v12906_v20  ;;  %v12980_v20 = vld [vmem:[#allocation7_spill] sm:$0xff] }
  0x9f   : > { %7900 = vmatpush3.msra.mxu0 %v10079_v50  ;;  %7869 = vmatprep.subr.mxu1 %v12909_v38  ;;  %v10151_v38 = vsub.f32 %v392_v49, %v10116_v60  ;;  %v2032_v49 = vsub.f32 %v10103_v5, %v12686_v14  ;;  %12985 = vst [vmem:[#allocation14_spill] sm:$0xff] %v10177_v43 }
  0xa0   : > { %7901 = vmatprep.subr.mxu0 %v10087_v31  ;;  %1312 = vmatprep.mubr.f32.mxu1 %v12980_v20  ;;  %v10185_v14 = vsub.f32 %v375_v32, %v10144_v63  ;;  %v372_v20 = vld [vmem:[%s12501_s1 + $0x48] sm:$0xff]  ;;  %v10216_v32 = vsub.f32 %v374_v36, %v10177_v43  ;;  %v371_v36 = vld [vmem:[%s12501_s1 + $0x40] sm:$0xff]  ;;  %v2053_v1 = vsub.f32 %v10173_v48, %v12997_v56 }
  0xa1   : > { %1489 = vmatprep.mubr.f32.mxu0 %v12981_v40  ;;  %7870 = vmatpush3.msra.mxu1 %v12913_v41  ;;  %v373_v41 = vld [vmem:[%s12501_s1 + $0x50] sm:$0xff]  ;;  %v2033_v46 = vand.u32 4294901760, %v2032_v49  ;;  %v1921_v49 = vand.u32 4294901760, %v1920_v29  ;;  %v12992_v24 = vand.u32 4294901760, %v10151_v38 }
  0xa2   : > { %7902 = vmatpush3.msra.mxu0 %v10097_v4  ;;  %1316 = vmatmul.mubr.f32.gmra.mxu1 %v12982_v18  ;;  %v2039_v18 = vsub.f32 %v10119_v21, %v12987_v55  ;;  %v12990_v55 = vand.u32 4294901760, %v10131_v27  ;;  %v13000_v16 = vand.u32 4294901760, %v10185_v14 }
  0xa3   : > { %1491 = vmatmul.mubr.f32.gmra.mxu0 %v12984_v28  ;;  %7871 = vmatprep.subr.mxu1 %v12917_v23  ;;  %v388_v23 = vld [vmem:[%s12501_s1 + $0xc8] sm:$0xff] }
  0xa4   : > { %7903 = vmatprep.subr.mxu0 %v10116_v60  ;;  %7872 = vmatpush3.msra.mxu1 %v12919_v44  ;;  %v10198_v44 = vand.u32 4294901760, %v373_v41  ;;  %v1927_v0 = vsub.f32 %v10131_v27, %v12990_v55  ;;  %v10218_v12 = vand.u32 4294901760, %v388_v23  ;;  %v387_v55 = vld [vmem:[%s12501_s1 + $0xc0] sm:$0xff]  ;;  %v1941_v56 = vsub.f32 %v10185_v14, %v13000_v16  ;;  %v385_v16 = vld [vmem:[%s12501_s1 + $0xb0] sm:$0xff] }
  0xa5   : > { %7904 = vmatpush3.msra.mxu0 %v10123_v58  ;;  %7873 = vmatprep.subr.mxu1 %v12921_v19  ;;  %v10211_v19 = vsub.f32 %v390_v26, %v10163_v8  ;;  %v2040_v26 = vand.u32 4294901760, %v2039_v18  ;;  %v10240_v18 = vand.u32 4294901760, %v372_v20  ;;  %v10246_v53 = vand.u32 4294901760, %v387_v55 }
  0xa6   : > { %12988 = vst [vmem:[#allocation37_spill] sm:$0xff] %v10198_v44  ;;  %7905 = vmatprep.subr.mxu0 %v10133_v13  ;;  %1496 = vmatprep.mubr.f32.mxu0 %v12989_v39  ;;  %12991 = vst [vmem:[#allocation17_spill] sm:$0xff] %v10218_v12  ;;  %v10238_v62 = vsub.f32 %v373_v41, %v10198_v44  ;;  %v1928_v29 = vand.u32 4294901760, %v1927_v0  ;;  %v386_v41 = vld [vmem:[%s12501_s1 + $0xb8] sm:$0xff]  ;;  %v10268_v17 = vsub.f32 %v388_v23, %v10218_v12 }
  0xa7   : > { %7874 = vmatpush3.msra.mxu1 %v12924_v7  ;;  %1635 = vmatprep.mubr.f32.mxu1 %v12975_v11  ;;  %v2046_v7 = vsub.f32 %v10151_v38, %v12992_v24  ;;  %12994 = vst [vmem:[#allocation18_spill] sm:$0xff] %v10240_v18  ;;  %v12995_v24 = vand.u32 4294901760, %v10156_v45  ;;  %12996 = vst [vmem:[#allocation19_spill] sm:$0xff] %v10246_v53  ;;  %v12999_v0 = vld [vmem:[#allocation56_spill] sm:$0xff]  ;;  %v13003_v23 = vand.u32 4294901760, %v10211_v19  ;;  %v10302_v3 = vand.u32 4294901760, %v385_v16 }
  0xa8   : > { %7906 = vmatpush3.msra.mxu0 %v10144_v63  ;;  %1637 = vmatmul.mubr.f32.vlgmr.msra.gmra.mxu1 %v12977_v22  ;;  %v10289_v42 = vsub.f32 %v387_v55, %v10246_v53  ;;  %v13007_v55 = vand.u32 4294901760, %v10233_v37  ;;  %v13010_v25 = vand.u32 4294901760, %v10238_v62 }
  0xa9   : > { %1498 = vmatmul.mubr.f32.gmra.mxu0 %v12993_v52  ;;  %7907 = vmatprep.subr.mxu0 %v10163_v8  ;;  %v1934_v61 = vsub.f32 %v10156_v45, %v12995_v24  ;;  %v10256_v24 = vand.u32 4294901760, %v371_v36  ;;  %v2047_v33 = vand.u32 4294901760, %v2046_v7  ;;  %v2060_v10 = vsub.f32 %v10211_v19, %v13003_v23  ;;  %13006 = vst [vmem:[#allocation6_spill] sm:$0xff] %v10302_v3 }
  0xaa   : > { %7955 = vmatprep.subr.mxu1 %v2033_v46  ;;  %7908 = vmatpush3.msra.mxu0 %v10177_v43  ;;  %v10275_v46 = vand.u32 4294901760, %v386_v41  ;;  %v13005_v23 = vand.u32 4294901760, %v10216_v32  ;;  %v2067_v30 = vsub.f32 %v10233_v37, %v13007_v55  ;;  %v1955_v55 = vsub.f32 %v10238_v62, %v13010_v25  ;;  %v383_v25 = vld [vmem:[%s12501_s1 + $0xa0] sm:$0xff]  ;;  %v13028_v43 = vld [vmem:[#allocation70_spill] sm:$0xff] }
  0xab   : > { %7956 = vmatpush3.msra.mxu1 %v1921_v49  ;;  %7909 = vmatprep.subr.mxu0 %v10187_v57  ;;  %12998 = vst [vmem:[#allocation20_spill] sm:$0xff] %v10256_v24  ;;  %v1935_v7 = vand.u32 4294901760, %v1934_v61  ;;  %v2054_v49 = vand.u32 4294901760, %v2053_v1  ;;  %v10296_v1 = vand.u32 4294901760, %v370_v59  ;;  %v1942_v61 = vand.u32 4294901760, %v1941_v56  ;;  %v13009_v56 = vld [vmem:[#allocation62_spill] sm:$0xff] }
  0xac   : > { %7957 = vmatprep.subr.mxu1 %v2040_v26  ;;  %1503 = vmatprep.mubr.f32.mxu0 %v12999_v0  ;;  %v10273_v26 = vsub.f32 %v372_v20, %v10240_v18  ;;  %13001 = vst [vmem:[#allocation5_spill] sm:$0xff] %v10275_v46  ;;  %v369_v20 = vld [vmem:[%s12501_s1 + $0x30] sm:$0xff]  ;;  %v1948_v9 = vsub.f32 %v10216_v32, %v13005_v23  ;;  %v2061_v54 = vand.u32 4294901760, %v2060_v10 }
  0xad   : > { %1642 = vmatprep.mubr.f32.mxu1 %v12981_v40  ;;  %7910 = vmatpush3.msra.mxu0 %v10198_v44  ;;  %13004 = vst [vmem:[#allocation26_spill] sm:$0xff] %v10296_v1  ;;  %v10312_v23 = vand.u32 4294901760, %v369_v20  ;;  %v10324_v2 = vsub.f32 %v386_v41, %v10275_v46  ;;  %v13015_v41 = vand.u32 4294901760, %v10268_v17 }
  0xae   : > { %7958 = vmatpush3.msra.mxu1 %v1928_v29  ;;  %1505 = vmatmul.mubr.f32.gmra.mxu0 %v13002_v6  ;;  %v10294_v29 = vsub.f32 %v371_v36, %v10256_v24  ;;  %v384_v36 = vld [vmem:[%s12501_s1 + $0xa8] sm:$0xff]  ;;  %v1949_v10 = vand.u32 4294901760, %v1948_v9  ;;  %v1956_v9 = vand.u32 4294901760, %v1955_v55 }
  0xaf   : > { %1644 = vmatmul.mubr.f32.gmra.mxu1 %v12984_v28  ;;  %7911 = vmatprep.subr.mxu0 %v10218_v12  ;;  %13008 = vst [vmem:[#allocation27_spill] sm:$0xff] %v10312_v23  ;;  %13011 = vst [vmem:[#allocation8_spill] sm:$0xff] %v10324_v2  ;;  %v2074_v47 = vsub.f32 %v10268_v17, %v13015_v41  ;;  %v13019_v41 = vand.u32 4294901760, %v10273_v26 }
  0xb0   : > { %7959 = vmatprep.subr.mxu1 %v2047_v33  ;;  %7912 = vmatpush3.msra.mxu0 %v10240_v18  ;;  %v10331_v33 = vand.u32 4294901760, %v384_v36  ;;  %v10358_v18 = vand.u32 4294901760, %v383_v25  ;;  %v13024_v44 = vand.u32 4294901760, %v10294_v29 }
  0xb1   : > { %7960 = vmatpush3.msra.mxu1 %v1935_v7  ;;  %7913 = vmatprep.subr.mxu0 %v10246_v53  ;;  %v2068_v7 = vand.u32 4294901760, %v2067_v30  ;;  %v10352_v30 = vand.u32 4294901760, %v368_v35  ;;  %v1962_v53 = vsub.f32 %v10273_v26, %v13019_v41  ;;  %v366_v41 = vld [vmem:[%s12501_s1 + $0x18] sm:$0xff] }
  0xb2   : > { %7961 = vmatprep.subr.mxu1 %v2054_v49  ;;  %1510 = vmatprep.mubr.f32.mxu0 %v13009_v56  ;;  %v10329_v49 = vsub.f32 %v370_v59, %v10296_v1  ;;  %13013 = vst [vmem:[#allocation10_spill] sm:$0xff] %v10331_v33  ;;  %v367_v59 = vld [vmem:[%s12501_s1 + $0x20] sm:$0xff]  ;;  %13020 = vst [vmem:[#allocation33_spill] sm:$0xff] %v10358_v18  ;;  %v1969_v57 = vsub.f32 %v10294_v29, %v13024_v44  ;;  %v10392_v44 = vand.u32 4294901760, %v366_v41 }
  0xb3   : > { %1649 = vmatprep.mubr.f32.mxu1 %v12989_v39  ;;  %7914 = vmatpush3.msra.mxu0 %v10256_v24  ;;  %v10345_v24 = vsub.f32 %v385_v16, %v10302_v3  ;;  %13018 = vst [vmem:[#allocation32_spill] sm:$0xff] %v10352_v30  ;;  %v13021_v16 = vand.u32 4294901760, %v10289_v42 }
  0xb4   : > { %13012 = vst [vmem:[#allocation28_spill] sm:$0xff] %v10329_v49  ;;  %7962 = vmatpush3.msra.mxu1 %v1942_v61  ;;  %1512 = vmatmul.mubr.f32.gmra.mxu0 %v13014_v34  ;;  %v10350_v61 = vsub.f32 %v369_v20, %v10312_v23  ;;  %v382_v20 = vld [vmem:[%s12501_s1 + $0x98] sm:$0xff]  ;;  %13027 = vst [vmem:[#allocation22_spill] sm:$0xff] %v10392_v44 }
  0xb5   : > { %13016 = vst [vmem:[#allocation29_spill] sm:$0xff] %v10345_v24  ;;  %1651 = vmatmul.mubr.f32.gmra.mxu1 %v12993_v52  ;;  %7915 = vmatprep.subr.mxu0 %v10275_v46  ;;  %v2081_v12 = vsub.f32 %v10289_v42, %v13021_v16  ;;  %v2075_v16 = vand.u32 4294901760, %v2074_v47  ;;  %v381_v46 = vld [vmem:[%s12501_s1 + $0x90] sm:$0xff]  ;;  %v1963_v47 = vand.u32 4294901760, %v1962_v53  ;;  %v10390_v55 = vand.u32 4294901760, %v382_v20 }
  0xb6   : > { %13017 = vst [vmem:[#allocation31_spill] sm:$0xff] %v10350_v61  ;;  %7963 = vmatprep.subr.mxu1 %v2061_v54  ;;  %7916 = vmatpush3.msra.mxu0 %v10296_v1  ;;  %v10371_v54 = vand.u32 4294901760, %v367_v59  ;;  %v13023_v1 = vld [vmem:[#allocation66_spill] sm:$0xff]  ;;  %v10403_v53 = vsub.f32 %v383_v25, %v10358_v18  ;;  %v13032_v25 = vand.u32 4294901760, %v10345_v24 }
  0xb7   : > { %7964 = vmatpush3.msra.mxu1 %v1949_v10  ;;  %7917 = vmatprep.subr.mxu0 %v10302_v3  ;;  %v10383_v3 = vsub.f32 %v384_v36, %v10331_v33  ;;  %13026 = vst [vmem:[#allocation47_spill] sm:$0xff] %v10390_v55  ;;  %v2082_v8 = vand.u32 4294901760, %v2081_v12  ;;  %v13029_v10 = vand.u32 4294901760, %v10324_v2 }
  0xb8   : > { %13022 = vst [vmem:[#allocation15_spill] sm:$0xff] %v10371_v54  ;;  %7965 = vmatprep.subr.mxu1 %v2068_v7  ;;  %1517 = vmatprep.mubr.f32.mxu0 %v13023_v1  ;;  %v10388_v7 = vsub.f32 %v368_v35, %v10352_v30  ;;  %v1970_v35 = vand.u32 4294901760, %v1969_v57  ;;  %v363_v57 = vld [vmem:[%s12501_s1] sm:$0xff] }
  0xb9   : > { %1656 = vmatprep.mubr.f32.mxu1 %v12999_v0  ;;  %7918 = vmatpush3.msra.mxu0 %v10312_v23  ;;  %v2088_v36 = vsub.f32 %v10324_v2, %v13029_v10  ;;  %v365_v23 = vld [vmem:[%s12501_s1 + $0x10] sm:$0xff]  ;;  %v10410_v0 = vand.u32 4294901760, %v381_v46  ;;  %v10414_v10 = vsub.f32 %v367_v59, %v10371_v54  ;;  %v2095_v2 = vsub.f32 %v10345_v24, %v13032_v25  ;;  %v364_v59 = vld [vmem:[%s12501_s1 + $0x8] sm:$0xff]  ;;  %v379_v24 = vld [vmem:[%s12501_s1 + $0x80] sm:$0xff] }
  0xba   : > { %13025 = vst [vmem:[#allocation21_spill] sm:$0xff] %v10388_v7  ;;  %7966 = vmatpush3.msra.mxu1 %v1956_v9  ;;  %1519 = vmatmul.mubr.f32.gmra.mxu0 %v13028_v43  ;;  %v13030_v9 = vand.u32 4294901760, %v10329_v49  ;;  %v13034_v25 = vld [vmem:[#allocation79_spill] sm:$0xff]  ;;  %v10455_v52 = vand.u32 4294901760, %v364_v59 }
  0xbb   : > { %1658 = vmatmul.mubr.f32.gmra.mxu1 %v13002_v6  ;;  %7919 = vmatprep.subr.mxu0 %v10331_v33  ;;  %13031 = vst [vmem:[#allocation49_spill] sm:$0xff] %v10410_v0  ;;  %v380_v33 = vld [vmem:[%s12501_s1 + $0x88] sm:$0xff]  ;;  %v10435_v6 = vsub.f32 %v366_v41, %v10392_v44  ;;  %v10449_v41 = vsub.f32 %v381_v46, %v10410_v0 }
  0xbc   : > { %v1976_v12 = vsub.f32 %v10329_v49, %v13030_v9  ;;  %7967 = vmatprep.subr.mxu1 %v2075_v16  ;;  %7920 = vmatpush3.msra.mxu0 %v10352_v30  ;;  %v10424_v16 = vand.u32 4294901760, %v365_v23  ;;  %v10431_v9 = vsub.f32 %v382_v20, %v10390_v55  ;;  %v2089_v30 = vand.u32 4294901760, %v2088_v36  ;;  %v13038_v36 = vld [vmem:[#allocation82_spill] sm:$0xff] }
  0xbd   : > { %7968 = vmatpush3.msra.mxu1 %v1963_v47  ;;  %7921 = vmatprep.subr.mxu0 %v10358_v18  ;;  %v13035_v47 = vand.u32 4294901760, %v10350_v61  ;;  %v10446_v20 = vand.u32 4294901760, %v380_v33  ;;  %13037 = vst [vmem:[#allocation24_spill] sm:$0xff] %v10449_v41 }
  0xbe   : > { %13033 = vst [vmem:[#allocation23_spill] sm:$0xff] %v10424_v16  ;;  %7969 = vmatprep.subr.mxu1 %v2082_v8  ;;  %1524 = vmatprep.mubr.f32.mxu0 %v13034_v25  ;;  %v1977_v8 = vand.u32 4294901760, %v1976_v12  ;;  %v10464_v46 = vsub.f32 %v365_v23, %v10424_v16  ;;  %v13041_v12 = vand.u32 4294901760, %v10403_v53  ;;  %v10478_v23 = vand.u32 4294901760, %v363_v57 }
  0xbf   : > { %v1983_v18 = vsub.f32 %v10350_v61, %v13035_v47  ;;  %1663 = vmatprep.mubr.f32.mxu1 %v13009_v56  ;;  %7922 = vmatpush3.msra.mxu0 %v10371_v54  ;;  %13036 = vst [vmem:[#allocation51_spill] sm:$0xff] %v10446_v20  ;;  %v2096_v47 = vand.u32 4294901760, %v2095_v2  ;;  %v13039_v61 = vand.u32 4294901760, %v10383_v3  ;;  %v13040_v2 = vand.u32 4294901760, %v10388_v7 }
  0xc0   : > { %7970 = vmatpush3.msra.mxu1 %v1970_v35  ;;  %1526 = vmatmul.mubr.f32.gmra.mxu0 %v13038_v36  ;;  %v10486_v54 = vsub.f32 %v364_v59, %v10455_v52  ;;  %v13046_v59 = vld [vmem:[#allocation90_spill] sm:$0xff] }
  0xc1   : > { %v2102_v49 = vsub.f32 %v10383_v3, %v13039_v61  ;;  %1665 = vmatmul.mubr.f32.gmra.mxu1 %v13014_v34  ;;  %7923 = vmatprep.subr.mxu0 %v10390_v55  ;;  %v1990_v35 = vsub.f32 %v10388_v7, %v13040_v2  ;;  %v10469_v61 = vand.u32 4294901760, %v379_v24  ;;  %v1984_v56 = vand.u32 4294901760, %v1983_v18 }
  0xc2   : > { %7971 = vmatprep.subr.mxu1 %v2089_v30  ;;  %7924 = vmatpush3.msra.mxu0 %v10392_v44  ;;  %v2109_v34 = vsub.f32 %v10403_v53, %v13041_v12  ;;  %v10482_v7 = vsub.f32 %v380_v33, %v10446_v20  ;;  %v13042_v30 = vld [vmem:[#allocation88_spill] sm:$0xff]  ;;  %v13043_v12 = vand.u32 4294901760, %v10414_v10  ;;  %v13044_v2 = vand.u32 4294901760, %v10431_v9 }
  0xc3   : > { %7972 = vmatpush3.msra.mxu1 %v1977_v8  ;;  %7925 = vmatprep.subr.mxu0 %v10410_v0  ;;  %v2103_v18 = vand.u32 4294901760, %v2102_v49  ;;  %v1991_v55 = vand.u32 4294901760, %v1990_v35  ;;  %v10498_v49 = vsub.f32 %v379_v24, %v10469_v61  ;;  %v10507_v35 = vsub.f32 %v363_v57, %v10478_v23 }
  0xc4   : > { %7973 = vmatprep.subr.mxu1 %v2096_v47  ;;  %1531 = vmatprep.mubr.f32.mxu0 %v13042_v30  ;;  %v1997_v8 = vsub.f32 %v10414_v10, %v13043_v12  ;;  %v2116_v33 = vsub.f32 %v10431_v9, %v13044_v2  ;;  %v2110_v0 = vand.u32 4294901760, %v2109_v34  ;;  %v13047_v12 = vand.u32 4294901760, %v10435_v6  ;;  %v13052_v47 = vld [vmem:[#allocation46_spill] sm:$0xff] }
  0xc5   : > { %1670 = vmatprep.mubr.f32.mxu1 %v13023_v1  ;;  %7926 = vmatpush3.msra.mxu0 %v10424_v16  ;;  %13045 = vst [vmem:[#allocation25_spill] sm:$0xff] %v10498_v49  ;;  %13048 = vst [vmem:[#allocation88_spill] sm:$0xff] %v10507_v35  ;;  %v13049_v2 = vand.u32 4294901760, %v10449_v41  ;;  %v12752_v16 = vand.u32 4294901760, %v10498_v49 }
  0xc6   : > { %7974 = vmatpush3.msra.mxu1 %v1984_v56  ;;  %1533 = vmatmul.mubr.f32.gmra.mxu0 %v13046_v59  ;;  %v2004_v44 = vsub.f32 %v10435_v6, %v13047_v12  ;;  %v12753_v56 = vand.u32 4294901760, %v10482_v7  ;;  %v1998_v34 = vand.u32 4294901760, %v1997_v8  ;;  %v2117_v12 = vand.u32 4294901760, %v2116_v33 }
  0xc7   : > { %1672 = vmatmul.mubr.f32.gmra.mxu1 %v13028_v43  ;;  %7927 = vmatprep.subr.mxu0 %v10446_v20  ;;  %v2123_v24 = vsub.f32 %v10449_v41, %v13049_v2  ;;  %v13050_v20 = vand.u32 4294901760, %v10464_v46  ;;  %v12751_v33 = vand.u32 4294901760, %v10507_v35 }
  0xc8   : > { %7975 = vmatprep.subr.mxu1 %v2103_v18  ;;  %7928 = vmatpush3.msra.mxu0 %v10455_v52  ;;  %v2005_v2 = vand.u32 4294901760, %v2004_v44  ;;  %v13051_v18 = vld [vmem:[#allocation43_spill] sm:$0xff] }
  0xc9   : > { %7976 = vmatpush3.msra.mxu1 %v1991_v55  ;;  %7929 = vmatprep.subr.mxu0 %v10469_v61  ;;  %v2011_v57 = vsub.f32 %v10464_v46, %v13050_v20  ;;  %v2124_v8 = vand.u32 4294901760, %v2123_v24  ;;  %v2130_v55 = vsub.f32 %v10482_v7, %v12753_v56  ;;  %v13053_v20 = vand.u32 4294901760, %v10486_v54  ;;  %v13076_v56 = vld [vmem:[#allocation21_spill] sm:$0xff] }
  0xca   : > { %7977 = vmatprep.subr.mxu1 %v2110_v0  ;;  %1677 = vmatprep.mubr.f32.mxu1 %v13034_v25  ;;  %v2137_v24 = vsub.f32 %v10498_v49, %v12752_v16  ;;  %v13075_v16 = vld [vmem:[#allocation17_spill] sm:$0xff] }
  0xcb   : > { %7930 = vmatpush3.msra.mxu0 %v10478_v23  ;;  %1800 = vmatprep.mubr.f32.mxu0 %v13051_v18  ;;  %v2018_v0 = vsub.f32 %v10486_v54, %v13053_v20  ;;  %v2012_v44 = vand.u32 4294901760, %v2011_v57  ;;  %v13054_v57 = vld [vmem:[#allocation52_spill] sm:$0xff]  ;;  %v13057_v20 = vld [vmem:[#allocation75_spill] sm:$0xff] }
  0xcc   : > { %7978 = vmatpush3.msra.mxu1 %v1998_v34  ;;  %1806 = vmatmul.mubr.f32.vlgmr.msra.gmra.mxu0 %v13052_v47  ;;  %v2131_v34 = vand.u32 4294901760, %v2130_v55  ;;  %v2025_v47 = vsub.f32 %v10507_v35, %v12751_v33  ;;  %v2138_v18 = vand.u32 4294901760, %v2137_v24  ;;  %v13056_v55 = vld [vmem:[#allocation67_spill] sm:$0xff]  ;;  %v13074_v33 = vld [vmem:[#allocation61_spill] sm:$0xff] }
  0xcd   : > { %1679 = vmatmul.mubr.f32.gmra.mxu1 %v13038_v36  ;;  %7979 = vmatprep.subr.mxu1 %v2117_v12  ;;  %v2019_v12 = vand.u32 4294901760, %v2018_v0  ;;  %v13058_v0 = vld [vmem:[#allocation76_spill] sm:$0xff]  ;;  %v13060_v24 = vld [vmem:[#allocation83_spill] sm:$0xff] }
  0xce   : > { %8011 = vmatprep.subr.mxu0 %v10103_v5  ;;  %7980 = vmatpush3.msra.mxu1 %v2005_v2  ;;  %v13055_v2 = vld [vmem:[#allocation58_spill] sm:$0xff] }
  0xcf   : > { %8012 = vmatpush3.msra.mxu0 %v10109_v15  ;;  %7981 = vmatprep.subr.mxu1 %v2124_v8  ;;  %v2026_v8 = vand.u32 4294901760, %v2025_v47  ;;  %v13062_v47 = vld [vmem:[#allocation55_spill] sm:$0xff] }
  0xd0   : > { %8013 = vmatprep.subr.mxu0 %v10119_v21  ;;  %1684 = vmatprep.mubr.f32.mxu1 %v13042_v30 }
  0xd1   : > { %1815 = vmatprep.mubr.f32.mxu0 %v13054_v57  ;;  %7982 = vmatpush3.msra.mxu1 %v2012_v44  ;;  %v13059_v44 = vld [vmem:[#allocation80_spill] sm:$0xff]  ;;  %v13064_v57 = vld [vmem:[#allocation13_spill] sm:$0xff] }
  0xd2   : > { %8014 = vmatpush3.msra.mxu0 %v10131_v27  ;;  %1686 = vmatmul.mubr.f32.gmra.mxu1 %v13046_v59 }
  0xd3   : > { %1821 = vmatmul.mubr.f32.gmra.mxu0 %v13055_v2  ;;  %7983 = vmatprep.subr.mxu1 %v2131_v34  ;;  %v13061_v34 = vld [vmem:[#allocation86_spill] sm:$0xff] }
  0xd4   : > { %8015 = vmatprep.subr.mxu0 %v10151_v38  ;;  %7984 = vmatpush3.msra.mxu1 %v2019_v12  ;;  %v13063_v12 = vld [vmem:[#allocation8_spill] sm:$0xff]  ;;  %v13066_v2 = vld [vmem:[#allocation14_spill] sm:$0xff] }
  0xd5   : > { %8016 = vmatpush3.msra.mxu0 %v10156_v45  ;;  %7985 = vmatprep.subr.mxu1 %v2138_v18  ;;  %v13065_v18 = vld [vmem:[#allocation28_spill] sm:$0xff] }
  0xd6   : > { %8017 = vmatprep.subr.mxu0 %v10173_v48  ;;  %1830 = vmatprep.mubr.f32.mxu0 %v13056_v55  ;;  %v13068_v55 = vld [vmem:[#allocation16_spill] sm:$0xff] }
  0xd7   : > { %7986 = vmatpush3.msra.mxu1 %v2026_v8  ;;  %2141 = vmatprep.mubr.f32.mxu1 %v12975_v11  ;;  %v13067_v8 = vld [vmem:[#allocation29_spill] sm:$0xff]  ;;  %v13090_v11 = vld [vmem:[#allocation10_spill] sm:$0xff] }
  0xd8   : > { %8018 = vmatpush3.msra.mxu0 %v10185_v14  ;;  %2143 = vmatmul.mubr.f32.vlgmr.msra.gmra.mxu1 %v12977_v22  ;;  %v13085_v22 = vld [vmem:[#allocation26_spill] sm:$0xff] }
  0xd9   : > { %1836 = vmatmul.mubr.f32.gmra.mxu0 %v13057_v20  ;;  %8019 = vmatprep.subr.mxu0 %v10211_v19  ;;  %v13069_v20 = vld [vmem:[#allocation91_spill] sm:$0xff] }
  0xda   : > { %8067 = vmatprep.subr.mxu1 %v10074_v51  ;;  %8020 = vmatpush3.msra.mxu0 %v10216_v32 }
  0xdb   : > { %8068 = vmatpush3.msra.mxu1 %v10079_v50  ;;  %8021 = vmatprep.subr.mxu0 %v10233_v37 }
  0xdc   : > { %8069 = vmatprep.subr.mxu1 %v10087_v31  ;;  %1845 = vmatprep.mubr.f32.mxu0 %v13058_v0  ;;  %v13070_v0 = vld [vmem:[#allocation56_spill] sm:$0xff] }
  0xdd   : > { %2148 = vmatprep.mubr.f32.mxu1 %v12981_v40  ;;  %8022 = vmatpush3.msra.mxu0 %v10238_v62  ;;  %v13084_v40 = vld [vmem:[#allocation5_spill] sm:$0xff] }
  0xde   : > { %8070 = vmatpush3.msra.mxu1 %v10097_v4  ;;  %1851 = vmatmul.mubr.f32.gmra.mxu0 %v13059_v44  ;;  %v13071_v44 = vld [vmem:[#allocation31_spill] sm:$0xff] }
  0xdf   : > { %2150 = vmatmul.mubr.f32.gmra.mxu1 %v12984_v28  ;;  %8023 = vmatprep.subr.mxu0 %v10268_v17  ;;  %v13083_v28 = vld [vmem:[#allocation65_spill] sm:$0xff] }
  0xe0   : > { %8071 = vmatprep.subr.mxu1 %v10116_v60  ;;  %8024 = vmatpush3.msra.mxu0 %v10273_v26 }
  0xe1   : > { %8072 = vmatpush3.msra.mxu1 %v10123_v58  ;;  %8025 = vmatprep.subr.mxu0 %v10289_v42 }
  0xe2   : > { %8073 = vmatprep.subr.mxu1 %v10133_v13  ;;  %1860 = vmatprep.mubr.f32.mxu0 %v13060_v24  ;;  %v13072_v24 = vld [vmem:[#allocation37_spill] sm:$0xff] }
  0xe3   : > { %2155 = vmatprep.mubr.f32.mxu1 %v12989_v39  ;;  %8026 = vmatpush3.msra.mxu0 %v10294_v29  ;;  %v13080_v39 = vld [vmem:[#allocation62_spill] sm:$0xff] }
  0xe4   : > { %8074 = vmatpush3.msra.mxu1 %v10144_v63  ;;  %1866 = vmatmul.mubr.f32.gmra.mxu0 %v13061_v34  ;;  %v13073_v34 = vld [vmem:[#allocation94_spill] sm:$0xff] }
  0xe5   : > { %2157 = vmatmul.mubr.f32.gmra.mxu1 %v13062_v47  ;;  %8027 = vmatprep.subr.mxu0 %v13063_v12  ;;  %v13077_v47 = vld [vmem:[#allocation18_spill] sm:$0xff] }
  0xe6   : > { %8075 = vmatprep.subr.mxu1 %v13064_v57  ;;  %8028 = vmatpush3.msra.mxu0 %v13065_v18 }
  0xe7   : > { %8076 = vmatpush3.msra.mxu1 %v13066_v2  ;;  %8029 = vmatprep.subr.mxu0 %v13067_v8 }
  0xe8   : > { %8077 = vmatprep.subr.mxu1 %v13068_v55  ;;  %1875 = vmatprep.mubr.f32.mxu0 %v13069_v20  ;;  %v13078_v20 = vld [vmem:[#allocation19_spill] sm:$0xff] }
  0xe9   : > { %2162 = vmatprep.mubr.f32.mxu1 %v13070_v0  ;;  %8030 = vmatpush3.msra.mxu0 %v13071_v44  ;;  %v13079_v0 = vld [vmem:[#allocation9_spill] sm:$0xff] }
  0xea   : > { %8078 = vmatpush3.msra.mxu1 %v13072_v24  ;;  %1881 = vmatmul.mubr.f32.gmra.mxu0 %v13073_v34  ;;  %v13081_v34 = vld [vmem:[#allocation20_spill] sm:$0xff] }
  0xeb   : > { %2164 = vmatmul.mubr.f32.gmra.mxu1 %v13074_v33  ;;  %8031 = vmatprep.subr.mxu0 %v10383_v3  ;;  %v13082_v33 = vld [vmem:[#allocation30_spill] sm:$0xff] }
  0xec   : > { %8079 = vmatprep.subr.mxu1 %v13075_v16  ;;  %8032 = vmatpush3.msra.mxu0 %v13076_v56 }
  0xed   : > { %8080 = vmatpush3.msra.mxu1 %v13077_v47  ;;  %8033 = vmatprep.subr.mxu0 %v10403_v53 }
  0xee   : > { %8081 = vmatprep.subr.mxu1 %v13078_v20  ;;  %1890 = vmatprep.mubr.f32.mxu0 %v13079_v0  ;;  %v13086_v0 = vld [vmem:[#allocation6_spill] sm:$0xff] }
  0xef   : > { %2169 = vmatprep.mubr.f32.mxu1 %v13080_v39  ;;  %8034 = vmatpush3.msra.mxu0 %v10414_v10  ;;  %v13087_v39 = vld [vmem:[#allocation11_spill] sm:$0xff] }
  0xf0   : > { %8082 = vmatpush3.msra.mxu1 %v13081_v34  ;;  %1896 = vmatmul.mubr.f32.gmra.mxu0 %v13082_v33  ;;  %v13088_v33 = vld [vmem:[#allocation27_spill] sm:$0xff] }
  0xf1   : > { %2171 = vmatmul.mubr.f32.gmra.mxu1 %v13083_v28  ;;  %8035 = vmatprep.subr.mxu0 %v10431_v9  ;;  %v13089_v28 = vld [vmem:[#allocation12_spill] sm:$0xff] }
  0xf2   : > { %8083 = vmatprep.subr.mxu1 %v13084_v40  ;;  %8036 = vmatpush3.msra.mxu0 %v10435_v6 }
  0xf3   : > { %8084 = vmatpush3.msra.mxu1 %v13085_v22  ;;  %8037 = vmatprep.subr.mxu0 %v10449_v41  ;;  %v13091_v41 = vld [vmem:[#allocation32_spill] sm:$0xff] }
  0xf4   : > { %8085 = vmatprep.subr.mxu1 %v13086_v0  ;;  %1905 = vmatprep.mubr.f32.mxu0 %v13087_v39  ;;  %v13092_v39 = vld [vmem:[#allocation33_spill] sm:$0xff] }
  0xf5   : > { %2176 = vmatprep.mubr.f32.mxu1 %v13023_v1  ;;  %8038 = vmatpush3.msra.mxu0 %v10464_v46  ;;  %v13093_v1 = vld [vmem:[#allocation35_spill] sm:$0xff] }
  0xf6   : > { %8086 = vmatpush3.msra.mxu1 %v13088_v33  ;;  %1911 = vmatmul.mubr.f32.gmra.mxu0 %v13089_v28  ;;  %v13094_v28 = vld [vmem:[#allocation15_spill] sm:$0xff] }
  0xf7   : > { %2178 = vmatmul.mubr.f32.gmra.mxu1 %v13028_v43  ;;  %8039 = vmatprep.subr.mxu0 %v10482_v7  ;;  %v13095_v43 = vld [vmem:[#allocation39_spill] sm:$0xff] }
  0xf8   : > { %8087 = vmatprep.subr.mxu1 %v13090_v11  ;;  %8040 = vmatpush3.msra.mxu0 %v10486_v54  ;;  %v13096_v11 = vld [vmem:[#allocation47_spill] sm:$0xff] }
  0xf9   : > { %8088 = vmatpush3.msra.mxu1 %v13091_v41  ;;  %8041 = vmatprep.subr.mxu0 %v10498_v49  ;;  %v13097_v41 = vand.u32 4294901760, %v10103_v5  ;;  %v13098_v49 = vld [vmem:[#allocation22_spill] sm:$0xff]  ;;  %v13104_v5 = vand.u32 4294901760, %v10131_v27  ;;  %v13109_v27 = vand.u32 4294901760, %v10173_v48  ;;  %v13116_v48 = vand.u32 4294901760, %v10216_v32 }
  0xfa   : > { %8089 = vmatprep.subr.mxu1 %v13092_v39  ;;  %2183 = vmatprep.mubr.f32.mxu1 %v13034_v25  ;;  %v13099_v25 = vand.u32 4294901760, %v10109_v15  ;;  %v13106_v15 = vld [vmem:[#allocation51_spill] sm:$0xff] }
  0xfb   : > { %8042 = vmatpush3.msra.mxu0 %v10507_v35  ;;  %2327 = vmatprep.mubr.f32.mxu0 %v13093_v1  ;;  %v13100_v35 = vld [vmem:[#allocation49_spill] sm:$0xff]  ;;  %v13101_v1 = vand.u32 4294901760, %v10119_v21  ;;  %v13108_v21 = vand.u32 4294901760, %v10156_v45 }
  0xfc   : > { %8090 = vmatpush3.msra.mxu1 %v13094_v28  ;;  %2330 = vmatmul.mubr.f32.vlgmr.msra.gmra.mxu0 %v13095_v43  ;;  %v13102_v43 = vld [vmem:[#allocation42_spill] sm:$0xff] }
  0xfd   : > { %2185 = vmatmul.mubr.f32.gmra.mxu1 %v13038_v36  ;;  %8091 = vmatprep.subr.mxu1 %v13096_v11  ;;  %v13103_v36 = vld [vmem:[#allocation23_spill] sm:$0xff] }
  0xfe   : > { %8123 = vmatprep.subr.mxu0 %v13097_v41  ;;  %8092 = vmatpush3.msra.mxu1 %v13098_v49  ;;  %v7595_v39 = vpop.f32.mrf.mxu0  ;;  %v13105_v41 = vld [vmem:[#allocation48_spill] sm:$0xff] }
  0xff   : > { %8124 = vmatpush3.msra.mxu0 %v13099_v25  ;;  %8093 = vmatprep.subr.mxu1 %v13100_v35  ;;  %v13107_v25 = vand.u32 4294901760, %v10151_v38  ;;  %v13112_v38 = vand.u32 4294901760, %v10185_v14 }
 0x100   : > { %8125 = vmatprep.subr.mxu0 %v13101_v1  ;;  %2190 = vmatprep.mubr.f32.mxu1 %v13042_v30  ;;  %v7596_v11 = vpop.f32.mrf.mxu0 }
 0x101   : > { %2336 = vmatprep.mubr.f32.mxu0 %v13102_v43  ;;  %8094 = vmatpush3.msra.mxu1 %v13103_v36  ;;  %v13110_v43 = vld [vmem:[#allocation54_spill] sm:$0xff]  ;;  %v7597_v14 = vadd.f32 %v7596_v11, %v7595_v39  ;;  %v13123_v11 = vand.u32 4294901760, %v10268_v17 }
 0x102   : > { %8126 = vmatpush3.msra.mxu0 %v13104_v5  ;;  %2192 = vmatmul.mubr.f32.gmra.mxu1 %v13046_v59  ;;  %v13111_v5 = vld [vmem:[#allocation38_spill] sm:$0xff]  ;;  %v13115_v59 = vand.u32 4294901760, %v10211_v19  ;;  %v13119_v19 = vld [vmem:[#allocation44_spill] sm:$0xff] }
 0x103   : > { %2339 = vmatmul.mubr.f32.gmra.mxu0 %v13105_v41  ;;  %8095 = vmatprep.subr.mxu1 %v13106_v15 }
 0x104   : > { %8127 = vmatprep.subr.mxu0 %v13107_v25  ;;  %8096 = vmatpush3.msra.mxu1 %v10455_v52  ;;  %v13113_v25 = vld [vmem:[#allocation41_spill] sm:$0xff] }
 0x105   : > { %8128 = vmatpush3.msra.mxu0 %v13108_v21  ;;  %8097 = vmatprep.subr.mxu1 %v10469_v61  ;;  %v13114_v21 = vld [vmem:[#allocation59_spill] sm:$0xff] }
 0x106   : > { %v7598_v1 = vpop.f32.mrf.mxu0  ;;  %8129 = vmatprep.subr.mxu0 %v13109_v27  ;;  %2345 = vmatprep.mubr.f32.mxu0 %v13110_v43  ;;  %v13117_v43 = vand.u32 4294901760, %v10233_v37  ;;  %v13122_v37 = vld [vmem:[#allocation53_spill] sm:$0xff] }
 0x107   : > { %8098 = vmatpush3.msra.mxu1 %v10478_v23  ;;  %2497 = vmatprep.mubr.f32.mxu1 %v13111_v5 }
 0x108   : > { %v7599_v41 = vpop.f32.mrf.mxu0  ;;  %8130 = vmatpush3.msra.mxu0 %v13112_v38  ;;  %2501 = vmatmul.mubr.f32.vlgmr.msra.gmra.mxu1 %v13113_v25  ;;  %v7651_v45 = vpop.f32.mrf.mxu1  ;;  %v13118_v25 = vld [vmem:[#allocation60_spill] sm:$0xff] }
 0x109   : > { %2348 = vmatmul.mubr.f32.gmra.mxu0 %v13114_v21  ;;  %8131 = vmatprep.subr.mxu0 %v13115_v59  ;;  %v7600_v17 = vadd.f32 %v7599_v41, %v7598_v1  ;;  %v13132_v1 = vand.u32 4294901760, %v13065_v18  ;;  %v13137_v18 = vld [vmem:[#allocation78_spill] sm:$0xff] }
 0x10a   : > { %8179 = vmatprep.subr.mxu1 %v10074_v51  ;;  %8132 = vmatpush3.msra.mxu0 %v13116_v48  ;;  %v7652_v27 = vpop.f32.mrf.mxu1  ;;  %v13120_v51 = vand.u32 4294901760, %v10238_v62  ;;  %v13125_v62 = vand.u32 4294901760, %v10289_v42  ;;  %v13126_v48 = vld [vmem:[#allocation69_spill] sm:$0xff] }
 0x10b   : > { %8180 = vmatpush3.msra.mxu1 %v10079_v50  ;;  %8133 = vmatprep.subr.mxu0 %v13117_v43  ;;  %v7601_v5 = vpop.f32.mrf.mxu0  ;;  %v7653_v38 = vadd.f32 %v7652_v27, %v7651_v45  ;;  %v13121_v50 = vld [vmem:[#allocation68_spill] sm:$0xff]  ;;  %v13124_v45 = vand.u32 4294901760, %v10273_v26  ;;  %v13127_v43 = vld [vmem:[#allocation57_spill] sm:$0xff]  ;;  %v13129_v26 = vld [vmem:[#allocation71_spill] sm:$0xff] }
 0x10c   : > { %8181 = vmatprep.subr.mxu1 %v10087_v31  ;;  %2354 = vmatprep.mubr.f32.mxu0 %v13118_v25  ;;  %v13134_v25 = vld [vmem:[#allocation74_spill] sm:$0xff] }
 0x10d   : > { %2508 = vmatprep.mubr.f32.mxu1 %v13119_v19  ;;  %8134 = vmatpush3.msra.mxu0 %v13120_v51  ;;  %v7602_v32 = vpop.f32.mrf.mxu0  ;;  %v10671_v59 = vadd.f32 %v7653_v38, %v7597_v14  ;;  %v13130_v14 = vld [vmem:[#allocation63_spill] sm:$0xff]  ;;  %v13135_v51 = vld [vmem:[#allocation64_spill] sm:$0xff] }
 0x10e   : > { %8182 = vmatpush3.msra.mxu1 %v10097_v4  ;;  %2357 = vmatmul.mubr.f32.gmra.mxu0 %v13121_v50  ;;  %v7603_v19 = vadd.f32 %v7602_v32, %v7601_v5  ;;  %v13138_v50 = vld [vmem:[#allocation72_spill] sm:$0xff]  ;;  %v13140_v5 = vand.u32 4294901760, %v13076_v56  ;;  %v13145_v56 = vld [vmem:[#allocation87_spill] sm:$0xff] }
 0x10f   : > { %2512 = vmatmul.mubr.f32.gmra.mxu1 %v13122_v37  ;;  %8135 = vmatprep.subr.mxu0 %v13123_v11  ;;  %v7604_v31 = vpop.f32.mrf.mxu0  ;;  %v7654_v39 = vpop.f32.mrf.mxu1  ;;  %v13142_v11 = vld [vmem:[#allocation85_spill] sm:$0xff] }
 0x110   : > { %8183 = vmatprep.subr.mxu1 %v10116_v60  ;;  %8136 = vmatpush3.msra.mxu0 %v13124_v45  ;;  %v13128_v60 = vand.u32 4294901760, %v10294_v29  ;;  %v13143_v45 = vld [vmem:[#allocation73_spill] sm:$0xff] }
 0x111   : > { %8184 = vmatpush3.msra.mxu1 %v10123_v58  ;;  %8137 = vmatprep.subr.mxu0 %v13125_v62  ;;  %v7605_v4 = vpop.f32.mrf.mxu0  ;;  %v7655_v21 = vpop.f32.mrf.mxu1  ;;  %v13146_v62 = vld [vmem:[#allocation77_spill] sm:$0xff] }
 0x112   : > { %8185 = vmatprep.subr.mxu1 %v10133_v13  ;;  %2363 = vmatprep.mubr.f32.mxu0 %v13126_v48  ;;  %v7656_v27 = vadd.f32 %v7655_v21, %v7654_v39  ;;  %v13131_v13 = vand.u32 4294901760, %v13063_v12  ;;  %v7606_v39 = vadd.f32 %v7605_v4, %v7604_v31  ;;  %v13148_v31 = vand.u32 4294901760, %v10435_v6  ;;  %v13154_v6 = vld [vmem:[#allocation95_spill] sm:$0xff] }
 0x113   : > { %2519 = vmatprep.mubr.f32.mxu1 %v13127_v43  ;;  %8138 = vmatpush3.msra.mxu0 %v13128_v60  ;;  %v13152_v43 = vld [vmem:[#allocation81_spill] sm:$0xff] }
 0x114   : > { %8186 = vmatpush3.msra.mxu1 %v10144_v63  ;;  %2366 = vmatmul.mubr.f32.gmra.mxu0 %v13129_v26  ;;  %v10691_v58 = vadd.f32 %v7656_v27, %v7600_v17  ;;  %v7607_v42 = vpop.f32.mrf.mxu0  ;;  %v13133_v63 = vand.u32 4294901760, %v13067_v8  ;;  %v13151_v17 = vld [vmem:[#allocation93_spill] sm:$0xff]  ;;  %v13155_v26 = vld [vmem:[#allocation84_spill] sm:$0xff] }
 0x115   : > { %2523 = vmatmul.mubr.f32.gmra.mxu1 %v13130_v14  ;;  %8139 = vmatprep.subr.mxu0 %v13131_v13  ;;  %v7657_v38 = vpop.f32.mrf.mxu1  ;;  %v13157_v14 = vld [vmem:[#allocation10_spill] sm:$0xff]  ;;  %v13158_v13 = vand.u32 4294901760, %v10486_v54  ;;  %v13167_v54 = vld [vmem:[#allocation36_spill] sm:$0xff] }
 0x116   : > { %8187 = vmatprep.subr.mxu1 %v13064_v57  ;;  %8140 = vmatpush3.msra.mxu0 %v13132_v1  ;;  %v7608_v29 = vpop.f32.mrf.mxu0  ;;  %v13136_v57 = vand.u32 4294901760, %v13071_v44 }
 0x117   : > { %8188 = vmatpush3.msra.mxu1 %v13066_v2  ;;  %8141 = vmatprep.subr.mxu0 %v13133_v63  ;;  %v7658_v41 = vpop.f32.mrf.mxu1  ;;  %v7609_v27 = vadd.f32 %v7608_v29, %v7607_v42  ;;  %v13162_v63 = vld [vmem:[#allocation33_spill] sm:$0xff] }
 0x118   : > { %8189 = vmatprep.subr.mxu1 %v13068_v55  ;;  %2372 = vmatprep.mubr.f32.mxu0 %v13134_v25  ;;  %v7659_v12 = vadd.f32 %v7658_v41, %v7657_v38  ;;  %v13139_v55 = vand.u32 4294901760, %v10383_v3  ;;  %v13160_v38 = vld [vmem:[#allocation25_spill] sm:$0xff] }
 0x119   : > { %2530 = vmatprep.mubr.f32.mxu1 %v13135_v51  ;;  %8142 = vmatpush3.msra.mxu0 %v13136_v57  ;;  %v13161_v1 = vand.u32 4294901760, %v13160_v38  ;;  %v13163_v41 = vld [vmem:[#allocation89_spill] sm:$0xff]  ;;  %v13166_v51 = vld [vmem:[#allocation34_spill] sm:$0xff] }
 0x11a   : > { %8190 = vmatpush3.msra.mxu1 %v13072_v24  ;;  %2375 = vmatmul.mubr.f32.gmra.mxu0 %v13137_v18  ;;  %v10709_v2 = vadd.f32 %v7659_v12, %v7603_v19  ;;  %v7610_v8 = vpop.f32.mrf.mxu0  ;;  %v13141_v24 = vand.u32 4294901760, %v10403_v53  ;;  %v13164_v19 = vld [vmem:[#allocation88_spill] sm:$0xff] }
 0x11b   : > { %2534 = vmatmul.mubr.f32.gmra.mxu1 %v13138_v50  ;;  %8143 = vmatprep.subr.mxu0 %v13139_v55  ;;  %v7660_v37 = vpop.f32.mrf.mxu1  ;;  %v13165_v12 = vand.u32 4294901760, %v13164_v19  ;;  %v13168_v50 = vld [vmem:[#allocation92_spill] sm:$0xff]  ;;  %v13169_v55 = vld [vmem:[#allocation47_spill] sm:$0xff] }
 0x11c   : > { %8191 = vmatprep.subr.mxu1 %v13075_v16  ;;  %8144 = vmatpush3.msra.mxu0 %v13140_v5  ;;  %v7611_v44 = vpop.f32.mrf.mxu0  ;;  %v13144_v16 = vand.u32 4294901760, %v10414_v10 }
 0x11d   : > { %8192 = vmatpush3.msra.mxu1 %v13077_v47  ;;  %8145 = vmatprep.subr.mxu0 %v13141_v24  ;;  %v7661_v32 = vpop.f32.mrf.mxu1 }
 0x11e   : > { %8193 = vmatprep.subr.mxu1 %v13078_v20  ;;  %2381 = vmatprep.mubr.f32.mxu0 %v13142_v11  ;;  %v7662_v3 = vadd.f32 %v7661_v32, %v7660_v37  ;;  %v13147_v20 = vand.u32 4294901760, %v10431_v9  ;;  %v13172_v32 = vld [vmem:[#allocation45_spill] sm:$0xff] }
 0x11f   : > { %2541 = vmatprep.mubr.f32.mxu1 %v13143_v45  ;;  %8146 = vmatpush3.msra.mxu0 %v13144_v16  ;;  %v13174_v45 = vld [vmem:[#allocation50_spill] sm:$0xff] }
 0x120   : > { %8194 = vmatpush3.msra.mxu1 %v13081_v34  ;;  %2384 = vmatmul.mubr.f32.gmra.mxu0 %v13145_v56  ;;  %v10727_v47 = vadd.f32 %v7662_v3, %v7606_v39  ;;  %v7613_v53 = vpop.f32.mrf.mxu0  ;;  %v13149_v34 = vld [vmem:[#allocation24_spill] sm:$0xff]  ;;  %v13175_v56 = vld [vmem:[#allocation55_spill] sm:$0xff] }
 0x121   : > { %2545 = vmatmul.mubr.f32.gmra.mxu1 %v13146_v62  ;;  %8147 = vmatprep.subr.mxu0 %v13147_v20  ;;  %v7663_v21 = vpop.f32.mrf.mxu1  ;;  %v13150_v4 = vand.u32 4294901760, %v13149_v34  ;;  %v13173_v3 = vld [vmem:[#allocation96_spill] sm:$0xff]  ;;  %v12767_v62 = vmov 0.0  }
 0x122   : > { %8195 = vmatprep.subr.mxu1 %v13084_v40  ;;  %8148 = vmatpush3.msra.mxu0 %v13148_v31  ;;  %v7614_v10 = vpop.f32.mrf.mxu0  ;;  %v13153_v40 = vand.u32 4294901760, %v10464_v46 }
 0x123   : > { %8196 = vmatpush3.msra.mxu1 %v13085_v22  ;;  %8149 = vmatprep.subr.mxu0 %v13150_v4  ;;  %v7664_v48 = vpop.f32.mrf.mxu1  ;;  %v7615_v11 = vadd.f32 %v7614_v10, %v7613_v53 }
 0x124   : > { %8197 = vmatprep.subr.mxu1 %v13086_v0  ;;  %2390 = vmatprep.mubr.f32.mxu0 %v13151_v17  ;;  %v7665_v9 = vadd.f32 %v7664_v48, %v7663_v21  ;;  %v13156_v0 = vand.u32 4294901760, %v10482_v7  ;;  %v7612_v7 = vadd.f32 %v7611_v44, %v7610_v8  ;;  %v13170_v8 = vld [vmem:[#allocation7_spill] sm:$0xff]  ;;  %v13171_v44 = vld [vmem:[#allocation40_spill] sm:$0xff]  ;;  %v13178_v21 = vld [vmem:[#allocation62_spill] sm:$0xff] }
 0x125   : > { %2552 = vmatprep.mubr.f32.mxu1 %v13152_v43  ;;  %8150 = vmatpush3.msra.mxu0 %v13153_v40  ;;  %v13179_v48 = vld [vmem:[#allocation65_spill] sm:$0xff]  ;;  %v13180_v17 = vld [vmem:[#allocation66_spill] sm:$0xff] }
 0x126   : > { %8198 = vmatpush3.msra.mxu1 %v13088_v33  ;;  %2393 = vmatmul.mubr.f32.gmra.mxu0 %v13154_v6  ;;  %v10745_v22 = vadd.f32 %v7665_v9, %v7609_v27  ;;  %v10747_v60 = vpop.f32.mrf.mxu0  ;;  %v13159_v33 = vld [vmem:[#allocation32_spill] sm:$0xff]  ;;  %v13182_v43 = vld [vmem:[#allocation70_spill] sm:$0xff]  ;;  %v13183_v6 = vld [vmem:[#allocation79_spill] sm:$0xff] }
 0x127   : > { %2556 = vmatmul.mubr.f32.gmra.mxu1 %v13155_v26  ;;  %8151 = vmatprep.subr.mxu0 %v13156_v0  ;;  %v7666_v42 = vpop.f32.mrf.mxu1 }
 0x128   : > { %8199 = vmatprep.subr.mxu1 %v13157_v14  ;;  %8152 = vmatpush3.msra.mxu0 %v13158_v13  ;;  %v10755_v46 = vpop.f32.mrf.mxu0 }
 0x129   : > { %8200 = vmatpush3.msra.mxu1 %v13159_v33  ;;  %8153 = vmatprep.subr.mxu0 %v13161_v1  ;;  %v7667_v29 = vpop.f32.mrf.mxu1 }
 0x12a   : > { %8201 = vmatprep.subr.mxu1 %v13162_v63  ;;  %2563 = vmatprep.mubr.f32.mxu1 %v13163_v41  ;;  %v7668_v25 = vadd.f32 %v7667_v29, %v7666_v42  ;;  %v13184_v42 = vld [vmem:[#allocation82_spill] sm:$0xff] }
 0x12b   : > { %8154 = vmatpush3.msra.mxu0 %v13165_v12  ;;  %2744 = vmatprep.mubr.f32.mxu0 %v13166_v51  ;;  %v13186_v29 = vld [vmem:[#allocation90_spill] sm:$0xff] }
 0x12c   : > { %8202 = vmatpush3.msra.mxu1 %v13094_v28  ;;  %2746 = vmatmul.mubr.f32.vlgmr.msra.gmra.mxu0 %v13167_v54  ;;  %v10767_v57 = vadd.f32 %v7668_v25, %v7612_v7  ;;  %v7707_v18 = vpop.f32.mrf.mxu0 }
 0x12d   : > { %2567 = vmatmul.mubr.f32.gmra.mxu1 %v13168_v50  ;;  %8203 = vmatprep.subr.mxu1 %v13169_v55  ;;  %v7669_v37 = vpop.f32.mrf.mxu1 }
 0x12e   : > { %8204 = vmatpush3.msra.mxu1 %v13098_v49  ;;  %2574 = vmatprep.mubr.f32.mxu1 %v13170_v8  ;;  %v7708_v5 = vpop.f32.mrf.mxu0 }
 0x12f   : > { %8205 = vmatprep.subr.mxu1 %v13100_v35  ;;  %2751 = vmatprep.mubr.f32.mxu0 %v13171_v44  ;;  %v7670_v28 = vpop.f32.mrf.mxu1  ;;  %v7709_v24 = vadd.f32 %v7708_v5, %v7707_v18 }
 0x130   : > { %8206 = vmatpush3.msra.mxu1 %v13103_v36  ;;  %2753 = vmatmul.mubr.f32.gmra.mxu0 %v13172_v32  ;;  %v7671_v39 = vadd.f32 %v7670_v28, %v7669_v37 }
 0x131   : > { %2578 = vmatmul.mubr.f32.gmra.mxu1 %v13173_v3  ;;  %8207 = vmatprep.subr.mxu1 %v13106_v15  ;;  %v1070_v49 = vadd.f32 %v7709_v24, %v10671_v59 }
 0x132   : > { %8208 = vmatpush3.msra.mxu1 %v10455_v52  ;;  %2758 = vmatprep.mubr.f32.mxu0 %v13174_v45  ;;  %v10782_v35 = vadd.f32 %v7671_v39, %v7615_v11  ;;  %v10784_v16 = vpop.f32.mrf.mxu1  ;;  %v13176_v52 = vld [vmem:[#allocation56_spill] sm:$0xff] }
 0x133   : > { %8209 = vmatprep.subr.mxu1 %v10469_v61  ;;  %2897 = vmatprep.mubr.f32.mxu1 %v13166_v51  ;;  %v7710_v36 = vpop.f32.mrf.mxu0  ;;  %v13177_v61 = vld [vmem:[#allocation61_spill] sm:$0xff] }
 0x134   : > { %8210 = vmatpush3.msra.mxu1 %v10478_v23  ;;  %2760 = vmatmul.mubr.f32.gmra.mxu0 %v13175_v56  ;;  %v10790_v15 = vpop.f32.mrf.mxu1 }
 0x135   : > { %2899 = vmatmul.mubr.f32.vlgmr.msra.gmra.mxu1 %v13167_v54  ;;  %2765 = vmatprep.mubr.f32.mxu0 %v13176_v52  ;;  %v7711_v59 = vpop.f32.mrf.mxu0 }
 0x136   : > { %2904 = vmatprep.mubr.f32.mxu1 %v13171_v44  ;;  %v7712_v53 = vadd.f32 %v7711_v59, %v7710_v36  ;;  %8451 = vmatprep.subr.mxu0 %v12767_v62 }
 0x137   : > { %8470 = vmatprep.subr.mxu1 %v12767_v62 }
 0x138   : > { %2767 = vmatmul.mubr.f32.gmra.mxu0 %v13177_v61  ;;  %v1079_v23 = vadd.f32 %v7712_v53, %v10691_v58  ;;  %v7763_v20 = vpop.f32.mrf.mxu1 }
 0x139   : > { %2906 = vmatmul.mubr.f32.gmra.mxu1 %v13172_v32  ;;  %2772 = vmatprep.mubr.f32.mxu0 %v13178_v21  ;;  %v10801_v31 = vpop.f32.mrf.mxu0 }
 0x13a   : > { %2911 = vmatprep.mubr.f32.mxu1 %v13174_v45  ;;  %v7764_v10 = vpop.f32.mrf.mxu1 }
 0x13b   : > { %v10804_v34 = vpop.f32.mrf.mxu0  ;;  %v7765_v4 = vadd.f32 %v7764_v10, %v7763_v20 }
 0x13c   : > { %2774 = vmatmul.mubr.f32.gmra.mxu0 %v13179_v48 }
 0x13d   : > { %2913 = vmatmul.mubr.f32.gmra.mxu1 %v13175_v56  ;;  %2779 = vmatprep.mubr.f32.mxu0 %v13180_v17  ;;  %v10809_v58 = vadd.f32 %v7765_v4, %v1070_v49 }
 0x13e   : > { %2918 = vmatprep.mubr.f32.mxu1 %v13176_v52  ;;  %v10812_v27 = vpop.f32.mrf.mxu0 }
 0x13f   : > { %13181 = vst [vmem:[#allocation43_spill] sm:$0xff] %v10809_v58  ;;  %v7766_v9 = vpop.f32.mrf.mxu1 }
 0x140   : > { %2781 = vmatmul.mubr.f32.gmra.mxu0 %v13182_v43  ;;  %v10815_v40 = vpop.f32.mrf.mxu0 }
 0x141   : > { %2920 = vmatmul.mubr.f32.gmra.mxu1 %v13177_v61  ;;  %2786 = vmatprep.mubr.f32.mxu0 %v13183_v6  ;;  %v7767_v26 = vpop.f32.mrf.mxu1 }
 0x142   : > { %2925 = vmatprep.mubr.f32.mxu1 %v13178_v21  ;;  %v7768_v0 = vadd.f32 %v7767_v26, %v7766_v9  ;;  %v7674_v26 = vadd.f32 %v10790_v15, %v10784_v16 }
 0x144   : > { %2788 = vmatmul.mubr.f32.gmra.mxu0 %v13184_v42  ;;  %v10821_v14 = vadd.f32 %v7768_v0, %v1079_v23  ;;  %v7719_v13 = vpop.f32.mrf.mxu0 }
 0x145   : > { %2927 = vmatmul.mubr.f32.gmra.mxu1 %v13179_v48  ;;  %2793 = vmatprep.mubr.f32.mxu0 %v13042_v30  ;;  %v10825_v33 = vpop.f32.mrf.mxu1 }
 0x146   : > { %13185 = vst [vmem:[#allocation46_spill] sm:$0xff] %v10821_v14  ;;  %2932 = vmatprep.mubr.f32.mxu1 %v13180_v17  ;;  %v7720_v38 = vpop.f32.mrf.mxu0 }
 0x147   : > { %v7770_v1 = vpop.f32.mrf.mxu1 }
 0x148   : > { %2795 = vmatmul.mubr.f32.gmra.mxu0 %v13186_v29 }
 0x149   : > { %2934 = vmatmul.mubr.f32.gmra.mxu1 %v13182_v43  ;;  %8467 = vmatprep.mubr.msk.f32.mxu0 %vm9035_vm0, %v12767_v62 }
 0x14a   : > { %2939 = vmatprep.mubr.f32.mxu1 %v13183_v6  ;;  %v7722_v63 = vpop.f32.mrf.mxu0 }
 0x14b   : > { %v10833_v41 = vpop.f32.mrf.mxu1 }
 0x14c   : > { %v7723_v7 = vpop.f32.mrf.mxu0 }
 0x14d   : > { %2941 = vmatmul.mubr.f32.gmra.mxu1 %v13184_v42  ;;  %v7773_v25 = vpop.f32.mrf.mxu1  ;;  %v7724_v0 = vadd.f32 %v7723_v7, %v7722_v63  ;;  %v7618_v42 = vadd.f32 %v10755_v46, %v10747_v60 }
 0x14e   : > { %2946 = vmatprep.mubr.f32.mxu1 %v13042_v30 }
 0x14f   : > { %v1115_v16 = vadd.f32 %v7724_v0, %v10767_v57 }
 0x150   : > { %v7725_v19 = vpop.f32.mrf.mxu0 }
 0x151   : > { %2948 = vmatmul.mubr.f32.gmra.mxu1 %v13186_v29  ;;  %v7775_v12 = vpop.f32.mrf.mxu1  ;;  %v7715_v29 = vadd.f32 %v10804_v34, %v10801_v31  ;;  %v7774_v34 = vadd.f32 %v7773_v25, %v10833_v41 }
 0x152   : > { %v7726_v51 = vpop.f32.mrf.mxu0  ;;  %8486 = vmatprep.mubr.msk.f32.mxu1 %vm9035_vm0, %v12767_v62  ;;  %v7718_v62 = vadd.f32 %v10815_v40, %v10812_v27 }
 0x153   : > { %v7776_v54 = vpop.f32.mrf.mxu1  ;;  %v1088_v46 = vadd.f32 %v7715_v29, %v10709_v2 }
 0x154   : > { %v7777_v15 = vadd.f32 %v7776_v54, %v7775_v12  ;;  %v1097_v31 = vadd.f32 %v7718_v62, %v10727_v47 }
 0x156   : > { %v10840_v18 = vpop.f32.mrf.mxu0  ;;  %v1274_v41 = vadd.f32 %v7774_v34, %v1097_v31 }
 0x157   : > { %v7778_v50 = vpop.f32.mrf.mxu1 }
 0x158   : > { %v7729_v55 = vpop.f32.mrf.mxu0 }
 0x159   : > { %v7779_v37 = vpop.f32.mrf.mxu1  ;;  %v7730_v2 = vadd.f32 %v7729_v55, %v10840_v18  ;;  %v403_v18 = vld [vmem:[%s12504_s4] sm:$0xf] }
 0x15c   : > { %v10842_v8 = vpop.f32.mrf.mxu0 }
 0x15d   : > { %13187 = vst [vmem:[#allocation52_spill] sm:$0xff] %v10842_v8  ;;  %v7781_v5 = vpop.f32.mrf.mxu1 }
 0x15e   : > { %v10844_v28 = vpop.f32.mrf.mxu0 }
 0x15f   : > { %v7782_v44 = vpop.f32.mrf.mxu1  ;;  %13188 = vst [vmem:[#allocation58_spill] sm:$0xff] %v10844_v28  ;;  %v7727_v28 = vadd.f32 %v7726_v51, %v7725_v19 }
 0x160   : > { %v7783_v27 = vadd.f32 %v7782_v44, %v7781_v5 }
 0x161   : > { %v1124_v7 = vadd.f32 %v7727_v28, %v10782_v35 }
 0x162   : > { %v10846_v30 = vpop.f32.mrf.mxu1 }
 0x163   : > { %v10848_v24 = vpop.f32.mrf.mxu0  ;;  %v1307_v25 = vadd.f32 %v7783_v27, %v1124_v7  ;;  %v9036_v27 = vmov 0  }
 0x164   : > { %v7785_v32 = vpop.f32.mrf.mxu1  ;;  %8891 = vset.pattern.permute.xlu0 %v9036_v27 }
 0x165   : > { %v7823_v11 = vpop.f32.mrf.mxu0 }
 0x168   : > { %v10850_v39 = vpop.f32.mrf.mxu1 }
 0x169   : > { %13189 = vst [vmem:[#allocation67_spill] sm:$0xff] %v10850_v39  ;;  %v7825_v3 = vpop.f32.mrf.mxu0  ;;  %v7780_v39 = vadd.f32 %v7779_v37, %v7778_v50  ;;  %v7786_v37 = vadd.f32 %v7785_v32, %v10846_v30 }
 0x16a   : > { %v10852_v45 = vpop.f32.mrf.mxu1 }
 0x16b   : > { %v7826_v49 = vpop.f32.mrf.mxu0  ;;  %13190 = vst [vmem:[#allocation75_spill] sm:$0xff] %v10852_v45  ;;  %v7721_v45 = vadd.f32 %v7720_v38, %v7719_v13  ;;  %v1296_v13 = vadd.f32 %v7780_v39, %v1115_v16 }
 0x16c   : > { %v7827_v50 = vadd.f32 %v7826_v49, %v7825_v3  ;;  %v13194_v3 = vld [vmem:[#allocation58_spill] sm:$0xff] }
 0x16d   : > { %v1106_v40 = vadd.f32 %v7721_v45, %v10745_v22 }
 0x16e   : > { %v7828_v36 = vpop.f32.mrf.mxu0 }
 0x16f   : > { %v10854_v56 = vpop.f32.mrf.mxu1  ;;  %v1285_v51 = vadd.f32 %v7777_v15, %v1106_v40  ;;  %v404_v40 = vld [vmem:[%s12505_s5] sm:$0xf] }
 0x170   : > { %13191 = vst [vmem:[#allocation76_spill] sm:$0xff] %v10854_v56  ;;  %v7829_v52 = vpop.f32.mrf.mxu0  ;;  %v7771_v56 = vadd.f32 %v7770_v1, %v10825_v33  ;;  %2963 = vperm.xlu0 %8891, %v404_v40  }
 0x171   : > { %v10856_v59 = vpop.f32.mrf.mxu1  ;;  %v7830_v57 = vadd.f32 %v7829_v52, %v7828_v36  ;;  %v13193_v52 = vld [vmem:[#allocation52_spill] sm:$0xff] }
 0x172   : > { %13192 = vst [vmem:[#allocation80_spill] sm:$0xff] %v10856_v59  ;;  %v932_v59 = vadd.f32 %v7674_v26, %v7618_v42  ;;  %v1263_v1 = vadd.f32 %v7771_v56, %v1088_v46  ;;  %v7821_v49 = vadd.f32 %v13194_v3, %v13193_v52 }
 0x173   : > { %v1507_v39 = vadd.f32 %v7830_v57, %v1274_v41 }
 0x174   : > { %v7831_v53 = vpop.f32.mrf.mxu0  ;;  %v1133_v55 = vadd.f32 %v7730_v2, %v932_v59  ;;  %v1500_v32 = vadd.f32 %v7827_v50, %v1263_v1 }
 0x175   : > { %v7881_v61 = vpop.f32.mrf.mxu1 }
 0x176   : > { %v7832_v23 = vpop.f32.mrf.mxu0 }
 0x177   : > { %v7882_v20 = vpop.f32.mrf.mxu1  ;;  %v7833_v38 = vadd.f32 %v7832_v23, %v7831_v53 }
 0x178   : > { %v7883_v45 = vadd.f32 %v7882_v20, %v7881_v61  ;;  %v1318_v61 = vadd.f32 %v7786_v37, %v1133_v55 }
 0x179   : > { %v1514_v5 = vadd.f32 %v7833_v38, %v1285_v51 }
 0x17a   : > { %v7834_v21 = vpop.f32.mrf.mxu0  ;;  %v1653_v0 = vadd.f32 %v7883_v45, %v1500_v32 }
 0x17b   : > { %v7884_v10 = vpop.f32.mrf.mxu1 }
 0x17c   : > { %v7835_v4 = vpop.f32.mrf.mxu0  ;;  %v1693_v1 = vmul.f32 0.0625, %v1653_v0 }
 0x17d   : > { %v7885_v48 = vpop.f32.mrf.mxu1  ;;  %v7836_v63 = vadd.f32 %v7835_v4, %v7834_v21 }
 0x17e   : > { %v7886_v22 = vadd.f32 %v7885_v48, %v7884_v10 }
 0x17f   : > { %v1521_v54 = vadd.f32 %v7836_v63, %v1296_v13  ;;  %v13200_v63 = vld [vmem:[#allocation43_spill] sm:$0xff] }
 0x180   : > { %v7837_v17 = vpop.f32.mrf.mxu0  ;;  %v1660_v21 = vadd.f32 %v7886_v22, %v1507_v39 }
 0x181   : > { %v7887_v9 = vpop.f32.mrf.mxu1 }
 0x182   : > { %v7838_v43 = vpop.f32.mrf.mxu0  ;;  %v1694_v31 = vmul.f32 0.0625, %v1660_v21 }
 0x183   : > { %v7888_v6 = vpop.f32.mrf.mxu1  ;;  %v7839_v19 = vadd.f32 %v7838_v43, %v7837_v17  ;;  %v2968_v17 = vsel %vm2966_vm1, %v403_v18, 0  ;;  %v13198_v43 = vld [vmem:[#allocation67_spill] sm:$0xff] }
 0x184   : > { %v7889_v47 = vadd.f32 %v7888_v6, %v7887_v9  ;;  %v13197_v9 = vld [vmem:[#allocation46_spill] sm:$0xff]  ;;  %v13199_v6 = vld [vmem:[#allocation75_spill] sm:$0xff]  ;;  %v10899_v57 = vand.u32 4294901760, %v2968_v17 }
 0x185   : > { %v1528_v36 = vadd.f32 %v7839_v19, %v1307_v25  ;;  %v7877_v26 = vadd.f32 %v13199_v6, %v13198_v43 }
 0x186   : > { %v7840_v58 = vpop.f32.mrf.mxu0  ;;  %v1667_v53 = vadd.f32 %v7889_v47, %v1514_v5  ;;  %13201 = vst [vmem:[#allocation83_spill] sm:$0xff] %v10899_v57 }
 0x187   : > { %v7890_v14 = vpop.f32.mrf.mxu1 }
 0x188   : > { %v7841_v8 = vpop.f32.mrf.mxu0  ;;  %v1695_v42 = vmul.f32 0.0625, %v1667_v53 }
 0x189   : > { %v7891_v60 = vpop.f32.mrf.mxu1  ;;  %v7842_v30 = vadd.f32 %v7841_v8, %v7840_v58 }
 0x18a   : > { %v7892_v33 = vadd.f32 %v7891_v60, %v7890_v14  ;;  %v7824_v14 = vadd.f32 %v7823_v11, %v10848_v24  ;;  %v13195_v24 = vld [vmem:[#allocation76_spill] sm:$0xff]  ;;  %v1486_v60 = vadd.f32 %v7821_v49, %v13200_v63  ;;  %v10901_v19 = vand.u32 4294901760, %v1695_v42 }
 0x18b   : > { %v13196_v11 = vld [vmem:[#allocation80_spill] sm:$0xff]  ;;  %v1535_v29 = vadd.f32 %v7842_v30, %v1318_v61 }
 0x18c   : > { %v10873_v12 = vpop.f32.mrf.mxu0  ;;  %v1674_v35 = vadd.f32 %v7892_v33, %v1521_v54  ;;  %v7880_v23 = vadd.f32 %v13196_v11, %v13195_v24  ;;  %v1493_v59 = vadd.f32 %v7824_v14, %v13197_v9  ;;  %v1639_v33 = vadd.f32 %v7877_v26, %v1486_v60 }
 0x18d   : > { %v7893_v62 = vpop.f32.mrf.mxu1  ;;  %v10922_v39 = vsub.f32 %v1695_v42, %v10901_v19 }
 0x18e   : > { %v7932_v28 = vpop.f32.mrf.mxu0  ;;  %v1696_v20 = vmul.f32 0.0625, %v1674_v35  ;;  %v1646_v46 = vadd.f32 %v7880_v23, %v1493_v59  ;;  %v1691_v5 = vmul.f32 0.0625, %v1639_v33  ;;  %v10916_v35 = vand.u32 4294901760, %v1693_v1 }
 0x18f   : > { %v7894_v44 = vpop.f32.mrf.mxu1  ;;  %v7933_v50 = vadd.f32 %v7932_v28, %v10873_v12 }
 0x190   : > { %v7895_v56 = vadd.f32 %v7894_v44, %v7893_v62  ;;  %v10897_v13 = vand.u32 4294901760, %v1696_v20  ;;  %v1692_v47 = vmul.f32 0.0625, %v1646_v46  ;;  %v10908_v62 = vand.u32 4294901760, %v1694_v31 }
 0x191   : > { %v10919_v44 = vsub.f32 %v2968_v17, %v10899_v57  ;;  %v10942_v53 = vand.u32 4294901760, %v1691_v5  ;;  %v10951_v24 = vsub.f32 %v1693_v1, %v10916_v35 }
 0x192   : > { %v1681_v10 = vadd.f32 %v7895_v56, %v1528_v36  ;;  %v7896_v4 = vpop.f32.mrf.mxu1  ;;  %v10911_v25 = vsub.f32 %v1696_v20, %v10897_v13  ;;  %v13203_v56 = vmov 0.0   ;;  %v10934_v18 = vand.u32 4294901760, %v1692_v47 }
 0x193   : > { %v10885_v48 = vpop.f32.mrf.mxu0  ;;  %13202 = vst [vmem:[#allocation86_spill] sm:$0xff] %v10919_v44  ;;  %v10937_v55 = vsub.f32 %v1694_v31, %v10908_v62  ;;  %v10948_v32 = vand.u32 4294901760, %v10919_v44  ;;  %v10979_v26 = vsub.f32 %v1691_v5, %v10942_v53  ;;  %v3107_v42 = vand.u32 4294901760, %v10951_v24 }
 0x194   : > { %v1697_v58 = vmul.f32 0.0625, %v1681_v10  ;;  %v7897_v8 = vpop.f32.mrf.mxu1  ;;  %v3086_v49 = vand.u32 4294901760, %v10911_v25  ;;  %v3093_v10 = vand.u32 4294901760, %v10922_v39  ;;  %v10964_v20 = vsub.f32 %v1692_v47, %v10934_v18 }
 0x195   : > { %v7898_v16 = vadd.f32 %v7897_v8, %v7896_v4  ;;  %v7935_v15 = vpop.f32.mrf.mxu0  ;;  %13204 = vst [vmem:[#allocation8_spill] sm:$0xff] %v10948_v32  ;;  %v3100_v59 = vand.u32 4294901760, %v10937_v55  ;;  %v3121_v33 = vand.u32 4294901760, %v10979_v26 }
 0x196   : > { %v10892_v34 = vand.u32 4294901760, %v1697_v58  ;;  %v7936_v4 = vadd.f32 %v7935_v15, %v10885_v48  ;;  %v3087_v9 = vsub.f32 %v10911_v25, %v3086_v49  ;;  %v3046_v48 = vsub.f32 %v10919_v44, %v10948_v32 }
 0x197   : > { %v1688_v38 = vadd.f32 %v7898_v16, %v1535_v29  ;;  %v3094_v8 = vsub.f32 %v10922_v39, %v3093_v10  ;;  %v3101_v63 = vsub.f32 %v10937_v55, %v3100_v59  ;;  %v3114_v60 = vand.u32 4294901760, %v10964_v20 }
 0x198   : > { %v7987_v7 = vpop.f32.mrf.mxu1  ;;  %v10904_v51 = vsub.f32 %v1697_v58, %v10892_v34  ;;  %v3088_v15 = vand.u32 4294901760, %v3087_v9  ;;  %v10997_v40 = vand.u32 4294901760, %v3046_v48 }
 0x199   : > { %v1698_v2 = vmul.f32 0.0625, %v1688_v38  ;;  %v10906_v54 = vpop.f32.mrf.mxu0  ;;  %v3095_v27 = vand.u32 4294901760, %v3094_v8  ;;  %v3108_v38 = vsub.f32 %v10951_v24, %v3107_v42  ;;  %v3115_v47 = vsub.f32 %v10964_v20, %v3114_v60 }
 0x19a   : > { %v7988_v41 = vpop.f32.mrf.mxu1  ;;  %v3079_v12 = vand.u32 4294901760, %v10904_v51  ;;  %13205 = vst [vmem:[#allocation13_spill] sm:$0xff] %v10997_v40 }
 0x19b   : > { %v10914_v22 = vand.u32 4294901760, %v1698_v2  ;;  %v7938_v37 = vpop.f32.mrf.mxu0  ;;  %v7989_v14 = vadd.f32 %v7988_v41, %v7987_v7 }
 0x19c   : > { %v3080_v21 = vsub.f32 %v10904_v51, %v3079_v12  ;;  %v7939_v46 = vadd.f32 %v7938_v37, %v10906_v54  ;;  %v3102_v54 = vand.u32 4294901760, %v3101_v63  ;;  %v3109_v37 = vand.u32 4294901760, %v3108_v38 }
 0x19d   : > { %v10925_v45 = vsub.f32 %v1698_v2, %v10914_v22  ;;  %v10927_v36 = vadd.f32 %v7989_v14, %v7933_v50  ;;  %8452 = vmatpush3.msra.mxu0 %v10914_v22  ;;  %v3122_v14 = vsub.f32 %v10979_v26, %v3121_v33 }
 0x19e   : > { %v10931_v28 = vpop.f32.mrf.mxu0  ;;  %8453 = vmatprep.subr.mxu0 %v13203_v56  ;;  %v3081_v58 = vand.u32 4294901760, %v3080_v21 }
 0x19f   : > { %v7990_v52 = vpop.f32.mrf.mxu1  ;;  %8454 = vmatpush3.msra.mxu0 %v10892_v34  ;;  %v3072_v3 = vand.u32 4294901760, %v10925_v45 }
 0x1a0   : > { %v10944_v30 = vpop.f32.mrf.mxu0  ;;  %8455 = vmatprep.subr.mxu0 %v13203_v56 }
 0x1a1   : > { %v7991_v11 = vpop.f32.mrf.mxu1  ;;  %8456 = vmatpush3.msra.mxu0 %v10897_v13  ;;  %v3073_v23 = vsub.f32 %v10925_v45, %v3072_v3  ;;  %v7942_v5 = vadd.f32 %v10944_v30, %v10931_v28  ;;  %v3123_v28 = vand.u32 4294901760, %v3122_v14 }
 0x1a2   : > { %v7992_v61 = vadd.f32 %v7991_v11, %v7990_v52  ;;  %8457 = vmatprep.subr.mxu0 %v13203_v56  ;;  %v3116_v11 = vand.u32 4294901760, %v3115_v47 }
 0x1a3   : > { %8458 = vmatpush3.msra.mxu0 %v10901_v19  ;;  %v3074_v17 = vand.u32 4294901760, %v3073_v23 }
 0x1a4   : > { %v10971_v43 = vadd.f32 %v7992_v61, %v7936_v4  ;;  %v10973_v6 = vpop.f32.mrf.mxu0  ;;  %8459 = vmatprep.subr.mxu0 %v13203_v56 }
 0x1a5   : > { %v7993_v0 = vpop.f32.mrf.mxu1  ;;  %8460 = vmatpush3.msra.mxu0 %v10908_v62  ;;  %8471 = vmatpush3.msra.mxu1 %v3074_v17 }
 0x1a6   : > { %v7944_v29 = vpop.f32.mrf.mxu0  ;;  %8461 = vmatprep.subr.mxu0 %v13203_v56  ;;  %8472 = vmatprep.subr.mxu1 %v13203_v56 }
 0x1a7   : > { %v7994_v16 = vpop.f32.mrf.mxu1  ;;  %8462 = vmatpush3.msra.mxu0 %v10916_v35  ;;  %8473 = vmatpush3.msra.mxu1 %v3081_v58  ;;  %v7945_v17 = vadd.f32 %v7944_v29, %v10973_v6 }
 0x1a8   : > { %v7995_v31 = vadd.f32 %v7994_v16, %v7993_v0  ;;  %8463 = vmatprep.subr.mxu0 %v13203_v56  ;;  %8474 = vmatprep.subr.mxu1 %v13203_v56 }
 0x1a9   : > { %8464 = vmatpush3.msra.mxu0 %v10934_v18  ;;  %8475 = vmatpush3.msra.mxu1 %v3088_v15 }
 0x1aa   : > { %v11003_v1 = vadd.f32 %v7995_v31, %v7939_v46  ;;  %v7946_v7 = vpop.f32.mrf.mxu0  ;;  %8465 = vmatprep.subr.mxu0 %v13203_v56  ;;  %8476 = vmatprep.subr.mxu1 %v13203_v56 }
 0x1ab   : > { %v7996_v2 = vpop.f32.mrf.mxu1  ;;  %8466 = vmatpush3.msra.mxu0 %v10942_v53  ;;  %8477 = vmatpush3.msra.mxu1 %v3095_v27 }
 0x1ac   : > { %v7947_v41 = vpop.f32.mrf.mxu0  ;;  %8478 = vmatprep.subr.mxu1 %v13203_v56  ;;  %8489 = vmatprep.subr.mxu0 %v13203_v56 }
 0x1ad   : > { %v7997_v50 = vpop.f32.mrf.mxu1  ;;  %8468 = vmatmul.mubr.f32.vlgmr.msra.gmra.mxu0 %v10997_v40  ;;  %8479 = vmatpush3.msra.mxu1 %v3102_v54  ;;  %v7948_v29 = vadd.f32 %v7947_v41, %v7946_v7 }
 0x1ae   : > { %v7998_v52 = vadd.f32 %v7997_v50, %v7996_v2  ;;  %8490 = vmatpush3.msra.mxu0 %v10925_v45  ;;  %8480 = vmatprep.subr.mxu1 %v13203_v56 }
 0x1af   : > { %8491 = vmatprep.subr.mxu0 %v13203_v56  ;;  %8481 = vmatpush3.msra.mxu1 %v3109_v37 }
 0x1b0   : > { %v11022_v23 = vadd.f32 %v7998_v52, %v7942_v5  ;;  %v7949_v21 = vpop.f32.mrf.mxu0  ;;  %8492 = vmatpush3.msra.mxu0 %v10904_v51  ;;  %8482 = vmatprep.subr.mxu1 %v13203_v56 }
 0x1b1   : > { %v7999_v4 = vpop.f32.mrf.mxu1  ;;  %8493 = vmatprep.subr.mxu0 %v13203_v56  ;;  %8483 = vmatpush3.msra.mxu1 %v3116_v11 }
 0x1b2   : > { %v7950_v30 = vpop.f32.mrf.mxu0  ;;  %8494 = vmatpush3.msra.mxu0 %v10911_v25  ;;  %8484 = vmatprep.subr.mxu1 %v13203_v56 }
 0x1b3   : > { %v8000_v61 = vpop.f32.mrf.mxu1  ;;  %8495 = vmatprep.subr.mxu0 %v13203_v56  ;;  %8485 = vmatpush3.msra.mxu1 %v3123_v28  ;;  %v7951_v7 = vadd.f32 %v7950_v30, %v7949_v21 }
 0x1b4   : > { %v8001_v9 = vadd.f32 %v8000_v61, %v7999_v4  ;;  %8496 = vmatpush3.msra.mxu0 %v10922_v39  ;;  %8508 = vmatprep.subr.mxu1 %v13203_v56 }
 0x1b5   : > { %8497 = vmatprep.subr.mxu0 %v13203_v56  ;;  %8487 = vmatmul.mubr.f32.vlgmr.msra.gmra.mxu1 %v10899_v57 }
 0x1b6   : > { %v11035_v48 = vadd.f32 %v8001_v9, %v7945_v17  ;;  %v11037_v0 = vpop.f32.mrf.mxu0  ;;  %8498 = vmatpush3.msra.mxu0 %v10937_v55  ;;  %8509 = vmatpush3.msra.mxu1 %v10914_v22 }
 0x1b7   : > { %v8002_v58 = vpop.f32.mrf.mxu1  ;;  %8499 = vmatprep.subr.mxu0 %v13203_v56  ;;  %8510 = vmatprep.subr.mxu1 %v13203_v56 }
 0x1b8   : > { %v11043_v6 = vpop.f32.mrf.mxu0  ;;  %8500 = vmatpush3.msra.mxu0 %v10951_v24  ;;  %8511 = vmatpush3.msra.mxu1 %v10892_v34 }
 0x1b9   : > { %v8003_v8 = vpop.f32.mrf.mxu1  ;;  %8501 = vmatprep.subr.mxu0 %v13203_v56  ;;  %8512 = vmatprep.subr.mxu1 %v13203_v56 }
 0x1ba   : > { %v8004_v16 = vadd.f32 %v8003_v8, %v8002_v58  ;;  %8502 = vmatpush3.msra.mxu0 %v10964_v20  ;;  %8513 = vmatpush3.msra.mxu1 %v10897_v13 }
 0x1bb   : > { %8503 = vmatprep.subr.mxu0 %v13203_v56  ;;  %8514 = vmatprep.subr.mxu1 %v13203_v56 }
 0x1bc   : > { %v11053_v15 = vadd.f32 %v8004_v16, %v7948_v29  ;;  %v8043_v63 = vpop.f32.mrf.mxu0  ;;  %8504 = vmatpush3.msra.mxu0 %v10979_v26  ;;  %8515 = vmatpush3.msra.mxu1 %v10901_v19 }
 0x1bd   : > { %v8005_v46 = vpop.f32.mrf.mxu1  ;;  %8505 = vmatprep.mubr.msk.f32.mxu0 %vm9035_vm0, %v13203_v56  ;;  %8516 = vmatprep.subr.mxu1 %v13203_v56 }
 0x1be   : > { %v8044_v31 = vpop.f32.mrf.mxu0  ;;  %8527 = vmatprep.subr.mxu0 %v13203_v56  ;;  %8506 = vmatmul.mubr.f32.vlgmr.msra.gmra.mxu0 %v10919_v44  ;;  %v7954_v44 = vadd.f32 %v11043_v6, %v11037_v0 }
 0x1bf   : > { %v8006_v27 = vpop.f32.mrf.mxu1  ;;  %v8045_v38 = vadd.f32 %v8044_v31, %v8043_v63  ;;  %8517 = vmatpush3.msra.mxu1 %v10908_v62  ;;  %8528 = vmatpush3.msra.mxu0 %v3072_v3 }
 0x1c0   : > { %v8007_v2 = vadd.f32 %v8006_v27, %v8005_v46  ;;  %8518 = vmatprep.subr.mxu1 %v13203_v56  ;;  %8529 = vmatprep.subr.mxu0 %v13203_v56 }
 0x1c1   : > { %v2332_v54 = vadd.f32 %v8045_v38, %v10927_v36  ;;  %8519 = vmatpush3.msra.mxu1 %v10916_v35  ;;  %8530 = vmatpush3.msra.mxu0 %v3079_v12 }
 0x1c2   : > { %v11071_v47 = vadd.f32 %v8007_v2, %v7951_v7  ;;  %v11073_v41 = vpop.f32.mrf.mxu1  ;;  %8520 = vmatprep.subr.mxu1 %v13203_v56  ;;  %8531 = vmatprep.subr.mxu0 %v13203_v56 }
 0x1c3   : > { %v8046_v45 = vpop.f32.mrf.mxu0  ;;  %8521 = vmatpush3.msra.mxu1 %v10934_v18  ;;  %8532 = vmatpush3.msra.mxu0 %v3086_v49 }
 0x1c4   : > { %v11080_v36 = vpop.f32.mrf.mxu1  ;;  %8522 = vmatprep.subr.mxu1 %v13203_v56  ;;  %8533 = vmatprep.subr.mxu0 %v13203_v56 }
 0x1c5   : > { %v8047_v51 = vpop.f32.mrf.mxu0  ;;  %8523 = vmatpush3.msra.mxu1 %v10942_v53  ;;  %8534 = vmatpush3.msra.mxu0 %v3093_v10 }
 0x1c6   : > { %v8048_v12 = vadd.f32 %v8047_v51, %v8046_v45  ;;  %8524 = vmatprep.mubr.msk.f32.mxu1 %vm9035_vm0, %v13203_v56  ;;  %8535 = vmatprep.subr.mxu0 %v13203_v56 }
 0x1c7   : > { %8546 = vmatprep.subr.mxu1 %v13203_v56  ;;  %8525 = vmatmul.mubr.f32.vlgmr.msra.gmra.mxu1 %v10948_v32 }
 0x1c8   : > { %v2341_v25 = vadd.f32 %v8048_v12, %v10971_v43  ;;  %v8099_v3 = vpop.f32.mrf.mxu1  ;;  %8536 = vmatpush3.msra.mxu0 %v3100_v59  ;;  %8547 = vmatpush3.msra.mxu1 %v10914_v22 }
 0x1c9   : > { %v11096_v39 = vpop.f32.mrf.mxu0  ;;  %8537 = vmatprep.subr.mxu0 %v13203_v56  ;;  %8548 = vmatprep.subr.mxu1 %v13203_v56 }
 0x1ca   : > { %v8100_v49 = vpop.f32.mrf.mxu1  ;;  %8538 = vmatpush3.msra.mxu0 %v3107_v42  ;;  %8549 = vmatpush3.msra.mxu1 %v10892_v34 }
 0x1cb   : > { %v11103_v10 = vpop.f32.mrf.mxu0  ;;  %v8101_v43 = vadd.f32 %v8100_v49, %v8099_v3  ;;  %8539 = vmatprep.subr.mxu0 %v13203_v56  ;;  %8550 = vmatprep.subr.mxu1 %v13203_v56 }
 0x1cc   : > { %8540 = vmatpush3.msra.mxu0 %v3114_v60  ;;  %8551 = vmatpush3.msra.mxu1 %v10897_v13 }
 0x1cd   : > { %v11110_v22 = vadd.f32 %v8101_v43, %v2332_v54  ;;  %8541 = vmatprep.subr.mxu0 %v13203_v56  ;;  %8552 = vmatprep.subr.mxu1 %v13203_v56  ;;  %v8010_v43 = vadd.f32 %v11080_v36, %v11073_v41 }
 0x1ce   : > { %v11114_v55 = vpop.f32.mrf.mxu0  ;;  %8542 = vmatpush3.msra.mxu0 %v3121_v33  ;;  %8543 = vmatprep.mubr.msk.f32.mxu0 %vm9035_vm0, %v13203_v56 }
 0x1cf   : > { %13206 = vst [vmem:[#allocation28_spill] sm:$0xff] %v11110_v22  ;;  %v8102_v34 = vpop.f32.mrf.mxu1  ;;  %8553 = vmatpush3.msra.mxu1 %v10901_v19  ;;  %8544 = vmatmul.mubr.f32.vlgmr.msra.gmra.mxu0 %v10899_v57 }
 0x1d0   : > { %v11122_v13 = vpop.f32.mrf.mxu0  ;;  %8554 = vmatprep.subr.mxu1 %v13203_v56  ;;  %8562 = vmatprep.mubr.msk.f32.mxu1 %vm9035_vm0, %v13203_v56 }
 0x1d1   : > { %v8103_v24 = vpop.f32.mrf.mxu1  ;;  %8555 = vmatpush3.msra.mxu1 %v10908_v62  ;;  %8565 = vmatprep.subr.mxu0 %v13203_v56  ;;  %v8054_v40 = vadd.f32 %v11122_v13, %v11114_v55 }
 0x1d2   : > { %v8104_v20 = vadd.f32 %v8103_v24, %v8102_v34  ;;  %8556 = vmatprep.subr.mxu1 %v13203_v56  ;;  %8581 = vmatprep.mubr.msk.f32.mxu0 %vm9035_vm0, %v13203_v56 }
 0x1d3   : > { %8557 = vmatpush3.msra.mxu1 %v10916_v35 }
 0x1d4   : > { %v11133_v19 = vadd.f32 %v8104_v20, %v2341_v25  ;;  %v8055_v59 = vpop.f32.mrf.mxu0  ;;  %8558 = vmatprep.subr.mxu1 %v13203_v56 }
 0x1d5   : > { %v8105_v26 = vpop.f32.mrf.mxu1  ;;  %8559 = vmatpush3.msra.mxu1 %v10934_v18 }
 0x1d6   : > { %13207 = vst [vmem:[#allocation14_spill] sm:$0xff] %v11133_v19  ;;  %v8056_v42 = vpop.f32.mrf.mxu0  ;;  %8560 = vmatprep.subr.mxu1 %v13203_v56 }
 0x1d7   : > { %v8106_v62 = vpop.f32.mrf.mxu1  ;;  %8561 = vmatpush3.msra.mxu1 %v10942_v53  ;;  %v8057_v20 = vadd.f32 %v8056_v42, %v8055_v59 }
 0x1d8   : > { %8563 = vmatmul.mubr.f32.vlgmr.msra.gmra.mxu1 %v10899_v57  ;;  %8584 = vmatprep.subr.mxu1 %v13203_v56  ;;  %v8051_v57 = vadd.f32 %v11103_v10, %v11096_v39  ;;  %v8107_v42 = vadd.f32 %v8106_v62, %v8105_v26  ;;  %v2359_v10 = vadd.f32 %v8054_v40, %v11022_v23 }
 0x1d9   : > { %8600 = vmatprep.mubr.msk.f32.mxu1 %vm9035_vm0, %v13203_v56  ;;  %v2368_v59 = vadd.f32 %v8057_v20, %v11035_v48 }
 0x1da   : > { %v8058_v35 = vpop.f32.mrf.mxu0  ;;  %v2350_v39 = vadd.f32 %v8051_v57, %v11003_v1 }
 0x1db   : > { %v8108_v60 = vpop.f32.mrf.mxu1 }
 0x1dc   : > { %v8059_v33 = vpop.f32.mrf.mxu0  ;;  %v2525_v62 = vadd.f32 %v8107_v42, %v2350_v39 }
 0x1dd   : > { %v8109_v50 = vpop.f32.mrf.mxu1  ;;  %v8060_v34 = vadd.f32 %v8059_v33, %v8058_v35 }
 0x1de   : > { %v8110_v35 = vadd.f32 %v8109_v50, %v8108_v60 }
 0x1df   : > { %v2377_v41 = vadd.f32 %v8060_v34, %v11053_v15 }
 0x1e0   : > { %v8061_v37 = vpop.f32.mrf.mxu0  ;;  %v2536_v60 = vadd.f32 %v8110_v35, %v2359_v10 }
 0x1e1   : > { %v8111_v14 = vpop.f32.mrf.mxu1 }
 0x1e2   : > { %v8062_v18 = vpop.f32.mrf.mxu0 }
 0x1e3   : > { %v8112_v5 = vpop.f32.mrf.mxu1 }
 0x1e6   : > { %v8064_v52 = vpop.f32.mrf.mxu0 }
 0x1e7   : > { %v8114_v11 = vpop.f32.mrf.mxu1 }
 0x1e8   : > { %v8065_v21 = vpop.f32.mrf.mxu0 }
 0x1e9   : > { %v8115_v4 = vpop.f32.mrf.mxu1 }
 0x1ea   : > { %v8116_v56 = vadd.f32 %v8115_v4, %v8114_v11 }
 0x1ec   : > { %v11143_v53 = vpop.f32.mrf.mxu0  ;;  %v2558_v55 = vadd.f32 %v8116_v56, %v2377_v41 }
 0x1ed   : > { %v8117_v28 = vpop.f32.mrf.mxu1 }
 0x1ee   : > { %v11145_v30 = vpop.f32.mrf.mxu0 }
 0x1ef   : > { %v8118_v61 = vpop.f32.mrf.mxu1 }
 0x1f0   : > { %v11147_v17 = vpop.f32.mrf.mxu0  ;;  %v8119_v0 = vadd.f32 %v8118_v61, %v8117_v28 }
 0x1f1   : > { %v8120_v9 = vpop.f32.mrf.mxu1 }
 0x1f2   : > { %v11149_v58 = vpop.f32.mrf.mxu0 }
 0x1f3   : > { %v8121_v8 = vpop.f32.mrf.mxu1 }
 0x1f4   : > { %v8161_v29 = vpop.f32.mrf.mxu0  ;;  %v8122_v1 = vadd.f32 %v8121_v8, %v8120_v9 }
 0x1f5   : > { %v11151_v16 = vpop.f32.mrf.mxu1 }
 0x1f6   : > { %13208 = vst [vmem:[#allocation29_spill] sm:$0xff] %v11151_v16  ;;  %v8162_v63 = vpop.f32.mrf.mxu0  ;;  %v8113_v16 = vadd.f32 %v8112_v5, %v8111_v14 }
 0x1f7   : > { %v11153_v46 = vpop.f32.mrf.mxu1  ;;  %v8163_v4 = vadd.f32 %v8162_v63, %v8161_v29  ;;  %v8157_v29 = vadd.f32 %v11145_v30, %v11143_v53  ;;  %v13215_v30 = vld [vmem:[#allocation28_spill] sm:$0xff] }
 0x1f8   : > { %13209 = vst [vmem:[#allocation16_spill] sm:$0xff] %v11153_v46  ;;  %v8164_v31 = vpop.f32.mrf.mxu0  ;;  %v8063_v46 = vadd.f32 %v8062_v18, %v8061_v37  ;;  %v2547_v14 = vadd.f32 %v8113_v16, %v2368_v59 }
 0x1f9   : > { %v11155_v27 = vpop.f32.mrf.mxu1  ;;  %v2762_v63 = vadd.f32 %v8163_v4, %v2525_v62 }
 0x1fa   : > { %v8165_v38 = vpop.f32.mrf.mxu0  ;;  %v2386_v37 = vadd.f32 %v8063_v46, %v11071_v47  ;;  %v8160_v47 = vadd.f32 %v11149_v58, %v11147_v17  ;;  %v13212_v17 = vld [vmem:[#allocation14_spill] sm:$0xff] }
 0x1fb   : > { %v11157_v7 = vpop.f32.mrf.mxu1  ;;  %v8166_v18 = vadd.f32 %v8165_v38, %v8164_v31 }
 0x1fc   : > { %13210 = vst [vmem:[#allocation91_spill] sm:$0xff] %v11157_v7  ;;  %v8167_v2 = vpop.f32.mrf.mxu0  ;;  %v2194_v7 = vadd.f32 %v8010_v43, %v7954_v44  ;;  %v8066_v44 = vadd.f32 %v8065_v21, %v8064_v52  ;;  %v2569_v50 = vadd.f32 %v8119_v0, %v2386_v37  ;;  %v2755_v58 = vadd.f32 %v8160_v47, %v13212_v17  ;;  %v405_v17 = vld [vmem:[%s12506_s6] sm:$0xff] }
 0x1fd   : > { %v8217_v54 = vpop.f32.mrf.mxu1  ;;  %v2769_v52 = vadd.f32 %v8166_v18, %v2536_v60 }
 0x1fe   : > { %v8168_v45 = vpop.f32.mrf.mxu0  ;;  %v2395_v61 = vadd.f32 %v8066_v44, %v2194_v7 }
 0x1ff   : > { %v8218_v51 = vpop.f32.mrf.mxu1  ;;  %v8169_v13 = vadd.f32 %v8168_v45, %v8167_v2 }
 0x200   : > { %v8170_v12 = vpop.f32.mrf.mxu0  ;;  %v8219_v21 = vadd.f32 %v8218_v51, %v8217_v54  ;;  %v2580_v38 = vadd.f32 %v8122_v1, %v2395_v61  ;;  %v13213_v54 = vld [vmem:[#allocation29_spill] sm:$0xff]  ;;  %v13214_v51 = vld [vmem:[#allocation16_spill] sm:$0xff] }
 0x201   : > { %v8220_v25 = vpop.f32.mrf.mxu1  ;;  %v2776_v40 = vadd.f32 %v8169_v13, %v2547_v14 }
 0x202   : > { %v8171_v3 = vpop.f32.mrf.mxu0 }
 0x203   : > { %v8221_v49 = vpop.f32.mrf.mxu1  ;;  %v8172_v36 = vadd.f32 %v8171_v3, %v8170_v12  ;;  %v13211_v9 = vld [vmem:[#allocation91_spill] sm:$0xff]  ;;  %v8213_v12 = vadd.f32 %v13214_v51, %v13213_v54  ;;  %v13219_v54 = vld [vmem:[#allocation86_spill] sm:$0xff] }
 0x204   : > { %v8173_v24 = vpop.f32.mrf.mxu0  ;;  %v8222_v56 = vadd.f32 %v8221_v49, %v8220_v25  ;;  %v8216_v8 = vadd.f32 %v13211_v9, %v11155_v27  ;;  %v2915_v25 = vadd.f32 %v8219_v21, %v2762_v63 }
 0x205   : > { %v8223_v32 = vpop.f32.mrf.mxu1  ;;  %v2783_v5 = vadd.f32 %v8172_v36, %v2558_v55 }
 0x206   : > { %v8174_v22 = vpop.f32.mrf.mxu0  ;;  %v2922_v7 = vadd.f32 %v8222_v56, %v2769_v52  ;;  %v2908_v20 = vadd.f32 %v8216_v8, %v2755_v58  ;;  %v2955_v35 = vmul.f32 0.0625, %v2915_v25  ;;  %v13217_v8 = vld [vmem:[#allocation13_spill] sm:$0xff]  ;;  %v4048_v58 = vsel %vm4046_vm2, %v405_v17, 0 }
 0x207   : > { %v8224_v19 = vpop.f32.mrf.mxu1  ;;  %v8175_v11 = vadd.f32 %v8174_v22, %v8173_v24  ;;  %v2748_v24 = vadd.f32 %v8157_v29, %v13215_v30  ;;  %v11309_v51 = vand.u32 4294901760, %v4048_v58 }
 0x208   : > { %v8176_v6 = vpop.f32.mrf.mxu0  ;;  %v8225_v48 = vadd.f32 %v8224_v19, %v8223_v32  ;;  %v2956_v27 = vmul.f32 0.0625, %v2922_v7  ;;  %v2954_v39 = vmul.f32 0.0625, %v2908_v20  ;;  %v11198_v14 = vand.u32 4294901760, %v2955_v35 }
 0x209   : > { %v8226_v33 = vpop.f32.mrf.mxu1  ;;  %v2790_v22 = vadd.f32 %v8175_v11, %v2569_v50  ;;  %v2901_v42 = vadd.f32 %v8213_v12, %v2748_v24  ;;  %v11322_v12 = vsub.f32 %v4048_v58, %v11309_v51 }
 0x20a   : > { %v8177_v28 = vpop.f32.mrf.mxu0  ;;  %v2929_v32 = vadd.f32 %v8225_v48, %v2776_v40  ;;  %v11191_v10 = vand.u32 4294901760, %v2956_v27  ;;  %v11209_v11 = vand.u32 4294901760, %v2954_v39  ;;  %v11221_v50 = vsub.f32 %v2955_v35, %v11198_v14  ;;  %v11382_v35 = vpop.permute.xlu0 %2963 }
 0x20b   : > { %v8227_v15 = vpop.f32.mrf.mxu1  ;;  %v8178_v19 = vadd.f32 %v8177_v28, %v8176_v6  ;;  %v2953_v37 = vmul.f32 0.0625, %v2901_v42  ;;  %v4143_v25 = vand.u32 4294901760, %v11322_v12 }
 0x20c   : > { %v8228_v26 = vadd.f32 %v8227_v15, %v8226_v33  ;;  %v2957_v49 = vmul.f32 0.0625, %v2929_v32  ;;  %v11212_v48 = vsub.f32 %v2956_v27, %v11191_v10  ;;  %v11233_v1 = vsub.f32 %v2954_v39, %v11209_v11 }
 0x20d   : > { %v8229_v57 = vpop.f32.mrf.mxu1  ;;  %v2797_v43 = vadd.f32 %v8178_v19, %v2580_v38  ;;  %v11217_v60 = vand.u32 4294901760, %v2953_v37  ;;  %v3645_v21 = vand.u32 4294901760, %v11221_v50 }
 0x20e   : > { %v2936_v23 = vadd.f32 %v8228_v26, %v2783_v5  ;;  %v11186_v0 = vand.u32 4294901760, %v2957_v49  ;;  %v13216_v5 = vmov 0.0   ;;  %v3652_v32 = vand.u32 4294901760, %v11233_v1 }
 0x20f   : > { %v8230_v16 = vpop.f32.mrf.mxu1  ;;  %v11242_v61 = vsub.f32 %v2953_v37, %v11217_v60 }
 0x210   : > { %v8231_v46 = vadd.f32 %v8230_v16, %v8229_v57  ;;  %v2958_v2 = vmul.f32 0.0625, %v2936_v23  ;;  %v11201_v44 = vsub.f32 %v2957_v49, %v11186_v0  ;;  %v3638_v23 = vand.u32 4294901760, %v11212_v48 }
 0x211   : > { %v8232_v31 = vpop.f32.mrf.mxu1  ;;  %v3659_v29 = vand.u32 4294901760, %v11242_v61  ;;  %v3653_v9 = vsub.f32 %v11233_v1, %v3652_v32  ;;  %v4144_v49 = vsub.f32 %v11322_v12, %v4143_v25 }
 0x212   : > { %v2943_v45 = vadd.f32 %v8231_v46, %v2790_v22  ;;  %v11182_v41 = vand.u32 4294901760, %v2958_v2  ;;  %v3631_v57 = vand.u32 4294901760, %v11201_v44  ;;  %v3639_v22 = vsub.f32 %v11212_v48, %v3638_v23 }
 0x213   : > { %v8233_v3 = vpop.f32.mrf.mxu1  ;;  %v3646_v46 = vsub.f32 %v11221_v50, %v3645_v21  ;;  %v3660_v38 = vsub.f32 %v11242_v61, %v3659_v29  ;;  %v3654_v7 = vand.u32 4294901760, %v3653_v9 }
 0x214   : > { %v2959_v34 = vmul.f32 0.0625, %v2943_v45  ;;  %v8234_v53 = vadd.f32 %v8233_v3, %v8232_v31  ;;  %v11194_v55 = vsub.f32 %v2958_v2, %v11182_v41  ;;  %v3632_v52 = vsub.f32 %v11201_v44, %v3631_v57  ;;  %v13218_v45 = vld [vmem:[#allocation83_spill] sm:$0xff]  ;;  %v13220_v3 = vld [vmem:[#allocation8_spill] sm:$0xff] }
 0x215   : > { %v3640_v63 = vand.u32 4294901760, %v3639_v22  ;;  %v3647_v31 = vand.u32 4294901760, %v3646_v46  ;;  %v3661_v2 = vand.u32 4294901760, %v3660_v38 }
 0x216   : > { %v11184_v36 = vand.u32 4294901760, %v2959_v34  ;;  %v2950_v59 = vadd.f32 %v8234_v53, %v2797_v43  ;;  %v3624_v62 = vand.u32 4294901760, %v11194_v55  ;;  %v3633_v19 = vand.u32 4294901760, %v3632_v52 }
 0x217   : > { %v4145_v43 = vand.u32 4294901760, %v4144_v49 }
 0x218   : > { %v11189_v6 = vsub.f32 %v2959_v34, %v11184_v36  ;;  %v2960_v33 = vmul.f32 0.0625, %v2950_v59  ;;  %v3625_v56 = vsub.f32 %v11194_v55, %v3624_v62  ;;  %v407_v59 = vld [vmem:[%s12506_s6 + $0x10] sm:$0xff] }
 0x21a   : > { %v11196_v13 = vand.u32 4294901760, %v2960_v33  ;;  %v3617_v15 = vand.u32 4294901760, %v11189_v6  ;;  %v3626_v16 = vand.u32 4294901760, %v3625_v56 }
 0x21c   : > { %v11204_v18 = vsub.f32 %v2960_v33, %v11196_v13  ;;  %8566 = vmatpush3.msra.mxu0 %v11196_v13  ;;  %v3618_v28 = vsub.f32 %v11189_v6, %v3617_v15  ;;  %v408_v33 = vld [vmem:[%s12506_s6 + $0x18] sm:$0xff] }
 0x21d   : > { %8567 = vmatprep.subr.mxu0 %v13216_v5 }
 0x21e   : > { %8568 = vmatpush3.msra.mxu0 %v11184_v36  ;;  %v3610_v26 = vand.u32 4294901760, %v11204_v18  ;;  %v3619_v47 = vand.u32 4294901760, %v3618_v28 }
 0x21f   : > { %8569 = vmatprep.subr.mxu0 %v13216_v5 }
 0x220   : > { %8570 = vmatpush3.msra.mxu0 %v11182_v41  ;;  %v3611_v4 = vsub.f32 %v11204_v18, %v3610_v26 }
 0x221   : > { %8571 = vmatprep.subr.mxu0 %v13216_v5 }
 0x222   : > { %8572 = vmatpush3.msra.mxu0 %v11186_v0  ;;  %v3612_v40 = vand.u32 4294901760, %v3611_v4 }
 0x223   : > { %8573 = vmatprep.subr.mxu0 %v13216_v5 }
 0x224   : > { %8574 = vmatpush3.msra.mxu0 %v11191_v10  ;;  %8585 = vmatpush3.msra.mxu1 %v3612_v40 }
 0x225   : > { %8575 = vmatprep.subr.mxu0 %v13216_v5  ;;  %8586 = vmatprep.subr.mxu1 %v13216_v5 }
 0x226   : > { %8576 = vmatpush3.msra.mxu0 %v11198_v14  ;;  %8587 = vmatpush3.msra.mxu1 %v3619_v47 }
 0x227   : > { %8577 = vmatprep.subr.mxu0 %v13216_v5  ;;  %8588 = vmatprep.subr.mxu1 %v13216_v5 }
 0x228   : > { %8578 = vmatpush3.msra.mxu0 %v11209_v11  ;;  %8589 = vmatpush3.msra.mxu1 %v3626_v16 }
 0x229   : > { %8579 = vmatprep.subr.mxu0 %v13216_v5  ;;  %8590 = vmatprep.subr.mxu1 %v13216_v5 }
 0x22a   : > { %8580 = vmatpush3.msra.mxu0 %v11217_v60  ;;  %8591 = vmatpush3.msra.mxu1 %v3633_v19 }
 0x22b   : > { %8582 = vmatmul.mubr.f32.vlgmr.msra.gmra.mxu0 %v13217_v8  ;;  %8592 = vmatprep.subr.mxu1 %v13216_v5 }
 0x22c   : > { %8603 = vmatprep.subr.mxu0 %v13216_v5  ;;  %8593 = vmatpush3.msra.mxu1 %v3640_v63 }
 0x22d   : > { %8604 = vmatpush3.msra.mxu0 %v11204_v18  ;;  %8594 = vmatprep.subr.mxu1 %v13216_v5  ;;  %v410_v18 = vld [vmem:[%s12506_s6 + $0x28] sm:$0xff] }
 0x22e   : > { %8605 = vmatprep.subr.mxu0 %v13216_v5  ;;  %8595 = vmatpush3.msra.mxu1 %v3647_v31  ;;  %v4063_v28 = vsel %vm4046_vm2, %v410_v18, 0 }
 0x22f   : > { %8606 = vmatpush3.msra.mxu0 %v11189_v6  ;;  %8596 = vmatprep.subr.mxu1 %v13216_v5  ;;  %v4054_v6 = vsel %vm4046_vm2, %v407_v59, 0  ;;  %v11425_v47 = vand.u32 4294901760, %v4063_v28 }
 0x230   : > { %8607 = vmatprep.subr.mxu0 %v13216_v5  ;;  %8597 = vmatpush3.msra.mxu1 %v3654_v7 }
 0x231   : > { %8608 = vmatpush3.msra.mxu0 %v11194_v55  ;;  %8598 = vmatprep.subr.mxu1 %v13216_v5  ;;  %v409_v55 = vld [vmem:[%s12506_s6 + $0x20] sm:$0xff]  ;;  %v11438_v9 = vsub.f32 %v4063_v28, %v11425_v47 }
 0x232   : > { %8609 = vmatprep.subr.mxu0 %v13216_v5  ;;  %8599 = vmatpush3.msra.mxu1 %v3661_v2 }
 0x233   : > { %8610 = vmatpush3.msra.mxu0 %v11201_v44  ;;  %8601 = vmatmul.mubr.f32.vlgmr.msra.gmra.mxu1 %v13218_v45  ;;  %v4060_v44 = vsel %vm4046_vm2, %v409_v55, 0 }
 0x234   : > { %8611 = vmatprep.subr.mxu0 %v13216_v5  ;;  %8622 = vmatprep.subr.mxu1 %v13216_v5  ;;  %v11413_v4 = vand.u32 4294901760, %v4060_v44 }
 0x235   : > { %8612 = vmatpush3.msra.mxu0 %v11212_v48  ;;  %8623 = vmatpush3.msra.mxu1 %v11196_v13 }
 0x236   : > { %8613 = vmatprep.subr.mxu0 %v13216_v5  ;;  %8624 = vmatprep.subr.mxu1 %v13216_v5 }
 0x237   : > { %8614 = vmatpush3.msra.mxu0 %v11221_v50  ;;  %8625 = vmatpush3.msra.mxu1 %v11184_v36 }
 0x238   : > { %8615 = vmatprep.subr.mxu0 %v13216_v5  ;;  %8626 = vmatprep.subr.mxu1 %v13216_v5 }
 0x239   : > { %8616 = vmatpush3.msra.mxu0 %v11233_v1  ;;  %8627 = vmatpush3.msra.mxu1 %v11182_v41  ;;  %v412_v1 = vld [vmem:[%s12506_s6 + $0x38] sm:$0xff] }
 0x23a   : > { %8617 = vmatprep.subr.mxu0 %v13216_v5  ;;  %8628 = vmatprep.subr.mxu1 %v13216_v5  ;;  %v4069_v22 = vsel %vm4046_vm2, %v412_v1, 0  ;;  %v416_v1 = vld [vmem:[%s12507_s7 + $0x18] sm:$0xff] }
 0x23b   : > { %8618 = vmatpush3.msra.mxu0 %v11242_v61  ;;  %8619 = vmatprep.mubr.msk.f32.mxu0 %vm9035_vm0, %v13216_v5  ;;  %v11440_v8 = vand.u32 4294901760, %v4069_v22 }
 0x23c   : > { %8629 = vmatpush3.msra.mxu1 %v11186_v0  ;;  %8620 = vmatmul.mubr.f32.vlgmr.msra.gmra.mxu0 %v13219_v54 }
 0x23d   : > { %8630 = vmatprep.subr.mxu1 %v13216_v5  ;;  %8641 = vmatprep.subr.mxu0 %v13216_v5  ;;  %v11455_v49 = vsub.f32 %v4069_v22, %v11440_v8 }
 0x23e   : > { %8631 = vmatpush3.msra.mxu1 %v11191_v10  ;;  %8642 = vmatpush3.msra.mxu0 %v3610_v26  ;;  %v411_v26 = vld [vmem:[%s12506_s6 + $0x30] sm:$0xff] }
 0x23f   : > { %8632 = vmatprep.subr.mxu1 %v13216_v5  ;;  %8643 = vmatprep.subr.mxu0 %v13216_v5 }
 0x240   : > { %8633 = vmatpush3.msra.mxu1 %v11198_v14  ;;  %8644 = vmatpush3.msra.mxu0 %v3617_v15 }
 0x241   : > { %8634 = vmatprep.subr.mxu1 %v13216_v5  ;;  %8645 = vmatprep.subr.mxu0 %v13216_v5 }
 0x242   : > { %8635 = vmatpush3.msra.mxu1 %v11209_v11  ;;  %8646 = vmatpush3.msra.mxu0 %v3624_v62 }
 0x243   : > { %8636 = vmatprep.subr.mxu1 %v13216_v5  ;;  %8647 = vmatprep.subr.mxu0 %v13216_v5 }
 0x244   : > { %8637 = vmatpush3.msra.mxu1 %v11217_v60  ;;  %8638 = vmatprep.mubr.msk.f32.mxu1 %vm9035_vm0, %v13216_v5 }
 0x245   : > { %8648 = vmatpush3.msra.mxu0 %v3631_v57  ;;  %8639 = vmatmul.mubr.f32.vlgmr.msra.gmra.mxu1 %v13220_v3  ;;  %v4066_v57 = vsel %vm4046_vm2, %v411_v26, 0  ;;  %v4193_v3 = vand.u32 4294901760, %v11438_v9 }
 0x246   : > { %8649 = vmatprep.subr.mxu0 %v13216_v5  ;;  %8660 = vmatprep.subr.mxu1 %v13216_v5  ;;  %v11430_v16 = vand.u32 4294901760, %v4066_v57 }
 0x247   : > { %8650 = vmatpush3.msra.mxu0 %v3638_v23  ;;  %8661 = vmatpush3.msra.mxu1 %v11196_v13  ;;  %v11395_v13 = vand.u32 4294901760, %v4054_v6 }
 0x248   : > { %8651 = vmatprep.subr.mxu0 %v13216_v5  ;;  %8662 = vmatprep.subr.mxu1 %v13216_v5  ;;  %v11447_v2 = vsub.f32 %v4066_v57, %v11430_v16 }
 0x249   : > { %8652 = vmatpush3.msra.mxu0 %v3645_v21  ;;  %8663 = vmatpush3.msra.mxu1 %v11184_v36  ;;  %v406_v36 = vld [vmem:[%s12506_s6 + $0x8] sm:$0xff]  ;;  %v11409_v62 = vsub.f32 %v4054_v6, %v11395_v13  ;;  %v11428_v21 = vsub.f32 %v4060_v44, %v11413_v4 }
 0x24a   : > { %8653 = vmatprep.subr.mxu0 %v13216_v5  ;;  %8664 = vmatprep.subr.mxu1 %v13216_v5 }
 0x24b   : > { %8654 = vmatpush3.msra.mxu0 %v3652_v32  ;;  %8665 = vmatpush3.msra.mxu1 %v11182_v41  ;;  %v4163_v23 = vand.u32 4294901760, %v11409_v62  ;;  %v4183_v7 = vand.u32 4294901760, %v11428_v21 }
 0x24c   : > { %8655 = vmatprep.subr.mxu0 %v13216_v5  ;;  %8666 = vmatprep.subr.mxu1 %v13216_v5 }
 0x24d   : > { %8656 = vmatpush3.msra.mxu0 %v3659_v29  ;;  %8657 = vmatprep.mubr.msk.f32.mxu0 %vm9035_vm0, %v13216_v5  ;;  %v4164_v38 = vsub.f32 %v11409_v62, %v4163_v23 }
 0x24e   : > { %8667 = vmatpush3.msra.mxu1 %v11186_v0  ;;  %8658 = vmatmul.mubr.f32.vlgmr.msra.gmra.mxu0 %v13218_v45  ;;  %v4051_v0 = vsel %vm4046_vm2, %v406_v36, 0 }
 0x24f   : > { %8668 = vmatprep.subr.mxu1 %v13216_v5  ;;  %8676 = vmatprep.mubr.msk.f32.mxu1 %vm9035_vm0, %v13216_v5 }
 0x250   : > { %8669 = vmatpush3.msra.mxu1 %v11191_v10  ;;  %8681 = vmatprep.mubr.f32.mxu0 %v4145_v43  ;;  %v11390_v10 = vand.u32 4294901760, %v4051_v0  ;;  %v4165_v43 = vand.u32 4294901760, %v4164_v38  ;;  %v420_v38 = vld [vmem:[%s12507_s7 + $0x38] sm:$0xff] }
 0x251   : > { %8670 = vmatprep.subr.mxu1 %v13216_v5 }
 0x252   : > { %8671 = vmatpush3.msra.mxu1 %v11198_v14  ;;  %v4057_v14 = vsel %vm4046_vm2, %v408_v33, 0 }
 0x253   : > { %8672 = vmatprep.subr.mxu1 %v13216_v5 }
 0x254   : > { %8673 = vmatpush3.msra.mxu1 %v11209_v11  ;;  %v11403_v11 = vsub.f32 %v4051_v0, %v11390_v10 }
 0x255   : > { %8674 = vmatprep.subr.mxu1 %v13216_v5 }
 0x256   : > { %8675 = vmatpush3.msra.mxu1 %v11217_v60  ;;  %v11411_v60 = vand.u32 4294901760, %v4057_v14  ;;  %v4153_v56 = vand.u32 4294901760, %v11403_v11 }
 0x257   : > { %8677 = vmatmul.mubr.f32.vlgmr.msra.gmra.mxu1 %v13218_v45 }
 0x258   : > { %8695 = vmatprep.mubr.f32.mxu1 %v11309_v51  ;;  %v11423_v61 = vsub.f32 %v4057_v14, %v11411_v60  ;;  %v4154_v46 = vsub.f32 %v11403_v11, %v4153_v56 }
 0x25a   : > { %v4173_v63 = vand.u32 4294901760, %v11423_v61  ;;  %v4155_v17 = vand.u32 4294901760, %v4154_v46  ;;  %v419_v46 = vld [vmem:[%s12507_s7 + $0x30] sm:$0xff] }
 0x25c   : > { %v4174_v54 = vsub.f32 %v11423_v61, %v4173_v63 }
 0x26d   : > { %v3049_v34 = vpop.f32.mrf.mxu0 }
 0x26e   : > { %v3050_v39 = vadd.f32 %v3049_v34, %v11382_v35  ;;  %v4184_v34 = vsub.f32 %v11428_v21, %v4183_v7 }
 0x26f   : > { %v8469_v53 = vpop.f32.mrf.mxu0 }
 0x270   : > { %v4203_v53 = vand.u32 4294901760, %v11447_v2  ;;  %v4185_v36 = vand.u32 4294901760, %v4184_v34 }
 0x272   : > { %v4204_v59 = vsub.f32 %v11447_v2, %v4203_v53 }
 0x275   : > { %v3160_v30 = vpop.f32.mrf.mxu1 }
 0x276   : > { %v3161_v15 = vadd.f32 %v3160_v30, %v3050_v39  ;;  %v4205_v39 = vand.u32 4294901760, %v4204_v59 }
 0x277   : > { %v8488_v24 = vpop.f32.mrf.mxu1 }
 0x27e   : > { %v3248_v20 = vpop.f32.mrf.mxu0 }
 0x27f   : > { %v3249_v50 = vadd.f32 %v3248_v20, %v3161_v15  ;;  %v4175_v20 = vand.u32 4294901760, %v4174_v54 }
 0x280   : > { %v8507_v27 = vpop.f32.mrf.mxu0 }
 0x281   : > { %v4194_v27 = vsub.f32 %v11438_v9, %v4193_v3 }
 0x283   : > { %v4195_v6 = vand.u32 4294901760, %v4194_v27 }
 0x287   : > { %v3329_v41 = vpop.f32.mrf.mxu1 }
 0x288   : > { %v3330_v40 = vadd.f32 %v3329_v41, %v3249_v50  ;;  %v4213_v41 = vand.u32 4294901760, %v11455_v49 }
 0x289   : > { %v8526_v42 = vpop.f32.mrf.mxu1 }
 0x28a   : > { %v4214_v33 = vsub.f32 %v11455_v49, %v4213_v41 }
 0x28c   : > { %v4215_v55 = vand.u32 4294901760, %v4214_v33 }
 0x28f   : > { %v3424_v37 = vpop.f32.mrf.mxu0 }
 0x290   : > { %v3425_v52 = vadd.f32 %v3424_v37, %v3330_v40  ;;  %v413_v37 = vld [vmem:[%s12507_s7] sm:$0xff] }
 0x291   : > { %v8545_v48 = vpop.f32.mrf.mxu0  ;;  %v4871_v14 = vsel %vm4046_vm2, %v413_v37, 0 }
 0x292   : > { %v11487_v44 = vand.u32 4294901760, %v4871_v14 }
 0x298   : > { %v3503_v32 = vpop.f32.mrf.mxu1 }
 0x299   : > { %v3504_v19 = vadd.f32 %v3503_v32, %v3425_v52  ;;  %v4880_v52 = vsel %vm4046_vm2, %v416_v1, 0 }
 0x29a   : > { %v8564_v29 = vpop.f32.mrf.mxu1 }
 0x29b   : > { %v3507_v31 = vmax.f32 %v3504_v19, 0.0  ;;  %v11553_v29 = vand.u32 4294901760, %v4880_v52 }
 0x29d   : > { %v4073_v45 = vsel %vm4071_vm3, %v3507_v31, 0  ;;  %v4889_v31 = vsel %vm4046_vm2, %v419_v46, 0 }
 0x29e   : > { %v4106_v58 = vand.u32 4294901760, %v4073_v45 }
 0x2a0   : > { %v4253_v30 = vsub.f32 %v4073_v45, %v4106_v58  ;;  %8679 = vmatprep.subr.mxu0 %v4106_v58 }
 0x2a1   : > { %8680 = vmatpush3.msra.mxu0 %v4106_v58 }
 0x2a2   : > { %8682 = vmatmul.mubr.f32.vlgmr.msra.gmra.mxu0 %v4155_v17  ;;  %8707 = vmatprep.subr.mxu0 %v4253_v30  ;;  %v4254_v24 = vand.u32 4294901760, %v4253_v30  ;;  %v11565_v17 = vsub.f32 %v4880_v52, %v11553_v29 }
 0x2a3   : > { %8708 = vmatpush3.msra.mxu0 %v4253_v30  ;;  %8684 = vmatprep.mubr.f32.mxu0 %v4165_v43  ;;  %v4892_v43 = vsel %vm4046_vm2, %v420_v38, 0 }
 0x2a4   : > { %8735 = vmatprep.subr.mxu0 %v4254_v24  ;;  %v4255_v42 = vsub.f32 %v4253_v30, %v4254_v24 }
 0x2a6   : > { %8685 = vmatmul.mubr.f32.gmra.mxu0 %v4175_v20  ;;  %v4256_v0 = vand.u32 4294901760, %v4255_v42  ;;  %v4995_v20 = vand.u32 4294901760, %v11565_v17 }
 0x2a7   : > { %8687 = vmatprep.mubr.f32.mxu0 %v4185_v36 }
 0x2a8   : > { %8693 = vmatprep.subr.mxu1 %v4256_v0 }
 0x2a9   : > { %8694 = vmatpush3.msra.mxu1 %v4256_v0 }
 0x2aa   : > { %8688 = vmatmul.mubr.f32.gmra.mxu0 %v4195_v6  ;;  %8696 = vmatmul.mubr.f32.vlgmr.msra.gmra.mxu1 %v11390_v10 }
 0x2ab   : > { %8721 = vmatprep.subr.mxu1 %v4106_v58  ;;  %8690 = vmatprep.mubr.f32.mxu0 %v4205_v39 }
 0x2ac   : > { %8722 = vmatpush3.msra.mxu1 %v4106_v58  ;;  %8698 = vmatprep.mubr.f32.mxu1 %v11395_v13 }
 0x2ad   : > { %8749 = vmatprep.subr.mxu1 %v4106_v58 }
 0x2ae   : > { %8691 = vmatmul.mubr.f32.gmra.mxu0 %v4215_v55  ;;  %8699 = vmatmul.mubr.f32.gmra.mxu1 %v11411_v60  ;;  %v4996_v55 = vsub.f32 %v11565_v17, %v4995_v20 }
 0x2af   : > { %8701 = vmatprep.mubr.f32.mxu1 %v11413_v4  ;;  %8709 = vmatprep.mubr.f32.mxu0 %v11322_v12  ;;  %v11498_v12 = vsub.f32 %v4871_v14, %v11487_v44 }
 0x2b2   : > { %8702 = vmatmul.mubr.f32.gmra.mxu1 %v11425_v47  ;;  %8710 = vmatmul.mubr.f32.vlgmr.msra.gmra.mxu0 %v11403_v11 }
 0x2b3   : > { %8736 = vmatpush3.msra.mxu0 %v4254_v24  ;;  %8704 = vmatprep.mubr.f32.mxu1 %v11430_v16 }
 0x2b4   : > { %8712 = vmatprep.mubr.f32.mxu0 %v11409_v62 }
 0x2b6   : > { %8705 = vmatmul.mubr.f32.gmra.mxu1 %v11440_v8  ;;  %8713 = vmatmul.mubr.f32.gmra.mxu0 %v11423_v61 }
 0x2b7   : > { %8715 = vmatprep.mubr.f32.mxu0 %v11428_v21  ;;  %8723 = vmatprep.mubr.f32.mxu1 %v4143_v25  ;;  %v4965_v25 = vand.u32 4294901760, %v11498_v12 }
 0x2b9   : > { %v4966_v18 = vsub.f32 %v11498_v12, %v4965_v25 }
 0x2ba   : > { %8716 = vmatmul.mubr.f32.gmra.mxu0 %v11438_v9  ;;  %8724 = vmatmul.mubr.f32.vlgmr.msra.gmra.mxu1 %v4153_v56  ;;  %v417_v56 = vld [vmem:[%s12507_s7 + $0x20] sm:$0xff] }
 0x2bb   : > { %8750 = vmatpush3.msra.mxu1 %v4106_v58  ;;  %8718 = vmatprep.mubr.f32.mxu0 %v11447_v2  ;;  %v4967_v15 = vand.u32 4294901760, %v4966_v18  ;;  %v4883_v21 = vsel %vm4046_vm2, %v417_v56, 0 }
 0x2bc   : > { %8726 = vmatprep.mubr.f32.mxu1 %v4163_v23  ;;  %v11555_v9 = vand.u32 4294901760, %v4883_v21 }
 0x2be   : > { %8719 = vmatmul.mubr.f32.gmra.mxu0 %v11455_v49  ;;  %8727 = vmatmul.mubr.f32.gmra.mxu1 %v4173_v63  ;;  %v11572_v49 = vand.u32 4294901760, %v4889_v31 }
 0x2bf   : > { %8729 = vmatprep.mubr.f32.mxu1 %v4183_v7  ;;  %8737 = vmatprep.mubr.f32.mxu0 %v11309_v51 }
 0x2c0   : > { %v11589_v0 = vsub.f32 %v4889_v31, %v11572_v49 }
 0x2c2   : > { %8730 = vmatmul.mubr.f32.gmra.mxu1 %v4193_v3  ;;  %8738 = vmatmul.mubr.f32.vlgmr.msra.gmra.mxu0 %v11390_v10  ;;  %v11570_v3 = vsub.f32 %v4883_v21, %v11555_v9 }
 0x2c3   : > { %8732 = vmatprep.mubr.f32.mxu1 %v4203_v53  ;;  %8740 = vmatprep.mubr.f32.mxu0 %v11395_v13 }
 0x2c4   : > { %v5005_v42 = vand.u32 4294901760, %v11570_v3 }
 0x2c6   : > { %8733 = vmatmul.mubr.f32.gmra.mxu1 %v4213_v41  ;;  %8741 = vmatmul.mubr.f32.gmra.mxu0 %v11411_v60  ;;  %v11582_v41 = vand.u32 4294901760, %v4892_v43 }
 0x2c7   : > { %8743 = vmatprep.mubr.f32.mxu0 %v11413_v4  ;;  %8751 = vmatprep.mubr.f32.mxu1 %v11309_v51 }
 0x2c8   : > { %v11599_v14 = vsub.f32 %v4892_v43, %v11582_v41 }
 0x2ca   : > { %8744 = vmatmul.mubr.f32.gmra.mxu0 %v11425_v47  ;;  %8752 = vmatmul.mubr.f32.vlgmr.msra.gmra.mxu1 %v11390_v10 }
 0x2cb   : > { %8746 = vmatprep.mubr.f32.mxu0 %v11430_v16  ;;  %8754 = vmatprep.mubr.f32.mxu1 %v11395_v13 }
 0x2ce   : > { %8747 = vmatmul.mubr.f32.gmra.mxu0 %v11440_v8  ;;  %8755 = vmatmul.mubr.f32.gmra.mxu1 %v11411_v60  ;;  %v414_v60 = vld [vmem:[%s12507_s7 + $0x8] sm:$0xff] }
 0x2cf   : > { %8757 = vmatprep.mubr.f32.mxu1 %v11413_v4  ;;  %8765 = vmatprep.mubr.f32.mxu0 %v4967_v15  ;;  %v415_v4 = vld [vmem:[%s12507_s7 + $0x10] sm:$0xff]  ;;  %v4874_v28 = vsel %vm4046_vm2, %v414_v60, 0  ;;  %v5006_v15 = vsub.f32 %v11570_v3, %v5005_v42 }
 0x2d0   : > { %v4877_v57 = vsel %vm4046_vm2, %v415_v4, 0  ;;  %v11531_v40 = vand.u32 4294901760, %v4874_v28 }
 0x2d1   : > { %v11536_v23 = vand.u32 4294901760, %v4877_v57 }
 0x2d2   : > { %8758 = vmatmul.mubr.f32.gmra.mxu1 %v11425_v47  ;;  %v11545_v19 = vsub.f32 %v4874_v28, %v11531_v40 }
 0x2d3   : > { %8760 = vmatprep.mubr.f32.mxu1 %v11430_v16  ;;  %v418_v16 = vld [vmem:[%s12507_s7 + $0x28] sm:$0xff] }
 0x2d4   : > { %v4975_v2 = vand.u32 4294901760, %v11545_v19 }
 0x2d6   : > { %8761 = vmatmul.mubr.f32.gmra.mxu1 %v11440_v8  ;;  %v4886_v8 = vsel %vm4046_vm2, %v418_v16, 0  ;;  %v4976_v30 = vsub.f32 %v11545_v19, %v4975_v2 }
 0x2d7   : > { %8779 = vmatprep.mubr.f32.mxu1 %v11487_v44  ;;  %v11567_v58 = vand.u32 4294901760, %v4886_v8 }
 0x2d8   : > { %v4977_v33 = vand.u32 4294901760, %v4976_v30 }
 0x2d9   : > { %v11580_v27 = vsub.f32 %v4886_v8, %v11567_v58  ;;  %v395_v8 = vld [vmem:[%s12502_s2] sm:$0xff] }
 0x2db   : > { %v5015_v37 = vand.u32 4294901760, %v11580_v27 }
 0x2eb   : > { %v3587_v51 = vpop.f32.mrf.mxu0 }
 0x2ec   : > { %v3588_v61 = vadd.f32 %v3587_v51, %v11382_v35  ;;  %v11551_v35 = vsub.f32 %v4877_v57, %v11536_v23  ;;  %v5025_v51 = vand.u32 4294901760, %v11589_v0 }
 0x2ed   : > { %v8583_v10 = vpop.f32.mrf.mxu0 }
 0x2ee   : > { %v4985_v45 = vand.u32 4294901760, %v11551_v35  ;;  %v5026_v60 = vsub.f32 %v11589_v0, %v5025_v51 }
 0x2f0   : > { %v4986_v59 = vsub.f32 %v11551_v35, %v4985_v45  ;;  %v5027_v1 = vand.u32 4294901760, %v5026_v60 }
 0x2f2   : > { %v4987_v18 = vand.u32 4294901760, %v4986_v59 }
 0x2f3   : > { %v3698_v11 = vpop.f32.mrf.mxu1 }
 0x2f4   : > { %v3699_v22 = vadd.f32 %v3698_v11, %v3588_v61  ;;  %v398_v61 = vld [vmem:[%s12502_s2 + $0x18] sm:$0xff] }
 0x2f5   : > { %v8602_v13 = vpop.f32.mrf.mxu1 }
 0x2f6   : > { %v4997_v13 = vand.u32 4294901760, %v4996_v55 }
 0x2fc   : > { %v3786_v48 = vpop.f32.mrf.mxu0 }
 0x2fd   : > { %v3787_v63 = vadd.f32 %v3786_v48, %v3699_v22  ;;  %v5016_v48 = vsub.f32 %v11580_v27, %v5015_v37  ;;  %v397_v22 = vld [vmem:[%s12502_s2 + $0x10] sm:$0xff] }
 0x2fe   : > { %v8621_v26 = vpop.f32.mrf.mxu0 }
 0x2ff   : > { %v5035_v26 = vand.u32 4294901760, %v11599_v14  ;;  %v5017_v28 = vand.u32 4294901760, %v5016_v48 }
 0x301   : > { %v5036_v57 = vsub.f32 %v11599_v14, %v5035_v26 }
 0x303   : > { %v5037_v56 = vand.u32 4294901760, %v5036_v57 }
 0x305   : > { %v3867_v62 = vpop.f32.mrf.mxu1 }
 0x306   : > { %v3868_v7 = vadd.f32 %v3867_v62, %v3787_v63  ;;  %v5007_v62 = vand.u32 4294901760, %v5006_v15  ;;  %v11654_v63 = vand.u32 4294901760, %v397_v22 }
 0x307   : > { %v8640_v50 = vpop.f32.mrf.mxu1 }
 0x30e   : > { %v3962_v47 = vpop.f32.mrf.mxu0 }
 0x30f   : > { %v3963_v54 = vadd.f32 %v3962_v47, %v3868_v7  ;;  %v11629_v47 = vand.u32 4294901760, %v398_v61 }
 0x310   : > { %v8659_v32 = vpop.f32.mrf.mxu0 }
 0x311   : > { %v11632_v52 = vsub.f32 %v398_v61, %v11629_v47  ;;  %v396_v32 = vld [vmem:[%s12502_s2 + $0x8] sm:$0xff] }
 0x312   : > { %v11659_v31 = vand.u32 4294901760, %v396_v32 }
 0x313   : > { %v5904_v21 = vand.u32 4294901760, %v11632_v52 }
 0x314   : > { %v11674_v38 = vsub.f32 %v396_v32, %v11659_v31 }
 0x315   : > { %v5905_v16 = vsub.f32 %v11632_v52, %v5904_v21 }
 0x316   : > { %v5916_v7 = vand.u32 4294901760, %v11674_v38 }
 0x317   : > { %v4041_v34 = vpop.f32.mrf.mxu1  ;;  %v5906_v46 = vand.u32 4294901760, %v5905_v16 }
 0x318   : > { %v4042_v53 = vadd.f32 %v4041_v34, %v3963_v54 }
 0x319   : > { %v8678_v24 = vpop.f32.mrf.mxu1 }
 0x31a   : > { %v4045_v36 = vmax.f32 %v4042_v53, 0.0 }
 0x31c   : > { %v4895_v6 = vsel %vm4071_vm3, %v4045_v36, 0 }
 0x31d   : > { %v11592_v39 = vand.u32 4294901760, %v4895_v6 }
 0x31f   : > { %v5075_v10 = vsub.f32 %v4895_v6, %v11592_v39  ;;  %8763 = vmatprep.subr.mxu0 %v11592_v39 }
 0x320   : > { %8764 = vmatpush3.msra.mxu0 %v11592_v39 }
 0x321   : > { %8766 = vmatmul.mubr.f32.vlgmr.msra.gmra.mxu0 %v4977_v33  ;;  %8791 = vmatprep.subr.mxu0 %v5075_v10  ;;  %v5076_v11 = vand.u32 4294901760, %v5075_v10 }
 0x322   : > { %8792 = vmatpush3.msra.mxu0 %v5075_v10  ;;  %8768 = vmatprep.mubr.f32.mxu0 %v4987_v18 }
 0x323   : > { %8819 = vmatprep.subr.mxu0 %v5076_v11  ;;  %v5077_v50 = vsub.f32 %v5075_v10, %v5076_v11 }
 0x325   : > { %8769 = vmatmul.mubr.f32.gmra.mxu0 %v4997_v13  ;;  %v5078_v4 = vand.u32 4294901760, %v5077_v50 }
 0x326   : > { %8771 = vmatprep.mubr.f32.mxu0 %v5007_v62 }
 0x327   : > { %8777 = vmatprep.subr.mxu1 %v5078_v4 }
 0x328   : > { %8778 = vmatpush3.msra.mxu1 %v5078_v4 }
 0x329   : > { %8772 = vmatmul.mubr.f32.gmra.mxu0 %v5017_v28  ;;  %8780 = vmatmul.mubr.f32.vlgmr.msra.gmra.mxu1 %v11531_v40 }
 0x32a   : > { %8805 = vmatprep.subr.mxu1 %v11592_v39  ;;  %8774 = vmatprep.mubr.f32.mxu0 %v5027_v1 }
 0x32b   : > { %8806 = vmatpush3.msra.mxu1 %v11592_v39  ;;  %8782 = vmatprep.mubr.f32.mxu1 %v11536_v23 }
 0x32c   : > { %8833 = vmatprep.subr.mxu1 %v11592_v39 }
 0x32d   : > { %8775 = vmatmul.mubr.f32.gmra.mxu0 %v5037_v56  ;;  %8783 = vmatmul.mubr.f32.gmra.mxu1 %v11553_v29 }
 0x32e   : > { %8785 = vmatprep.mubr.f32.mxu1 %v11555_v9  ;;  %8793 = vmatprep.mubr.f32.mxu0 %v11498_v12  ;;  %v11666_v12 = vand.u32 4294901760, %v395_v8 }
 0x331   : > { %8786 = vmatmul.mubr.f32.gmra.mxu1 %v11567_v58  ;;  %8794 = vmatmul.mubr.f32.vlgmr.msra.gmra.mxu0 %v11545_v19  ;;  %v11683_v19 = vsub.f32 %v395_v8, %v11666_v12 }
 0x332   : > { %8820 = vmatpush3.msra.mxu0 %v5076_v11  ;;  %8788 = vmatprep.mubr.f32.mxu1 %v11572_v49 }
 0x333   : > { %8796 = vmatprep.mubr.f32.mxu0 %v11551_v35  ;;  %5746 = vmatprep.subr.mxu0 %v11629_v47 }
 0x335   : > { %8789 = vmatmul.mubr.f32.gmra.mxu1 %v11582_v41  ;;  %8797 = vmatmul.mubr.f32.gmra.mxu0 %v11565_v17  ;;  %v5917_v17 = vsub.f32 %v11674_v38, %v5916_v7 }
 0x336   : > { %8799 = vmatprep.mubr.f32.mxu0 %v11570_v3  ;;  %8807 = vmatprep.mubr.f32.mxu1 %v4965_v25  ;;  %v11671_v25 = vsub.f32 %v397_v22, %v11654_v63 }
 0x337   : > { %v5918_v43 = vand.u32 4294901760, %v5917_v17 }
 0x338   : > { %v5910_v35 = vand.u32 4294901760, %v11671_v25 }
 0x339   : > { %8800 = vmatmul.mubr.f32.gmra.mxu0 %v11580_v27  ;;  %8808 = vmatmul.mubr.f32.vlgmr.msra.gmra.mxu1 %v4975_v2  ;;  %v5922_v2 = vand.u32 4294901760, %v11683_v19 }
 0x33a   : > { %8834 = vmatpush3.msra.mxu1 %v11592_v39  ;;  %8802 = vmatprep.mubr.f32.mxu0 %v11589_v0 }
 0x33b   : > { %8810 = vmatprep.mubr.f32.mxu1 %v4985_v45  ;;  %5907 = vmatprep.subr.mxu1 %v5906_v46  ;;  %v5911_v45 = vsub.f32 %v11671_v25, %v5910_v35  ;;  %v5923_v54 = vsub.f32 %v11683_v19, %v5922_v2 }
 0x33d   : > { %8803 = vmatmul.mubr.f32.gmra.mxu0 %v11599_v14  ;;  %8811 = vmatmul.mubr.f32.gmra.mxu1 %v4995_v20  ;;  %v5912_v3 = vand.u32 4294901760, %v5911_v45  ;;  %v5924_v34 = vand.u32 4294901760, %v5923_v54 }
 0x33e   : > { %8813 = vmatprep.mubr.f32.mxu1 %v5005_v42  ;;  %8821 = vmatprep.mubr.f32.mxu0 %v11487_v44 }
 0x341   : > { %8814 = vmatmul.mubr.f32.gmra.mxu1 %v5015_v37  ;;  %8822 = vmatmul.mubr.f32.vlgmr.msra.gmra.mxu0 %v11531_v40 }
 0x342   : > { %8816 = vmatprep.mubr.f32.mxu1 %v5025_v51  ;;  %8824 = vmatprep.mubr.f32.mxu0 %v11536_v23 }
 0x343   : > { %5748 = vmatpush1.msra.mxu0 %v11654_v63 }
 0x344   : > { %5750 = vmatprep.subr.mxu0 %v11659_v31 }
 0x345   : > { %8817 = vmatmul.mubr.f32.gmra.mxu1 %v5035_v26  ;;  %8825 = vmatmul.mubr.f32.gmra.mxu0 %v11553_v29 }
 0x346   : > { %8827 = vmatprep.mubr.f32.mxu0 %v11555_v9  ;;  %8835 = vmatprep.mubr.f32.mxu1 %v11487_v44 }
 0x347   : > { %5752 = vmatpush1.msra.mxu0 %v11666_v12 }
 0x348   : > { %6045 = vmatprep.subr.mxu0 %v11632_v52 }
 0x349   : > { %8828 = vmatmul.mubr.f32.gmra.mxu0 %v11567_v58  ;;  %8836 = vmatmul.mubr.f32.vlgmr.msra.gmra.mxu1 %v11531_v40 }
 0x34a   : > { %8830 = vmatprep.mubr.f32.mxu0 %v11572_v49  ;;  %8838 = vmatprep.mubr.f32.mxu1 %v11536_v23 }
 0x34b   : > { %5913 = vmatpush1.msra.mxu1 %v5912_v3 }
 0x34c   : > { %5919 = vmatprep.subr.mxu1 %v5918_v43 }
 0x34d   : > { %8831 = vmatmul.mubr.f32.gmra.mxu0 %v11582_v41  ;;  %8839 = vmatmul.mubr.f32.gmra.mxu1 %v11553_v29 }
 0x34e   : > { %8841 = vmatprep.mubr.f32.mxu1 %v11555_v9  ;;  %5925 = vmatpush1.msra.mxu1 %v5924_v34 }
 0x34f   : > { %5785 = vmatprep.mubr.f32.mxu0 %v13216_v5  ;;  %6181 = vmatprep.subr.mxu1 %v11629_v47 }
 0x351   : > { %8842 = vmatmul.mubr.f32.gmra.mxu1 %v11567_v58 }
 0x352   : > { %8844 = vmatprep.mubr.f32.mxu1 %v11572_v49 }
 0x355   : > { %8845 = vmatmul.mubr.f32.gmra.mxu1 %v11582_v41 }
 0x356   : > { %5958 = vmatprep.mubr.f32.mxu1 %v13216_v5 }
 0x362   : > { %v8683_v44 = vpop.f32.mrf.mxu0 }
 0x364   : > { %v4147_v40 = vpop.f32.mrf.mxu0 }
 0x366   : > { %v8686_v23 = vpop.f32.mrf.mxu0 }
 0x368   : > { %v4167_v53 = vpop.f32.mrf.mxu0 }
 0x36a   : > { %v8689_v29 = vpop.f32.mrf.mxu0  ;;  %v8697_v30 = vpop.f32.mrf.mxu1 }
 0x36b   : > { %v4300_v26 = vadd.f32 %v8697_v30, %v8683_v44 }
 0x36c   : > { %v4187_v9 = vpop.f32.mrf.mxu0  ;;  %v4293_v24 = vpop.f32.mrf.mxu1 }
 0x36d   : > { %v4294_v50 = vadd.f32 %v4293_v24, %v4147_v40 }
 0x36e   : > { %v8692_v20 = vpop.f32.mrf.mxu0  ;;  %v8700_v27 = vpop.f32.mrf.mxu1 }
 0x36f   : > { %v4312_v1 = vadd.f32 %v8700_v27, %v8686_v23 }
 0x370   : > { %v4207_v36 = vpop.f32.mrf.mxu0  ;;  %v4305_v59 = vpop.f32.mrf.mxu1 }
 0x371   : > { %v4306_v32 = vadd.f32 %v4305_v59, %v4167_v53 }
 0x372   : > { %v8703_v42 = vpop.f32.mrf.mxu1  ;;  %v8711_v58 = vpop.f32.mrf.mxu0 }
 0x373   : > { %v4417_v4 = vadd.f32 %v8711_v58, %v4300_v26  ;;  %v4324_v17 = vadd.f32 %v8703_v42, %v8689_v29 }
 0x374   : > { %v4317_v0 = vpop.f32.mrf.mxu1  ;;  %v4409_v49 = vpop.f32.mrf.mxu0 }
 0x375   : > { %v4410_v56 = vadd.f32 %v4409_v49, %v4294_v50  ;;  %v4318_v40 = vadd.f32 %v4317_v0, %v4187_v9 }
 0x376   : > { %v8706_v6 = vpop.f32.mrf.mxu1  ;;  %v8714_v41 = vpop.f32.mrf.mxu0 }
 0x377   : > { %v4431_v46 = vadd.f32 %v8714_v41, %v4312_v1  ;;  %v4336_v50 = vadd.f32 %v8706_v6, %v8692_v20 }
 0x378   : > { %v4329_v33 = vpop.f32.mrf.mxu1  ;;  %v4423_v39 = vpop.f32.mrf.mxu0 }
 0x379   : > { %v4424_v43 = vadd.f32 %v4423_v39, %v4306_v32  ;;  %v4330_v39 = vadd.f32 %v4329_v33, %v4207_v36 }
 0x37a   : > { %v8717_v55 = vpop.f32.mrf.mxu0  ;;  %v8725_v37 = vpop.f32.mrf.mxu1 }
 0x37b   : > { %v4541_v61 = vadd.f32 %v8725_v37, %v4417_v4  ;;  %v4445_v24 = vadd.f32 %v8717_v55, %v4324_v17 }
 0x37c   : > { %v4437_v14 = vpop.f32.mrf.mxu0  ;;  %v4532_v18 = vpop.f32.mrf.mxu1 }
 0x37d   : > { %v4533_v8 = vadd.f32 %v4532_v18, %v4410_v56  ;;  %v4438_v53 = vadd.f32 %v4437_v14, %v4318_v40 }
 0x37e   : > { %v8720_v15 = vpop.f32.mrf.mxu0  ;;  %v8728_v51 = vpop.f32.mrf.mxu1 }
 0x37f   : > { %v4557_v34 = vadd.f32 %v8728_v51, %v4431_v46  ;;  %v4459_v51 = vadd.f32 %v8720_v15, %v4336_v50 }
 0x380   : > { %v4451_v10 = vpop.f32.mrf.mxu0  ;;  %v4548_v11 = vpop.f32.mrf.mxu1 }
 0x381   : > { %v4549_v23 = vadd.f32 %v4548_v11, %v4424_v43  ;;  %v4452_v4 = vadd.f32 %v4451_v10, %v4330_v39 }
 0x382   : > { %v8731_v13 = vpop.f32.mrf.mxu1  ;;  %v8739_v48 = vpop.f32.mrf.mxu0 }
 0x383   : > { %v4669_v45 = vadd.f32 %v8739_v48, %v4541_v61  ;;  %v4573_v59 = vadd.f32 %v8731_v13, %v4445_v24 }
 0x384   : > { %v4564_v62 = vpop.f32.mrf.mxu1  ;;  %v4662_v60 = vpop.f32.mrf.mxu0 }
 0x385   : > { %v4663_v44 = vadd.f32 %v4662_v60, %v4533_v8  ;;  %v4565_v48 = vadd.f32 %v4564_v62, %v4438_v53 }
 0x386   : > { %v8734_v28 = vpop.f32.mrf.mxu1  ;;  %v8742_v57 = vpop.f32.mrf.mxu0 }
 0x387   : > { %v4681_v27 = vadd.f32 %v8742_v57, %v4557_v34  ;;  %v4589_v57 = vadd.f32 %v8734_v28, %v4459_v51 }
 0x388   : > { %v4580_v16 = vpop.f32.mrf.mxu1  ;;  %v4674_v22 = vpop.f32.mrf.mxu0 }
 0x389   : > { %v4675_v18 = vadd.f32 %v4674_v22, %v4549_v23  ;;  %v4581_v13 = vadd.f32 %v4580_v16, %v4452_v4 }
 0x38a   : > { %v8745_v54 = vpop.f32.mrf.mxu0  ;;  %v8753_v3 = vpop.f32.mrf.mxu1 }
 0x38b   : > { %v4783_v30 = vadd.f32 %v8753_v3, %v4669_v45  ;;  %v4693_v0 = vadd.f32 %v8745_v54, %v4573_v59 }
 0x38c   : > { %v4686_v58 = vpop.f32.mrf.mxu0  ;;  %v4776_v26 = vpop.f32.mrf.mxu1 }
 0x38d   : > { %v7541_v49 = vmul.f32 -1.442695, %v4783_v30  ;;  %v4777_v37 = vadd.f32 %v4776_v26, %v4663_v44  ;;  %v4687_v20 = vadd.f32 %v4686_v58, %v4565_v48 }
 0x38e   : > { %v8756_v41 = vpop.f32.mrf.mxu1  ;;  %v8748_v60 = vpop.f32.mrf.mxu0 }
 0x38f   : > { %8892 = vpow2.f32 %v7541_v49  ;;  %v7540_v29 = vmul.f32 -1.442695, %v4777_v37  ;;  %v4795_v42 = vadd.f32 %v8756_v41, %v4681_v27  ;;  %v4705_v22 = vadd.f32 %v8748_v60, %v4589_v57 }
 0x390   : > { %v4788_v9 = vpop.f32.mrf.mxu1  ;;  %v4698_v56 = vpop.f32.mrf.mxu0 }
 0x391   : > { %8894 = vpow2.f32 %v7540_v29  ;;  %v7543_v55 = vmul.f32 -1.442695, %v4795_v42  ;;  %v4789_v11 = vadd.f32 %v4788_v9, %v4675_v18  ;;  %v4699_v62 = vadd.f32 %v4698_v56, %v4581_v13 }
 0x392   : > { %v8759_v1 = vpop.f32.mrf.mxu1 }
 0x393   : > { %8896 = vpow2.f32 %v7543_v55  ;;  %v7542_v6 = vmul.f32 -1.442695, %v4789_v11  ;;  %v4807_v14 = vadd.f32 %v8759_v1, %v4693_v0 }
 0x394   : > { %v4800_v61 = vpop.f32.mrf.mxu1 }
 0x395   : > { %8898 = vpow2.f32 %v7542_v6  ;;  %v7545_v36 = vmul.f32 -1.442695, %v4807_v14  ;;  %v4801_v33 = vadd.f32 %v4800_v61, %v4687_v20 }
 0x396   : > { %v8762_v15 = vpop.f32.mrf.mxu1 }
 0x397   : > { %8900 = vpow2.f32 %v7545_v36  ;;  %v7544_v32 = vmul.f32 -1.442695, %v4801_v33  ;;  %v4819_v46 = vadd.f32 %v8762_v15, %v4705_v22 }
 0x398   : > { %v4812_v8 = vpop.f32.mrf.mxu1 }
 0x399   : > { %8902 = vpow2.f32 %v7544_v32  ;;  %v7547_v10 = vmul.f32 -1.442695, %v4819_v46  ;;  %v4813_v28 = vadd.f32 %v4812_v8, %v4699_v62 }
 0x39b   : > { %v7546_v45 = vmul.f32 -1.442695, %v4813_v28  ;;  %8904 = vpow2.f32 %v7547_v10 }
 0x39c   : > { %v8893_v17 = vpop.eup %8892 }
 0x39d   : > { %v4847_v54 = vadd.f32 1.0, %v8893_v17  ;;  %8906 = vpow2.f32 %v7546_v45 }
 0x39e   : > { %v8895_v16 = vpop.eup %8894 }
 0x39f   : > { %8908 = vrcp.f32 %v4847_v54  ;;  %v4846_v3 = vadd.f32 1.0, %v8895_v16 }
 0x3a0   : > { %v8897_v43 = vpop.eup %8896 }
 0x3a1   : > { %8910 = vrcp.f32 %v4846_v3  ;;  %v4849_v34 = vadd.f32 1.0, %v8897_v43 }
 0x3a2   : > { %v8899_v44 = vpop.eup %8898 }
 0x3a3   : > { %8912 = vrcp.f32 %v4849_v34  ;;  %v4848_v30 = vadd.f32 1.0, %v8899_v44  ;;  %v402_v34 = vld [vmem:[%s12503_s3 + $0x18] sm:$0xff] }
 0x3a4   : > { %v8901_v40 = vpop.eup %8900 }
 0x3a5   : > { %8914 = vrcp.f32 %v4848_v30  ;;  %v4851_v24 = vadd.f32 1.0, %v8901_v40 }
 0x3a6   : > { %v8903_v58 = vpop.eup %8902 }
 0x3a7   : > { %v4850_v26 = vadd.f32 1.0, %v8903_v58  ;;  %8916 = vrcp.f32 %v4851_v24  ;;  %v11816_v24 = vand.u32 4294901760, %v402_v34 }
 0x3a8   : > { %v8905_v23 = vpop.eup %8904 }
 0x3a9   : > { %8918 = vrcp.f32 %v4850_v26  ;;  %v4853_v50 = vadd.f32 1.0, %v8905_v23 }
 0x3aa   : > { %v8907_v27 = vpop.eup %8906 }
 0x3ab   : > { %v4852_v49 = vadd.f32 1.0, %v8907_v27 }
 0x3ac   : > { %v8909_v37 = vpop.eup %8908 }
 0x3ad   : > { %8920 = vrcp.f32 %v4852_v49  ;;  %v5697_v53 = vsel %vm5692_vm4, %v8909_v37, 0  ;;  %v11829_v49 = vsub.f32 %v402_v34, %v11816_v24 }
 0x3ae   : > { %v8911_v59 = vpop.eup %8910  ;;  %v11726_v41 = vand.u32 4294901760, %v5697_v53  ;;  %8922 = vrcp.f32 %v4853_v50 }
 0x3af   : > { %v5694_v18 = vsel %vm5692_vm4, %v8911_v59, 0  ;;  %v6762_v59 = vand.u32 4294901760, %v11829_v49 }
 0x3b0   : > { %v8913_v29 = vpop.eup %8912  ;;  %v11729_v42 = vand.u32 4294901760, %v5694_v18  ;;  %v11732_v39 = vsub.f32 %v5697_v53, %v11726_v41 }
 0x3b1   : > { %v5703_v51 = vsel %vm5692_vm4, %v8913_v29, 0 }
 0x3b2   : > { %v8915_v48 = vpop.eup %8914  ;;  %v11736_v60 = vsub.f32 %v5694_v18, %v11729_v42  ;;  %5960 = vmatmul.mubr.f32.vlgmr.msra.gmra.mxu1 %v11729_v42  ;;  %v11741_v0 = vand.u32 4294901760, %v5703_v51  ;;  %v5799_v4 = vand.u32 4294901760, %v11732_v39 }
 0x3b3   : > { %5965 = vmatprep.mubr.f32.mxu1 %v13216_v5  ;;  %v5700_v9 = vsel %vm5692_vm4, %v8915_v48, 0  ;;  %6183 = vmatpush1.msra.mxu1 %v11654_v63 }
 0x3b4   : > { %v5788_v55 = vand.u32 4294901760, %v11736_v60  ;;  %v11745_v11 = vand.u32 4294901760, %v5700_v9  ;;  %6185 = vmatprep.subr.mxu1 %v11659_v31  ;;  %v8917_v57 = vpop.eup %8916  ;;  %v11760_v14 = vsub.f32 %v5703_v51, %v11741_v0  ;;  %v5800_v61 = vsub.f32 %v11732_v39, %v5799_v4 }
 0x3b5   : > { %6187 = vmatpush1.msra.mxu1 %v11666_v12  ;;  %v5709_v33 = vsel %vm5692_vm4, %v8917_v57, 0  ;;  %v6763_v51 = vsub.f32 %v11829_v49, %v6762_v59 }
 0x3b6   : > { %v8919_v1 = vpop.eup %8918  ;;  %5967 = vmatmul.mubr.f32.gmra.mxu1 %v11726_v41  ;;  %v5789_v20 = vsub.f32 %v11736_v60, %v5788_v55  ;;  %v11755_v6 = vsub.f32 %v5700_v9, %v11745_v11  ;;  %6455 = vmatprep.subr.mxu1 %v11629_v47  ;;  %v5821_v47 = vand.u32 4294901760, %v11760_v14  ;;  %v5801_v62 = vand.u32 4294901760, %v5800_v61 }
 0x3b7   : > { %5972 = vmatprep.mubr.f32.mxu1 %v13216_v5  ;;  %v5706_v13 = vsel %vm5692_vm4, %v8919_v1, 0  ;;  %v11780_v8 = vand.u32 4294901760, %v5709_v33  ;;  %v6764_v9 = vand.u32 4294901760, %v6763_v51 }
 0x3b8   : > { %v5790_v56 = vand.u32 4294901760, %v5789_v20  ;;  %v5810_v22 = vand.u32 4294901760, %v11755_v6  ;;  %v11767_v36 = vand.u32 4294901760, %v5706_v13  ;;  %v5822_v45 = vsub.f32 %v11760_v14, %v5821_v47 }
 0x3b9   : > { %v11792_v54 = vsub.f32 %v5709_v33, %v11780_v8 }
 0x3ba   : > { %v8921_v15 = vpop.eup %8920  ;;  %5791 = vmatmul.mubr.f32.vlgmr.msra.gmra.mxu0 %v5790_v56  ;;  %5974 = vmatmul.mubr.f32.gmra.mxu1 %v11745_v11  ;;  %v5811_v32 = vsub.f32 %v11755_v6, %v5810_v22  ;;  %v11778_v46 = vsub.f32 %v5706_v13, %v11767_v36  ;;  %v5823_v44 = vand.u32 4294901760, %v5822_v45 }
 0x3bb   : > { %5796 = vmatprep.mubr.f32.mxu0 %v13216_v5  ;;  %5979 = vmatprep.mubr.f32.mxu1 %v13216_v5  ;;  %v5712_v10 = vsel %vm5692_vm4, %v8921_v15, 0  ;;  %v8923_v28 = vpop.eup %8922  ;;  %v5843_v52 = vand.u32 4294901760, %v11792_v54 }
 0x3bc   : > { %6048 = vmatpush1.msra.mxu0 %v11671_v25  ;;  %v5812_v17 = vand.u32 4294901760, %v5811_v32  ;;  %v5832_v16 = vand.u32 4294901760, %v11778_v46  ;;  %v11795_v3 = vand.u32 4294901760, %v5712_v10  ;;  %v5715_v43 = vsel %vm5692_vm4, %v8923_v28, 0 }
 0x3bd   : > { %6051 = vmatprep.subr.mxu0 %v11674_v38  ;;  %v5844_v26 = vsub.f32 %v11792_v54, %v5843_v52 }
 0x3be   : > { %5802 = vmatmul.mubr.f32.gmra.mxu0 %v5801_v62  ;;  %5981 = vmatmul.mubr.f32.gmra.mxu1 %v11741_v0  ;;  %v5833_v30 = vsub.f32 %v11778_v46, %v5832_v16  ;;  %v11811_v40 = vsub.f32 %v5712_v10, %v11795_v3 }
 0x3bf   : > { %5807 = vmatprep.mubr.f32.mxu0 %v13216_v5  ;;  %5986 = vmatprep.mubr.f32.mxu1 %v13216_v5  ;;  %v5845_v37 = vand.u32 4294901760, %v5844_v26 }
 0x3c0   : > { %6054 = vmatpush1.msra.mxu0 %v11683_v19  ;;  %v5834_v58 = vand.u32 4294901760, %v5833_v30  ;;  %v5854_v27 = vand.u32 4294901760, %v11811_v40 }
 0x3c1   : > { %6324 = vmatprep.subr.mxu0 %v5904_v21  ;;  %v11814_v21 = vand.u32 4294901760, %v5715_v43 }
 0x3c2   : > { %5813 = vmatmul.mubr.f32.gmra.mxu0 %v5812_v17  ;;  %5988 = vmatmul.mubr.f32.gmra.mxu1 %v11767_v36  ;;  %v5855_v50 = vsub.f32 %v11811_v40, %v5854_v27 }
 0x3c3   : > { %5818 = vmatprep.mubr.f32.mxu0 %v13216_v5  ;;  %5993 = vmatprep.mubr.f32.mxu1 %v13216_v5  ;;  %v11825_v23 = vsub.f32 %v5715_v43, %v11814_v21 }
 0x3c4   : > { %v5856_v18 = vand.u32 4294901760, %v5855_v50 }
 0x3c5   : > { %v5865_v53 = vand.u32 4294901760, %v11825_v23 }
 0x3c6   : > { %5824 = vmatmul.mubr.f32.gmra.mxu0 %v5823_v44  ;;  %5995 = vmatmul.mubr.f32.gmra.mxu1 %v11780_v8 }
 0x3c7   : > { %5829 = vmatprep.mubr.f32.mxu0 %v13216_v5  ;;  %6000 = vmatprep.mubr.f32.mxu1 %v13216_v5  ;;  %v5866_v29 = vsub.f32 %v11825_v23, %v5865_v53 }
 0x3c9   : > { %v5867_v48 = vand.u32 4294901760, %v5866_v29 }
 0x3ca   : > { %5835 = vmatmul.mubr.f32.gmra.mxu0 %v5834_v58  ;;  %6002 = vmatmul.mubr.f32.gmra.mxu1 %v11795_v3 }
 0x3cb   : > { %5840 = vmatprep.mubr.f32.mxu0 %v13216_v5  ;;  %6007 = vmatprep.mubr.f32.mxu1 %v13216_v5 }
 0x3ce   : > { %5846 = vmatmul.mubr.f32.gmra.mxu0 %v5845_v37  ;;  %6009 = vmatmul.mubr.f32.gmra.mxu1 %v11814_v21 }
 0x3cf   : > { %5851 = vmatprep.mubr.f32.mxu0 %v13216_v5  ;;  %6220 = vmatprep.mubr.f32.mxu1 %v13216_v5 }
 0x3d2   : > { %5857 = vmatmul.mubr.f32.gmra.mxu0 %v5856_v18  ;;  %6224 = vmatmul.mubr.f32.vlgmr.msra.gmra.mxu1 %v5788_v55 }
 0x3d3   : > { %5862 = vmatprep.mubr.f32.mxu0 %v13216_v5  ;;  %6229 = vmatprep.mubr.f32.mxu1 %v13216_v5 }
 0x3d4   : > { %6457 = vmatpush1.msra.mxu1 %v11654_v63  ;;  %v401_v63 = vld [vmem:[%s12503_s3 + $0x10] sm:$0xff] }
 0x3d5   : > { %6459 = vmatprep.subr.mxu1 %v11659_v31  ;;  %v400_v31 = vld [vmem:[%s12503_s3 + $0x8] sm:$0xff] }
 0x3d6   : > { %5868 = vmatmul.mubr.f32.gmra.mxu0 %v5867_v48  ;;  %6233 = vmatmul.mubr.f32.gmra.mxu1 %v5799_v4  ;;  %v11886_v38 = vand.u32 4294901760, %v400_v31 }
 0x3d7   : > { %6087 = vmatprep.mubr.f32.mxu0 %v13216_v5  ;;  %6238 = vmatprep.mubr.f32.mxu1 %v13216_v5 }
 0x3d8   : > { %6461 = vmatpush1.msra.mxu1 %v11666_v12  ;;  %v11881_v12 = vand.u32 4294901760, %v401_v63 }
 0x3d9   : > { %6765 = vmatprep.subr.mxu1 %v6764_v9 }
 0x3da   : > { %6090 = vmatmul.mubr.f32.vlgmr.msra.gmra.mxu0 %v11736_v60  ;;  %6242 = vmatmul.mubr.f32.gmra.mxu1 %v5810_v22  ;;  %v11899_v19 = vsub.f32 %v401_v63, %v11881_v12  ;;  %v11906_v60 = vsub.f32 %v400_v31, %v11886_v38 }
 0x3db   : > { %6095 = vmatprep.mubr.f32.mxu0 %v13216_v5  ;;  %6247 = vmatprep.mubr.f32.mxu1 %v13216_v5 }
 0x3dc   : > { %6328 = vmatpush1.msra.mxu0 %v5910_v35  ;;  %v399_v35 = vld [vmem:[%s12503_s3] sm:$0xff]  ;;  %v6768_v4 = vand.u32 4294901760, %v11899_v19 }
 0x3dd   : > { %6332 = vmatprep.subr.mxu0 %v5916_v7 }
 0x3de   : > { %6098 = vmatmul.mubr.f32.gmra.mxu0 %v11732_v39  ;;  %6251 = vmatmul.mubr.f32.gmra.mxu1 %v5821_v47  ;;  %v6769_v56 = vsub.f32 %v11899_v19, %v6768_v4 }
 0x3df   : > { %6103 = vmatprep.mubr.f32.mxu0 %v13216_v5  ;;  %6256 = vmatprep.mubr.f32.mxu1 %v13216_v5 }
 0x3e0   : > { %6336 = vmatpush1.msra.mxu0 %v5922_v2  ;;  %v11901_v2 = vand.u32 4294901760, %v399_v35  ;;  %v6770_v32 = vand.u32 4294901760, %v6769_v56 }
 0x3e1   : > { %v11883_v25 = vpop.f32.mrf.mxu0  ;;  %6604 = vmatprep.subr.mxu0 %v11816_v24 }
 0x3e2   : > { %6106 = vmatmul.mubr.f32.gmra.mxu0 %v11755_v6  ;;  %6260 = vmatmul.mubr.f32.gmra.mxu1 %v5832_v16  ;;  %v11917_v57 = vsub.f32 %v399_v35, %v11901_v2  ;;  %v6774_v6 = vand.u32 4294901760, %v11906_v60 }
 0x3e3   : > { %v11894_v7 = vpop.f32.mrf.mxu0  ;;  %6111 = vmatprep.mubr.f32.mxu0 %v13216_v5  ;;  %6265 = vmatprep.mubr.f32.mxu1 %v13216_v5 }
 0x3e4   : > { %v6780_v61 = vand.u32 4294901760, %v11917_v57  ;;  %v6775_v15 = vsub.f32 %v11906_v60, %v6774_v6 }
 0x3e5   : > { %v11903_v39 = vpop.f32.mrf.mxu0 }
 0x3e6   : > { %6114 = vmatmul.mubr.f32.gmra.mxu0 %v11760_v14  ;;  %6269 = vmatmul.mubr.f32.gmra.mxu1 %v5843_v52  ;;  %v6776_v45 = vand.u32 4294901760, %v6775_v15 }
 0x3e7   : > { %v11911_v55 = vpop.f32.mrf.mxu0  ;;  %6119 = vmatprep.mubr.f32.mxu0 %v13216_v5  ;;  %6274 = vmatprep.mubr.f32.mxu1 %v13216_v5 }
 0x3e9   : > { %v11919_v1 = vpop.f32.mrf.mxu0  ;;  %v11921_v20 = vpop.f32.mrf.mxu1 }
 0x3ea   : > { %6122 = vmatmul.mubr.f32.gmra.mxu0 %v11778_v46  ;;  %6278 = vmatmul.mubr.f32.gmra.mxu1 %v5854_v27  ;;  %v6781_v46 = vsub.f32 %v11917_v57, %v6780_v61  ;;  %v5122_v18 = vadd.f32 %v11921_v20, %v11883_v25 }
 0x3eb   : > { %v11927_v14 = vpop.f32.mrf.mxu0  ;;  %v11929_v13 = vpop.f32.mrf.mxu1  ;;  %6127 = vmatprep.mubr.f32.mxu0 %v13216_v5  ;;  %6283 = vmatprep.mubr.f32.mxu1 %v13216_v5 }
 0x3ec   : > { %v6782_v16 = vand.u32 4294901760, %v6781_v46  ;;  %v5116_v51 = vadd.f32 %v11929_v13, %v11894_v7 }
 0x3ed   : > { %v11937_v22 = vpop.f32.mrf.mxu0  ;;  %v11939_v33 = vpop.f32.mrf.mxu1 }
 0x3ee   : > { %6130 = vmatmul.mubr.f32.gmra.mxu0 %v11792_v54  ;;  %6287 = vmatmul.mubr.f32.gmra.mxu1 %v5865_v53  ;;  %v5134_v31 = vadd.f32 %v11939_v33, %v11903_v39 }
 0x3ef   : > { %v11947_v47 = vpop.f32.mrf.mxu0  ;;  %v11949_v62 = vpop.f32.mrf.mxu1  ;;  %6135 = vmatprep.mubr.f32.mxu0 %v13216_v5  ;;  %6494 = vmatprep.mubr.f32.mxu1 %v13216_v5 }
 0x3f1   : > { %v11956_v10 = vpop.f32.mrf.mxu1  ;;  %v8795_v28 = vpop.f32.mrf.mxu0 }
 0x3f2   : > { %6138 = vmatmul.mubr.f32.gmra.mxu0 %v11811_v40  ;;  %6496 = vmatmul.mubr.f32.vlgmr.msra.gmra.mxu1 %v11729_v42  ;;  %v5239_v48 = vadd.f32 %v8795_v28, %v5122_v18  ;;  %v5146_v39 = vadd.f32 %v11956_v10, %v11919_v1 }
 0x3f3   : > { %v11960_v17 = vpop.f32.mrf.mxu1  ;;  %v5231_v54 = vpop.f32.mrf.mxu0  ;;  %6143 = vmatprep.mubr.f32.mxu0 %v13216_v5  ;;  %6501 = vmatprep.mubr.f32.mxu1 %v13216_v5 }
 0x3f4   : > { %6771 = vmatpush1.msra.mxu1 %v6770_v32  ;;  %v5232_v25 = vadd.f32 %v5231_v54, %v5116_v51 }
 0x3f5   : > { %v11964_v43 = vpop.f32.mrf.mxu1  ;;  %v8798_v34 = vpop.f32.mrf.mxu0  ;;  %6777 = vmatprep.subr.mxu1 %v6776_v45 }
 0x3f6   : > { %6146 = vmatmul.mubr.f32.gmra.mxu0 %v11825_v23  ;;  %6503 = vmatmul.mubr.f32.gmra.mxu1 %v11726_v41  ;;  %v5253_v7 = vadd.f32 %v8798_v34, %v5134_v31 }
 0x3f7   : > { %v11968_v44 = vpop.f32.mrf.mxu1  ;;  %v5245_v30 = vpop.f32.mrf.mxu0  ;;  %6369 = vmatprep.mubr.f32.mxu0 %v13216_v5  ;;  %6508 = vmatprep.mubr.f32.mxu1 %v13216_v5 }
 0x3f8   : > { %6783 = vmatpush1.msra.mxu1 %v6782_v16 }
 0x3f9   : > { %v8801_v40 = vpop.f32.mrf.mxu0  ;;  %v8809_v52 = vpop.f32.mrf.mxu1  ;;  %7039 = vmatprep.subr.mxu1 %v11816_v24 }
 0x3fa   : > { %6371 = vmatmul.mubr.f32.vlgmr.msra.gmra.mxu0 %v11729_v42  ;;  %6510 = vmatmul.mubr.f32.gmra.mxu1 %v11745_v11  ;;  %v5363_v35 = vadd.f32 %v8809_v52, %v5239_v48  ;;  %v5158_v52 = vadd.f32 %v11964_v43, %v11937_v22 }
 0x3fb   : > { %v5259_v58 = vpop.f32.mrf.mxu0  ;;  %v5354_v26 = vpop.f32.mrf.mxu1  ;;  %6376 = vmatprep.mubr.f32.mxu0 %v13216_v5  ;;  %6515 = vmatprep.mubr.f32.mxu1 %v13216_v5 }
 0x3fc   : > { %6606 = vmatpush1.msra.mxu0 %v11881_v12  ;;  %v5355_v13 = vadd.f32 %v5354_v26, %v5232_v25 }
 0x3fd   : > { %v11978_v23 = vpop.f32.mrf.mxu0  ;;  %v8812_v27 = vpop.f32.mrf.mxu1  ;;  %6608 = vmatprep.subr.mxu0 %v11886_v38 }
 0x3fe   : > { %6378 = vmatmul.mubr.f32.gmra.mxu0 %v11726_v41  ;;  %6517 = vmatmul.mubr.f32.gmra.mxu1 %v11741_v0  ;;  %v5379_v46 = vadd.f32 %v8812_v27, %v5253_v7 }
 0x3ff   : > { %v11983_v42 = vpop.f32.mrf.mxu0  ;;  %v5370_v37 = vpop.f32.mrf.mxu1  ;;  %6383 = vmatprep.mubr.f32.mxu0 %v13216_v5  ;;  %6522 = vmatprep.mubr.f32.mxu1 %v13216_v5 }
 0x400   : > { %6610 = vmatpush1.msra.mxu0 %v11901_v2 }
 0x401   : > { %v8815_v50 = vpop.f32.mrf.mxu1  ;;  %v8823_v53 = vpop.f32.mrf.mxu0  ;;  %6903 = vmatprep.subr.mxu0 %v11829_v49 }
 0x402   : > { %6385 = vmatmul.mubr.f32.gmra.mxu0 %v11745_v11  ;;  %6524 = vmatmul.mubr.f32.gmra.mxu1 %v11767_v36  ;;  %v5128_v11 = vadd.f32 %v11949_v62, %v11911_v55  ;;  %v5491_v15 = vadd.f32 %v8823_v53, %v5363_v35  ;;  %v5140_v55 = vadd.f32 %v11960_v17, %v11927_v14 }
 0x403   : > { %v5386_v41 = vpop.f32.mrf.mxu1  ;;  %v5484_v29 = vpop.f32.mrf.mxu0  ;;  %6390 = vmatprep.mubr.f32.mxu0 %v13216_v5  ;;  %6529 = vmatprep.mubr.f32.mxu1 %v13216_v5  ;;  %v5267_v62 = vadd.f32 %v8801_v40, %v5146_v39  ;;  %v5152_v40 = vadd.f32 %v11968_v44, %v11947_v47 }
 0x404   : > { %v5246_v33 = vadd.f32 %v5245_v30, %v5128_v11  ;;  %v5485_v28 = vadd.f32 %v5484_v29, %v5355_v13 }
 0x405   : > { %v8818_v9 = vpop.f32.mrf.mxu1  ;;  %v8826_v63 = vpop.f32.mrf.mxu0  ;;  %v5395_v26 = vadd.f32 %v8815_v50, %v5267_v62 }
 0x406   : > { %6392 = vmatmul.mubr.f32.gmra.mxu0 %v11741_v0  ;;  %6531 = vmatmul.mubr.f32.gmra.mxu1 %v11780_v8  ;;  %v5371_v1 = vadd.f32 %v5370_v37, %v5246_v33  ;;  %v5503_v10 = vadd.f32 %v8826_v63, %v5379_v46  ;;  %v5281_v37 = vadd.f32 %v11978_v23, %v5158_v52 }
 0x407   : > { %v5402_v20 = vpop.f32.mrf.mxu1  ;;  %v5496_v56 = vpop.f32.mrf.mxu0  ;;  %6397 = vmatprep.mubr.f32.mxu0 %v13216_v5  ;;  %6536 = vmatprep.mubr.f32.mxu1 %v13216_v5 }
 0x408   : > { %v5497_v53 = vadd.f32 %v5496_v56, %v5371_v1  ;;  %v5411_v50 = vadd.f32 %v8818_v9, %v5281_v37 }
 0x409   : > { %v8829_v32 = vpop.f32.mrf.mxu0  ;;  %v8837_v0 = vpop.f32.mrf.mxu1 }
 0x40a   : > { %v5605_v45 = vadd.f32 %v8837_v0, %v5491_v15  ;;  %6399 = vmatmul.mubr.f32.gmra.mxu0 %v11767_v36  ;;  %6538 = vmatmul.mubr.f32.gmra.mxu1 %v11795_v3  ;;  %v5260_v36 = vadd.f32 %v5259_v58, %v5140_v55  ;;  %v5515_v22 = vadd.f32 %v8829_v32, %v5395_v26 }
 0x40b   : > { %v5508_v54 = vpop.f32.mrf.mxu0  ;;  %v5598_v16 = vpop.f32.mrf.mxu1  ;;  %6404 = vmatprep.mubr.f32.mxu0 %v13216_v5  ;;  %6543 = vmatprep.mubr.f32.mxu1 %v13216_v5 }
 0x40c   : > { %v7549_v34 = vmul.f32 -1.442695, %v5605_v45  ;;  %v5599_v30 = vadd.f32 %v5598_v16, %v5485_v28  ;;  %v5387_v18 = vadd.f32 %v5386_v41, %v5260_v36 }
 0x40d   : > { %v8840_v27 = vpop.f32.mrf.mxu1  ;;  %v8832_v29 = vpop.f32.mrf.mxu0 }
 0x40e   : > { %8924 = vpow2.f32 %v7549_v34  ;;  %v7548_v14 = vmul.f32 -1.442695, %v5599_v30  ;;  %v5617_v17 = vadd.f32 %v8840_v27, %v5503_v10  ;;  %6406 = vmatmul.mubr.f32.gmra.mxu0 %v11780_v8  ;;  %6545 = vmatmul.mubr.f32.gmra.mxu1 %v11814_v21  ;;  %v5274_v8 = vadd.f32 %v11983_v42, %v5152_v40 }
 0x40f   : > { %v5610_v51 = vpop.f32.mrf.mxu1  ;;  %6411 = vmatprep.mubr.f32.mxu0 %v13216_v5  ;;  %6816 = vmatprep.mubr.f32.mxu1 %v13216_v5  ;;  %v5509_v63 = vadd.f32 %v5508_v54, %v5387_v18  ;;  %v5520_v41 = vpop.f32.mrf.mxu0  ;;  %v5527_v25 = vadd.f32 %v8832_v29, %v5411_v50 }
 0x410   : > { %8926 = vpow2.f32 %v7548_v14  ;;  %v7551_v43 = vmul.f32 -1.442695, %v5617_v17  ;;  %v5611_v58 = vadd.f32 %v5610_v51, %v5497_v53  ;;  %v5403_v23 = vadd.f32 %v5402_v20, %v5274_v8 }
 0x411   : > { %v8843_v48 = vpop.f32.mrf.mxu1 }
 0x412   : > { %8928 = vpow2.f32 %v7551_v43  ;;  %v7550_v47 = vmul.f32 -1.442695, %v5611_v58  ;;  %v5629_v44 = vadd.f32 %v8843_v48, %v5515_v22  ;;  %6413 = vmatmul.mubr.f32.gmra.mxu0 %v11795_v3  ;;  %v5521_v7 = vadd.f32 %v5520_v41, %v5403_v23 }
 0x413   : > { %v5622_v31 = vpop.f32.mrf.mxu1  ;;  %6418 = vmatprep.mubr.f32.mxu0 %v13216_v5 }
 0x414   : > { %8930 = vpow2.f32 %v7550_v47  ;;  %v7553_v35 = vmul.f32 -1.442695, %v5629_v44  ;;  %v5623_v11 = vadd.f32 %v5622_v31, %v5509_v63 }
 0x415   : > { %v8846_v56 = vpop.f32.mrf.mxu1 }
 0x416   : > { %8932 = vpow2.f32 %v7553_v35  ;;  %v7552_v42 = vmul.f32 -1.442695, %v5623_v11  ;;  %v5641_v9 = vadd.f32 %v8846_v56, %v5527_v25  ;;  %6420 = vmatmul.mubr.f32.gmra.mxu0 %v11814_v21 }
 0x417   : > { %v5634_v13 = vpop.f32.mrf.mxu1  ;;  %6643 = vmatprep.mubr.f32.mxu0 %v13216_v5 }
 0x418   : > { %8934 = vpow2.f32 %v7552_v42  ;;  %v7555_v3 = vmul.f32 -1.442695, %v5641_v9  ;;  %v5635_v20 = vadd.f32 %v5634_v13, %v5521_v7 }
 0x41a   : > { %v7554_v15 = vmul.f32 -1.442695, %v5635_v20  ;;  %8936 = vpow2.f32 %v7555_v3 }
 0x41b   : > { %v8925_v39 = vpop.eup %8924 }
 0x41c   : > { %v5669_v33 = vadd.f32 1.0, %v8925_v39  ;;  %8938 = vpow2.f32 %v7554_v15 }
 0x41d   : > { %v8927_v32 = vpop.eup %8926 }
 0x41e   : > { %8940 = vrcp.f32 %v5669_v33  ;;  %v5668_v0 = vadd.f32 1.0, %v8927_v32 }
 0x41f   : > { %v8929_v46 = vpop.eup %8928 }
 0x420   : > { %8942 = vrcp.f32 %v5668_v0  ;;  %v5671_v28 = vadd.f32 1.0, %v8929_v46 }
 0x421   : > { %v8931_v45 = vpop.eup %8930 }
 0x422   : > { %8944 = vrcp.f32 %v5671_v28  ;;  %v5670_v21 = vadd.f32 1.0, %v8931_v45 }
 0x423   : > { %v8933_v55 = vpop.eup %8932 }
 0x424   : > { %8946 = vrcp.f32 %v5670_v21  ;;  %v5673_v62 = vadd.f32 1.0, %v8933_v55 }
 0x425   : > { %v8935_v54 = vpop.eup %8934 }
 0x426   : > { %v5672_v16 = vadd.f32 1.0, %v8935_v54  ;;  %8948 = vrcp.f32 %v5673_v62 }
 0x427   : > { %v8937_v1 = vpop.eup %8936 }
 0x428   : > { %8950 = vrcp.f32 %v5672_v16  ;;  %v5675_v52 = vadd.f32 1.0, %v8937_v1 }
 0x429   : > { %v8939_v10 = vpop.eup %8938 }
 0x42a   : > { %v5674_v34 = vadd.f32 1.0, %v8939_v10 }
 0x42b   : > { %v8941_v30 = vpop.eup %8940 }
 0x42c   : > { %8952 = vrcp.f32 %v5674_v34  ;;  %v6555_v36 = vsel %vm5692_vm4, %v8941_v30, 0 }
 0x42d   : > { %v8943_v26 = vpop.eup %8942  ;;  %v12028_v27 = vand.u32 4294901760, %v6555_v36  ;;  %8954 = vrcp.f32 %v5675_v52 }
 0x42e   : > { %v6552_v53 = vsel %vm5692_vm4, %v8943_v26, 0 }
 0x42f   : > { %v8945_v14 = vpop.eup %8944  ;;  %v12031_v17 = vand.u32 4294901760, %v6552_v53  ;;  %v12034_v40 = vsub.f32 %v6555_v36, %v12028_v27 }
 0x430   : > { %v6561_v37 = vsel %vm5692_vm4, %v8945_v14, 0 }
 0x431   : > { %v8947_v18 = vpop.eup %8946  ;;  %v12038_v29 = vsub.f32 %v6552_v53, %v12031_v17  ;;  %6818 = vmatmul.mubr.f32.vlgmr.msra.gmra.mxu1 %v12031_v17  ;;  %v12043_v22 = vand.u32 4294901760, %v6561_v37  ;;  %v6657_v8 = vand.u32 4294901760, %v12034_v40 }
 0x432   : > { %6823 = vmatprep.mubr.f32.mxu1 %v13216_v5  ;;  %v6558_v51 = vsel %vm5692_vm4, %v8947_v18, 0  ;;  %7041 = vmatpush1.msra.mxu1 %v11881_v12 }
 0x433   : > { %v6646_v43 = vand.u32 4294901760, %v12038_v29  ;;  %v12047_v58 = vand.u32 4294901760, %v6558_v51  ;;  %7043 = vmatprep.subr.mxu1 %v11886_v38  ;;  %v8949_v50 = vpop.eup %8948  ;;  %v12062_v44 = vsub.f32 %v6561_v37, %v12043_v22  ;;  %v6658_v31 = vsub.f32 %v12034_v40, %v6657_v8 }
 0x434   : > { %7045 = vmatpush1.msra.mxu1 %v11901_v2  ;;  %v6567_v11 = vsel %vm5692_vm4, %v8949_v50, 0 }
 0x435   : > { %v8951_v48 = vpop.eup %8950  ;;  %6825 = vmatmul.mubr.f32.gmra.mxu1 %v12028_v27  ;;  %v6647_v63 = vsub.f32 %v12038_v29, %v6646_v43  ;;  %v12057_v47 = vsub.f32 %v6558_v51, %v12047_v58  ;;  %7313 = vmatprep.subr.mxu1 %v11816_v24  ;;  %v6679_v24 = vand.u32 4294901760, %v12062_v44  ;;  %v6659_v7 = vand.u32 4294901760, %v6658_v31 }
 0x436   : > { %6830 = vmatprep.mubr.f32.mxu1 %v13216_v5  ;;  %v6564_v23 = vsel %vm5692_vm4, %v8951_v48, 0  ;;  %v12082_v13 = vand.u32 4294901760, %v6567_v11 }
 0x437   : > { %v6648_v41 = vand.u32 4294901760, %v6647_v63  ;;  %v6668_v25 = vand.u32 4294901760, %v12057_v47  ;;  %v12069_v35 = vand.u32 4294901760, %v6564_v23  ;;  %v6680_v15 = vsub.f32 %v12062_v44, %v6679_v24 }
 0x438   : > { %v12094_v33 = vsub.f32 %v6567_v11, %v12082_v13 }
 0x439   : > { %v8953_v56 = vpop.eup %8952  ;;  %6649 = vmatmul.mubr.f32.vlgmr.msra.gmra.mxu0 %v6648_v41  ;;  %6832 = vmatmul.mubr.f32.gmra.mxu1 %v12047_v58  ;;  %v6669_v42 = vsub.f32 %v12057_v47, %v6668_v25  ;;  %v12080_v9 = vsub.f32 %v6564_v23, %v12069_v35  ;;  %v6681_v28 = vand.u32 4294901760, %v6680_v15 }
 0x43a   : > { %6654 = vmatprep.mubr.f32.mxu0 %v13216_v5  ;;  %6837 = vmatprep.mubr.f32.mxu1 %v13216_v5  ;;  %v6570_v3 = vsel %vm5692_vm4, %v8953_v56, 0  ;;  %v8955_v20 = vpop.eup %8954  ;;  %v6701_v55 = vand.u32 4294901760, %v12094_v33 }
 0x43b   : > { %6906 = vmatpush1.msra.mxu0 %v11899_v19  ;;  %v6670_v39 = vand.u32 4294901760, %v6669_v42  ;;  %v6690_v32 = vand.u32 4294901760, %v12080_v9  ;;  %v12097_v0 = vand.u32 4294901760, %v6570_v3  ;;  %v6573_v46 = vsel %vm5692_vm4, %v8955_v20, 0 }
 0x43c   : > { %6909 = vmatprep.subr.mxu0 %v11906_v60  ;;  %v12109_v62 = vand.u32 4294901760, %v6573_v46 }
 0x43d   : > { %6660 = vmatmul.mubr.f32.gmra.mxu0 %v6659_v7  ;;  %6839 = vmatmul.mubr.f32.gmra.mxu1 %v12043_v22  ;;  %v6691_v45 = vsub.f32 %v12080_v9, %v6690_v32  ;;  %v6711_v21 = vsub.f32 %v6570_v3, %v12097_v0 }
 0x43e   : > { %6665 = vmatprep.mubr.f32.mxu0 %v13216_v5  ;;  %6844 = vmatprep.mubr.f32.mxu1 %v13216_v5  ;;  %v6722_v54 = vsub.f32 %v6573_v46, %v12109_v62 }
 0x43f   : > { %6912 = vmatpush1.msra.mxu0 %v11917_v57  ;;  %v6692_v49 = vand.u32 4294901760, %v6691_v45  ;;  %v6712_v16 = vand.u32 4294901760, %v6711_v21 }
 0x440   : > { %7182 = vmatprep.subr.mxu0 %v6762_v59  ;;  %v6702_v59 = vsub.f32 %v12094_v33, %v6701_v55  ;;  %v6723_v34 = vand.u32 4294901760, %v6722_v54 }
 0x441   : > { %6671 = vmatmul.mubr.f32.gmra.mxu0 %v6670_v39  ;;  %6846 = vmatmul.mubr.f32.gmra.mxu1 %v12069_v35  ;;  %v6713_v10 = vsub.f32 %v6711_v21, %v6712_v16 }
 0x442   : > { %6676 = vmatprep.mubr.f32.mxu0 %v13216_v5  ;;  %6851 = vmatprep.mubr.f32.mxu1 %v13216_v5  ;;  %v6703_v1 = vand.u32 4294901760, %v6702_v59  ;;  %v6724_v52 = vsub.f32 %v6722_v54, %v6723_v34 }
 0x443   : > { %v6714_v30 = vand.u32 4294901760, %v6713_v10 }
 0x444   : > { %v6725_v36 = vand.u32 4294901760, %v6724_v52 }
 0x445   : > { %6682 = vmatmul.mubr.f32.gmra.mxu0 %v6681_v28  ;;  %6853 = vmatmul.mubr.f32.gmra.mxu1 %v12082_v13 }
 0x446   : > { %6687 = vmatprep.mubr.f32.mxu0 %v13216_v5  ;;  %6858 = vmatprep.mubr.f32.mxu1 %v13216_v5 }
 0x449   : > { %6693 = vmatmul.mubr.f32.gmra.mxu0 %v6692_v49  ;;  %6860 = vmatmul.mubr.f32.gmra.mxu1 %v12097_v0 }
 0x44a   : > { %6698 = vmatprep.mubr.f32.mxu0 %v13216_v5  ;;  %6865 = vmatprep.mubr.f32.mxu1 %v13216_v5 }
 0x44d   : > { %6704 = vmatmul.mubr.f32.gmra.mxu0 %v6703_v1  ;;  %6867 = vmatmul.mubr.f32.gmra.mxu1 %v12109_v62 }
 0x44e   : > { %6709 = vmatprep.mubr.f32.mxu0 %v13216_v5  ;;  %7078 = vmatprep.mubr.f32.mxu1 %v13216_v5 }
 0x451   : > { %6715 = vmatmul.mubr.f32.gmra.mxu0 %v6714_v30  ;;  %7082 = vmatmul.mubr.f32.vlgmr.msra.gmra.mxu1 %v6646_v43 }
 0x452   : > { %6720 = vmatprep.mubr.f32.mxu0 %v13216_v5  ;;  %7087 = vmatprep.mubr.f32.mxu1 %v13216_v5 }
 0x453   : > { %7315 = vmatpush1.msra.mxu1 %v11881_v12 }
 0x454   : > { %7317 = vmatprep.subr.mxu1 %v11886_v38 }
 0x455   : > { %6726 = vmatmul.mubr.f32.gmra.mxu0 %v6725_v36  ;;  %7091 = vmatmul.mubr.f32.gmra.mxu1 %v6657_v8 }
 0x456   : > { %6945 = vmatprep.mubr.f32.mxu0 %v13216_v5  ;;  %7096 = vmatprep.mubr.f32.mxu1 %v13216_v5 }
 0x457   : > { %7319 = vmatpush1.msra.mxu1 %v11901_v2 }
 0x459   : > { %6948 = vmatmul.mubr.f32.vlgmr.msra.gmra.mxu0 %v12038_v29  ;;  %7100 = vmatmul.mubr.f32.gmra.mxu1 %v6668_v25 }
 0x45a   : > { %6953 = vmatprep.mubr.f32.mxu0 %v13216_v5  ;;  %7105 = vmatprep.mubr.f32.mxu1 %v13216_v5 }
 0x45b   : > { %7186 = vmatpush1.msra.mxu0 %v6768_v4 }
 0x45c   : > { %7190 = vmatprep.subr.mxu0 %v6774_v6 }
 0x45d   : > { %6956 = vmatmul.mubr.f32.gmra.mxu0 %v12034_v40  ;;  %7109 = vmatmul.mubr.f32.gmra.mxu1 %v6679_v24 }
 0x45e   : > { %6961 = vmatprep.mubr.f32.mxu0 %v13216_v5  ;;  %7114 = vmatprep.mubr.f32.mxu1 %v13216_v5 }
 0x45f   : > { %7194 = vmatpush1.msra.mxu0 %v6780_v61 }
 0x461   : > { %6964 = vmatmul.mubr.f32.gmra.mxu0 %v12057_v47  ;;  %7118 = vmatmul.mubr.f32.gmra.mxu1 %v6690_v32 }
 0x462   : > { %6969 = vmatprep.mubr.f32.mxu0 %v13216_v5  ;;  %7123 = vmatprep.mubr.f32.mxu1 %v13216_v5 }
 0x465   : > { %6972 = vmatmul.mubr.f32.gmra.mxu0 %v12062_v44  ;;  %7127 = vmatmul.mubr.f32.gmra.mxu1 %v6701_v55 }
 0x466   : > { %6977 = vmatprep.mubr.f32.mxu0 %v13216_v5  ;;  %7132 = vmatprep.mubr.f32.mxu1 %v13216_v5 }
 0x469   : > { %6980 = vmatmul.mubr.f32.gmra.mxu0 %v12080_v9  ;;  %7136 = vmatmul.mubr.f32.gmra.mxu1 %v6712_v16 }
 0x46a   : > { %6985 = vmatprep.mubr.f32.mxu0 %v13216_v5  ;;  %7141 = vmatprep.mubr.f32.mxu1 %v13216_v5 }
 0x46d   : > { %6988 = vmatmul.mubr.f32.gmra.mxu0 %v12094_v33  ;;  %7145 = vmatmul.mubr.f32.gmra.mxu1 %v6723_v34 }
 0x46e   : > { %6993 = vmatprep.mubr.f32.mxu0 %v13216_v5  ;;  %7352 = vmatprep.mubr.f32.mxu1 %v13216_v5 }
 0x471   : > { %6996 = vmatmul.mubr.f32.gmra.mxu0 %v6711_v21  ;;  %7354 = vmatmul.mubr.f32.vlgmr.msra.gmra.mxu1 %v12031_v17 }
 0x472   : > { %7001 = vmatprep.mubr.f32.mxu0 %v13216_v5  ;;  %7359 = vmatprep.mubr.f32.mxu1 %v13216_v5  ;;  %v5961_v12 = vpop.f32.mrf.mxu1 }
 0x474   : > { %v5963_v38 = vpop.f32.mrf.mxu1 }
 0x475   : > { %7004 = vmatmul.mubr.f32.gmra.mxu0 %v6722_v54  ;;  %7361 = vmatmul.mubr.f32.gmra.mxu1 %v12028_v27 }
 0x476   : > { %7227 = vmatprep.mubr.f32.mxu0 %v13216_v5  ;;  %7366 = vmatprep.mubr.f32.mxu1 %v13216_v5  ;;  %v5968_v19 = vpop.f32.mrf.mxu1 }
 0x478   : > { %v5970_v2 = vpop.f32.mrf.mxu1 }
 0x479   : > { %7229 = vmatmul.mubr.f32.vlgmr.msra.gmra.mxu0 %v12031_v17  ;;  %7368 = vmatmul.mubr.f32.gmra.mxu1 %v12047_v58 }
 0x47a   : > { %7234 = vmatprep.mubr.f32.mxu0 %v13216_v5  ;;  %7373 = vmatprep.mubr.f32.mxu1 %v13216_v5  ;;  %v5792_v60 = vpop.f32.mrf.mxu0  ;;  %v5975_v4 = vpop.f32.mrf.mxu1 }
 0x47b   : > { %v12171_v57 = vadd.f32 %v5961_v12, %v5792_v60 }
 0x47c   : > { %v5794_v6 = vpop.f32.mrf.mxu0  ;;  %v5977_v61 = vpop.f32.mrf.mxu1 }
 0x47d   : > { %7236 = vmatmul.mubr.f32.gmra.mxu0 %v12028_v27  ;;  %7375 = vmatmul.mubr.f32.gmra.mxu1 %v12043_v22  ;;  %v12175_v26 = vadd.f32 %v5963_v38, %v5794_v6 }
 0x47e   : > { %7241 = vmatprep.mubr.f32.mxu0 %v13216_v5  ;;  %7380 = vmatprep.mubr.f32.mxu1 %v13216_v5  ;;  %v5803_v53 = vpop.f32.mrf.mxu0  ;;  %v5982_v14 = vpop.f32.mrf.mxu1 }
 0x47f   : > { %v12179_v17 = vadd.f32 %v5968_v19, %v5803_v53 }
 0x480   : > { %v5805_v40 = vpop.f32.mrf.mxu0  ;;  %v5984_v37 = vpop.f32.mrf.mxu1 }
 0x481   : > { %7243 = vmatmul.mubr.f32.gmra.mxu0 %v12047_v58  ;;  %7382 = vmatmul.mubr.f32.gmra.mxu1 %v12069_v35  ;;  %v12183_v18 = vadd.f32 %v5970_v2, %v5805_v40 }
 0x482   : > { %7248 = vmatprep.mubr.f32.mxu0 %v13216_v5  ;;  %7387 = vmatprep.mubr.f32.mxu1 %v13216_v5  ;;  %v5814_v27 = vpop.f32.mrf.mxu0  ;;  %v5989_v29 = vpop.f32.mrf.mxu1 }
 0x483   : > { %v12187_v51 = vadd.f32 %v5975_v4, %v5814_v27 }
 0x484   : > { %v5816_v43 = vpop.f32.mrf.mxu0  ;;  %v5991_v8 = vpop.f32.mrf.mxu1 }
 0x485   : > { %7250 = vmatmul.mubr.f32.gmra.mxu0 %v12043_v22  ;;  %7389 = vmatmul.mubr.f32.gmra.mxu1 %v12082_v13  ;;  %v12191_v50 = vadd.f32 %v5977_v61, %v5816_v43 }
 0x486   : > { %7255 = vmatprep.mubr.f32.mxu0 %v13216_v5  ;;  %7394 = vmatprep.mubr.f32.mxu1 %v13216_v5  ;;  %v5825_v58 = vpop.f32.mrf.mxu0  ;;  %v5996_v48 = vpop.f32.mrf.mxu1 }
 0x487   : > { %v12195_v63 = vadd.f32 %v5982_v14, %v5825_v58 }
 0x488   : > { %v5827_v47 = vpop.f32.mrf.mxu0  ;;  %v5998_v44 = vpop.f32.mrf.mxu1 }
 0x489   : > { %7257 = vmatmul.mubr.f32.gmra.mxu0 %v12069_v35  ;;  %7396 = vmatmul.mubr.f32.gmra.mxu1 %v12097_v0  ;;  %v5985_v23 = vadd.f32 %v5984_v37, %v5827_v47 }
 0x48a   : > { %7262 = vmatprep.mubr.f32.mxu0 %v13216_v5  ;;  %7401 = vmatprep.mubr.f32.mxu1 %v13216_v5  ;;  %v5836_v22 = vpop.f32.mrf.mxu0  ;;  %v6003_v41 = vpop.f32.mrf.mxu1 }
 0x48b   : > { %v5990_v31 = vadd.f32 %v5989_v29, %v5836_v22 }
 0x48c   : > { %v5838_v25 = vpop.f32.mrf.mxu0  ;;  %v6005_v11 = vpop.f32.mrf.mxu1 }
 0x48d   : > { %7264 = vmatmul.mubr.f32.gmra.mxu0 %v12082_v13  ;;  %7403 = vmatmul.mubr.f32.gmra.mxu1 %v12109_v62  ;;  %v5992_v56 = vadd.f32 %v5991_v8, %v5838_v25 }
 0x48e   : > { %7269 = vmatprep.mubr.f32.mxu0 %v13216_v5  ;;  %v5847_v35 = vpop.f32.mrf.mxu0  ;;  %v6010_v24 = vpop.f32.mrf.mxu1 }
 0x48f   : > { %v5997_v7 = vadd.f32 %v5996_v48, %v5847_v35 }
 0x490   : > { %v5849_v42 = vpop.f32.mrf.mxu0  ;;  %v6012_v9 = vpop.f32.mrf.mxu1 }
 0x491   : > { %7271 = vmatmul.mubr.f32.gmra.mxu0 %v12097_v0  ;;  %v5999_v3 = vadd.f32 %v5998_v44, %v5849_v42 }
 0x492   : > { %7276 = vmatprep.mubr.f32.mxu0 %v13216_v5  ;;  %v5858_v20 = vpop.f32.mrf.mxu0  ;;  %v6225_v15 = vpop.f32.mrf.mxu1 }
 0x493   : > { %v6004_v39 = vadd.f32 %v6003_v41, %v5858_v20 }
 0x494   : > { %v5860_v33 = vpop.f32.mrf.mxu0  ;;  %v6227_v13 = vpop.f32.mrf.mxu1 }
 0x495   : > { %7278 = vmatmul.mubr.f32.gmra.mxu0 %v12109_v62  ;;  %v6006_v32 = vadd.f32 %v6005_v11, %v5860_v33 }
 0x496   : > { %v5869_v46 = vpop.f32.mrf.mxu0  ;;  %v6234_v28 = vpop.f32.mrf.mxu1 }
 0x497   : > { %v6011_v45 = vadd.f32 %v6010_v24, %v5869_v46 }
 0x498   : > { %v5871_v21 = vpop.f32.mrf.mxu0  ;;  %v6236_v55 = vpop.f32.mrf.mxu1 }
 0x499   : > { %v6013_v49 = vadd.f32 %v6012_v9, %v5871_v21 }
 0x49a   : > { %v6091_v59 = vpop.f32.mrf.mxu0  ;;  %v6243_v54 = vpop.f32.mrf.mxu1 }
 0x49b   : > { %v6092_v0 = vadd.f32 %v6091_v59, %v12171_v57 }
 0x49c   : > { %v6093_v16 = vpop.f32.mrf.mxu0  ;;  %v6245_v5 = vpop.f32.mrf.mxu1 }
 0x49d   : > { %v6094_v1 = vadd.f32 %v6093_v16, %v12175_v26  ;;  %v6226_v10 = vadd.f32 %v6225_v15, %v6092_v0 }
 0x49e   : > { %v6099_v34 = vpop.f32.mrf.mxu0  ;;  %v6252_v30 = vpop.f32.mrf.mxu1 }
 0x49f   : > { %v6100_v62 = vadd.f32 %v6099_v34, %v12179_v17  ;;  %v6228_v52 = vadd.f32 %v6227_v13, %v6094_v1 }
 0x4a0   : > { %v6101_v36 = vpop.f32.mrf.mxu0  ;;  %v6254_v12 = vpop.f32.mrf.mxu1 }
 0x4a1   : > { %v6102_v38 = vadd.f32 %v6101_v36, %v12183_v18  ;;  %v6235_v19 = vadd.f32 %v6234_v28, %v6100_v62 }
 0x4a2   : > { %v6107_v2 = vpop.f32.mrf.mxu0  ;;  %v6261_v60 = vpop.f32.mrf.mxu1 }
 0x4a3   : > { %v6108_v4 = vadd.f32 %v6107_v2, %v12187_v51  ;;  %v6237_v57 = vadd.f32 %v6236_v55, %v6102_v38 }
 0x4a4   : > { %v6109_v6 = vpop.f32.mrf.mxu0  ;;  %v6263_v61 = vpop.f32.mrf.mxu1 }
 0x4a5   : > { %v6110_v26 = vadd.f32 %v6109_v6, %v12191_v50  ;;  %v6244_v53 = vadd.f32 %v6243_v54, %v6108_v4 }
 0x4a6   : > { %v6115_v14 = vpop.f32.mrf.mxu0  ;;  %v6270_v40 = vpop.f32.mrf.mxu1 }
 0x4a7   : > { %v6116_v17 = vadd.f32 %v6115_v14, %v12195_v63  ;;  %v6246_v37 = vadd.f32 %v6245_v5, %v6110_v26 }
 0x4a8   : > { %v6117_v27 = vpop.f32.mrf.mxu0  ;;  %v6272_v29 = vpop.f32.mrf.mxu1 }
 0x4a9   : > { %v6118_v43 = vadd.f32 %v6117_v27, %v5985_v23  ;;  %v6253_v18 = vadd.f32 %v6252_v30, %v6116_v17 }
 0x4aa   : > { %v6123_v8 = vpop.f32.mrf.mxu0  ;;  %v6279_v58 = vpop.f32.mrf.mxu1 }
 0x4ab   : > { %v6124_v48 = vadd.f32 %v6123_v8, %v5990_v31  ;;  %v6255_v47 = vadd.f32 %v6254_v12, %v6118_v43 }
 0x4ac   : > { %v6125_v51 = vpop.f32.mrf.mxu0  ;;  %v6281_v44 = vpop.f32.mrf.mxu1 }
 0x4ad   : > { %v6126_v22 = vadd.f32 %v6125_v51, %v5992_v56  ;;  %v6262_v41 = vadd.f32 %v6261_v60, %v6124_v48 }
 0x4ae   : > { %v6131_v25 = vpop.f32.mrf.mxu0  ;;  %v6288_v50 = vpop.f32.mrf.mxu1 }
 0x4af   : > { %v6132_v11 = vadd.f32 %v6131_v25, %v5997_v7  ;;  %v6264_v35 = vadd.f32 %v6263_v61, %v6126_v22 }
 0x4b0   : > { %v6133_v24 = vpop.f32.mrf.mxu0  ;;  %v6290_v42 = vpop.f32.mrf.mxu1 }
 0x4b1   : > { %v6134_v63 = vadd.f32 %v6133_v24, %v5999_v3  ;;  %v6271_v9 = vadd.f32 %v6270_v40, %v6132_v11 }
 0x4b2   : > { %v6139_v20 = vpop.f32.mrf.mxu0  ;;  %v6497_v15 = vpop.f32.mrf.mxu1 }
 0x4b3   : > { %v6140_v23 = vadd.f32 %v6139_v20, %v6004_v39  ;;  %v6273_v33 = vadd.f32 %v6272_v29, %v6134_v63 }
 0x4b4   : > { %v6141_v13 = vpop.f32.mrf.mxu0  ;;  %v6499_v46 = vpop.f32.mrf.mxu1 }
 0x4b5   : > { %v6142_v31 = vadd.f32 %v6141_v13, %v6006_v32  ;;  %v6280_v28 = vadd.f32 %v6279_v58, %v6140_v23 }
 0x4b6   : > { %v6147_v21 = vpop.f32.mrf.mxu0  ;;  %v6504_v55 = vpop.f32.mrf.mxu1 }
 0x4b7   : > { %v6148_v56 = vadd.f32 %v6147_v21, %v6011_v45  ;;  %v6282_v59 = vadd.f32 %v6281_v44, %v6142_v31 }
 0x4b8   : > { %v6149_v54 = vpop.f32.mrf.mxu0  ;;  %v6506_v0 = vpop.f32.mrf.mxu1 }
 0x4b9   : > { %v6150_v7 = vadd.f32 %v6149_v54, %v6013_v49  ;;  %v6289_v16 = vadd.f32 %v6288_v50, %v6148_v56 }
 0x4ba   : > { %v6372_v5 = vpop.f32.mrf.mxu0  ;;  %v6511_v1 = vpop.f32.mrf.mxu1 }
 0x4bb   : > { %v6373_v3 = vadd.f32 %v6372_v5, %v6226_v10  ;;  %v6291_v34 = vadd.f32 %v6290_v42, %v6150_v7 }
 0x4bc   : > { %v6374_v30 = vpop.f32.mrf.mxu0  ;;  %v6513_v62 = vpop.f32.mrf.mxu1 }
 0x4bd   : > { %v12214_v39 = vadd.f32 %v6497_v15, %v6373_v3  ;;  %v6375_v36 = vadd.f32 %v6374_v30, %v6228_v52 }
 0x4be   : > { %v6379_v12 = vpop.f32.mrf.mxu0  ;;  %v6518_v32 = vpop.f32.mrf.mxu1 }
 0x4bf   : > { %v12216_v38 = vadd.f32 %v6499_v46, %v6375_v36  ;;  %v6380_v2 = vadd.f32 %v6379_v12, %v6235_v19 }
 0x4c0   : > { %v6381_v45 = vpop.f32.mrf.mxu0  ;;  %v6520_v60 = vpop.f32.mrf.mxu1 }
 0x4c1   : > { %v12218_v4 = vadd.f32 %v6504_v55, %v6380_v2  ;;  %v6382_v49 = vadd.f32 %v6381_v45, %v6237_v57 }
 0x4c2   : > { %v6386_v6 = vpop.f32.mrf.mxu0  ;;  %v6525_v61 = vpop.f32.mrf.mxu1 }
 0x4c3   : > { %v12220_v26 = vadd.f32 %v6506_v0, %v6382_v49  ;;  %v6387_v10 = vadd.f32 %v6386_v6, %v6244_v53 }
 0x4c4   : > { %v6388_v14 = vpop.f32.mrf.mxu0  ;;  %v6527_v40 = vpop.f32.mrf.mxu1 }
 0x4c5   : > { %v12222_v17 = vadd.f32 %v6511_v1, %v6387_v10  ;;  %v6389_v52 = vadd.f32 %v6388_v14, %v6246_v37 }
 0x4c6   : > { %v6393_v27 = vpop.f32.mrf.mxu0  ;;  %v6532_v29 = vpop.f32.mrf.mxu1 }
 0x4c7   : > { %v12224_v43 = vadd.f32 %v6513_v62, %v6389_v52  ;;  %v6394_v19 = vadd.f32 %v6393_v27, %v6253_v18 }
 0x4c8   : > { %v6395_v8 = vpop.f32.mrf.mxu0  ;;  %v6534_v57 = vpop.f32.mrf.mxu1 }
 0x4c9   : > { %v12226_v58 = vadd.f32 %v6518_v32, %v6394_v19  ;;  %v6396_v48 = vadd.f32 %v6395_v8, %v6255_v47 }
 0x4ca   : > { %v6400_v51 = vpop.f32.mrf.mxu0  ;;  %v6539_v11 = vpop.f32.mrf.mxu1 }
 0x4cb   : > { %v12228_v44 = vadd.f32 %v6520_v60, %v6396_v48  ;;  %v6401_v22 = vadd.f32 %v6400_v51, %v6262_v41 }
 0x4cc   : > { %v6402_v53 = vpop.f32.mrf.mxu0  ;;  %v6541_v15 = vpop.f32.mrf.mxu1 }
 0x4cd   : > { %13221 = vst [vmem:[#allocation31_spill] sm:$0xff] %v12228_v44  ;;  %v12230_v25 = vadd.f32 %v6525_v61, %v6401_v22  ;;  %v6403_v50 = vadd.f32 %v6402_v53, %v6264_v35 }
 0x4ce   : > { %v6407_v37 = vpop.f32.mrf.mxu0  ;;  %v6546_v21 = vpop.f32.mrf.mxu1 }
 0x4cf   : > { %13222 = vst [vmem:[#allocation37_spill] sm:$0xff] %v12230_v25  ;;  %v12232_v24 = vadd.f32 %v6527_v40, %v6403_v50  ;;  %v6408_v42 = vadd.f32 %v6407_v37, %v6271_v9 }
 0x4d0   : > { %v6409_v63 = vpop.f32.mrf.mxu0  ;;  %v6548_v7 = vpop.f32.mrf.mxu1 }
 0x4d1   : > { %13223 = vst [vmem:[#allocation94_spill] sm:$0xff] %v12232_v24  ;;  %v12234_v18 = vadd.f32 %v6532_v29, %v6408_v42  ;;  %v6410_v20 = vadd.f32 %v6409_v63, %v6273_v33 }
 0x4d2   : > { %v6414_v47 = vpop.f32.mrf.mxu0 }
 0x4d3   : > { %13224 = vst [vmem:[#allocation17_spill] sm:$0xff] %v12234_v18  ;;  %v12236_v23 = vadd.f32 %v6534_v57, %v6410_v20  ;;  %v6415_v13 = vadd.f32 %v6414_v47, %v6280_v28 }
 0x4d4   : > { %v6416_v46 = vpop.f32.mrf.mxu0 }
 0x4d5   : > { %13225 = vst [vmem:[#allocation21_spill] sm:$0xff] %v12236_v23  ;;  %v12238_v41 = vadd.f32 %v6539_v11, %v6415_v13  ;;  %v6417_v31 = vadd.f32 %v6416_v46, %v6282_v59 }
 0x4d6   : > { %v6421_v35 = vpop.f32.mrf.mxu0 }
 0x4d7   : > { %13226 = vst [vmem:[#allocation18_spill] sm:$0xff] %v12238_v41  ;;  %v12240_v55 = vadd.f32 %v6541_v15, %v6417_v31  ;;  %v6422_v56 = vadd.f32 %v6421_v35, %v6289_v16 }
 0x4d8   : > { %v6423_v54 = vpop.f32.mrf.mxu0 }
 0x4d9   : > { %13227 = vst [vmem:[#allocation19_spill] sm:$0xff] %v12240_v55  ;;  %v12242_v9 = vadd.f32 %v6546_v21, %v6422_v56  ;;  %v6424_v0 = vadd.f32 %v6423_v54, %v6291_v34 }
 0x4db   : > { %13228 = vst [vmem:[#allocation9_spill] sm:$0xff] %v12242_v9  ;;  %v12244_v33 = vadd.f32 %v6548_v7, %v6424_v0 }
 0x4dd   : > { %13229 = vst [vmem:[#allocation20_spill] sm:$0xff] %v12244_v33 }
 0x4f1   : > { %v6819_v5 = vpop.f32.mrf.mxu1 }
 0x4f3   : > { %v12246_v1 = vpop.f32.mrf.mxu1 }
 0x4f5   : > { %v12248_v28 = vpop.f32.mrf.mxu1 }
 0x4f7   : > { %v12250_v3 = vpop.f32.mrf.mxu1 }
 0x4f9   : > { %v6650_v59 = vpop.f32.mrf.mxu0  ;;  %v12252_v30 = vpop.f32.mrf.mxu1 }
 0x4fb   : > { %v6652_v62 = vpop.f32.mrf.mxu0  ;;  %v12254_v36 = vpop.f32.mrf.mxu1 }
 0x4fd   : > { %v6661_v16 = vpop.f32.mrf.mxu0  ;;  %v12256_v12 = vpop.f32.mrf.mxu1 }
 0x4ff   : > { %v12258_v34 = vpop.f32.mrf.mxu0  ;;  %v12260_v32 = vpop.f32.mrf.mxu1 }
 0x501   : > { %v12262_v2 = vpop.f32.mrf.mxu0  ;;  %v12264_v45 = vpop.f32.mrf.mxu1 }
 0x503   : > { %v12266_v60 = vpop.f32.mrf.mxu0  ;;  %v12268_v49 = vpop.f32.mrf.mxu1 }
 0x505   : > { %v12270_v6 = vpop.f32.mrf.mxu0  ;;  %v12272_v61 = vpop.f32.mrf.mxu1 }
 0x507   : > { %v12274_v10 = vpop.f32.mrf.mxu0  ;;  %v12276_v14 = vpop.f32.mrf.mxu1 }
 0x509   : > { %v12278_v40 = vpop.f32.mrf.mxu0  ;;  %v12280_v52 = vpop.f32.mrf.mxu1 }
 0x50a   : > { %13230 = vst [vmem:[#allocation30_spill] sm:$0xff] %v12280_v52 }
 0x50b   : > { %v12282_v27 = vpop.f32.mrf.mxu0  ;;  %v12284_v29 = vpop.f32.mrf.mxu1 }
 0x50c   : > { %13231 = vst [vmem:[#allocation5_spill] sm:$0xff] %v12284_v29 }
 0x50d   : > { %v12286_v19 = vpop.f32.mrf.mxu0  ;;  %v12288_v8 = vpop.f32.mrf.mxu1 }
 0x50e   : > { %13232 = vst [vmem:[#allocation26_spill] sm:$0xff] %v12288_v8 }
 0x50f   : > { %v12290_v48 = vpop.f32.mrf.mxu0  ;;  %v12292_v57 = vpop.f32.mrf.mxu1 }
 0x510   : > { %13233 = vst [vmem:[#allocation6_spill] sm:$0xff] %v12292_v57 }
 0x511   : > { %v12294_v51 = vpop.f32.mrf.mxu0  ;;  %v7083_v22 = vpop.f32.mrf.mxu1 }
 0x512   : > { %13234 = vst [vmem:[#allocation11_spill] sm:$0xff] %v12294_v51 }
 0x513   : > { %v12296_v53 = vpop.f32.mrf.mxu0  ;;  %v7085_v50 = vpop.f32.mrf.mxu1 }
 0x514   : > { %13235 = vst [vmem:[#allocation27_spill] sm:$0xff] %v12296_v53  ;;  %v6820_v53 = vadd.f32 %v6819_v5, %v6650_v59  ;;  %v6829_v5 = vadd.f32 %v12250_v3, %v12258_v34  ;;  %v8956_v3 = vld [vmem:[%s9509_s25] sm:$0xff] }
 0x515   : > { %v12298_v11 = vpop.f32.mrf.mxu0  ;;  %v7092_v37 = vpop.f32.mrf.mxu1 }
 0x516   : > { %13236 = vst [vmem:[#allocation12_spill] sm:$0xff] %v12298_v11 }
 0x517   : > { %v12300_v42 = vpop.f32.mrf.mxu0  ;;  %v12302_v63 = vpop.f32.mrf.mxu1 }
 0x518   : > { %13237 = vst [vmem:[#allocation35_spill] sm:$0xff] %v12300_v42 }
 0x519   : > { %v6949_v20 = vpop.f32.mrf.mxu0  ;;  %v12304_v15 = vpop.f32.mrf.mxu1 }
 0x51b   : > { %v6951_v47 = vpop.f32.mrf.mxu0  ;;  %v12306_v13 = vpop.f32.mrf.mxu1 }
 0x51d   : > { %v6957_v46 = vpop.f32.mrf.mxu0  ;;  %v12308_v31 = vpop.f32.mrf.mxu1 }
 0x51f   : > { %v6959_v21 = vpop.f32.mrf.mxu0  ;;  %v12310_v35 = vpop.f32.mrf.mxu1 }
 0x521   : > { %v6965_v56 = vpop.f32.mrf.mxu0  ;;  %v12312_v54 = vpop.f32.mrf.mxu1 }
 0x523   : > { %v6967_v0 = vpop.f32.mrf.mxu0  ;;  %v12314_v7 = vpop.f32.mrf.mxu1 }
 0x524   : > { %13238 = vst [vmem:[#allocation15_spill] sm:$0xff] %v12314_v7  ;;  %v6822_v7 = vadd.f32 %v12246_v1, %v6652_v62  ;;  %v6834_v1 = vadd.f32 %v12252_v30, %v12262_v2 }
 0x525   : > { %v6973_v33 = vpop.f32.mrf.mxu0  ;;  %v12316_v9 = vpop.f32.mrf.mxu1 }
 0x526   : > { %13239 = vst [vmem:[#allocation39_spill] sm:$0xff] %v12316_v9  ;;  %v6952_v44 = vadd.f32 %v6951_v47, %v6822_v7  ;;  %v6836_v47 = vadd.f32 %v12254_v36, %v12266_v60  ;;  %v6966_v7 = vadd.f32 %v6965_v56, %v6834_v1 }
 0x527   : > { %v12318_v55 = vpop.f32.mrf.mxu0  ;;  %v12320_v41 = vpop.f32.mrf.mxu1 }
 0x528   : > { %13240 = vst [vmem:[#allocation22_spill] sm:$0xff] %v12320_v41 }
 0x529   : > { %v12322_v23 = vpop.f32.mrf.mxu0  ;;  %v12324_v57 = vpop.f32.mrf.mxu1 }
 0x52a   : > { %13241 = vst [vmem:[#allocation49_spill] sm:$0xff] %v12324_v57 }
 0x52b   : > { %v12326_v42 = vpop.f32.mrf.mxu0  ;;  %v12328_v18 = vpop.f32.mrf.mxu1 }
 0x52c   : > { %13242 = vst [vmem:[#allocation42_spill] sm:$0xff] %v12328_v18  ;;  %v6950_v18 = vadd.f32 %v6949_v20, %v6820_v53  ;;  %v6960_v20 = vadd.f32 %v6959_v21, %v6829_v5  ;;  %v8958_v5 = vld [vmem:[%s9509_s25 + $0x10] sm:$0xff] }
 0x52d   : > { %v12330_v8 = vpop.f32.mrf.mxu0  ;;  %v12332_v11 = vpop.f32.mrf.mxu1 }
 0x52e   : > { %13243 = vst [vmem:[#allocation23_spill] sm:$0xff] %v12332_v11  ;;  %v6827_v11 = vadd.f32 %v12248_v28, %v6661_v16  ;;  %v7086_v16 = vadd.f32 %v7085_v50, %v6952_v44  ;;  %v6968_v44 = vadd.f32 %v6967_v0, %v6836_v47  ;;  %v7095_v56 = vadd.f32 %v12302_v63, %v6960_v20  ;;  %v8959_v0 = vld [vmem:[%s9509_s25 + $0x18] sm:$0xff] }
 0x52f   : > { %v12334_v24 = vpop.f32.mrf.mxu0  ;;  %v12336_v9 = vpop.f32.mrf.mxu1 }
 0x530   : > { %13244 = vst [vmem:[#allocation48_spill] sm:$0xff] %v12334_v24  ;;  %13245 = vst [vmem:[#allocation51_spill] sm:$0xff] %v12336_v9  ;;  %v6958_v59 = vadd.f32 %v6957_v46, %v6827_v11 }
 0x531   : > { %v12338_v29 = vpop.f32.mrf.mxu0  ;;  %v7355_v41 = vpop.f32.mrf.mxu1 }
 0x532   : > { %v7093_v2 = vadd.f32 %v7092_v37, %v6958_v59  ;;  %v7102_v37 = vadd.f32 %v12304_v15, %v6966_v7 }
 0x533   : > { %v12340_v25 = vpop.f32.mrf.mxu0  ;;  %v7357_v57 = vpop.f32.mrf.mxu1 }
 0x534   : > { %13246 = vst [vmem:[#allocation54_spill] sm:$0xff] %v12340_v25  ;;  %v7084_v25 = vadd.f32 %v7083_v22, %v6950_v18  ;;  %v7409_v18 = vmul.f32 %v8956_v3, %v12214_v39  ;;  %v8957_v22 = vld [vmem:[%s9509_s25 + $0x8] sm:$0xff]  ;;  %v7411_v39 = vmul.f32 %v8958_v5, %v12218_v4  ;;  %v7412_v4 = vmul.f32 %v8959_v0, %v12220_v26 }
 0x535   : > { %v12343_v52 = vpop.f32.mrf.mxu0  ;;  %v7362_v51 = vpop.f32.mrf.mxu1  ;;  %v7410_v11 = vmul.f32 %v8957_v22, %v12216_v38  ;;  %v6850_v26 = vadd.f32 %v12268_v49, %v12282_v27 }
 0x536   : > { %13247 = vst [vmem:[#allocation38_spill] sm:$0xff] %v12343_v52 }
 0x537   : > { %v12346_v24 = vpop.f32.mrf.mxu0  ;;  %v7364_v9 = vpop.f32.mrf.mxu1  ;;  %v6984_v49 = vadd.f32 %v12326_v42, %v6850_v26 }
 0x538   : > { %13248 = vst [vmem:[#allocation41_spill] sm:$0xff] %v12346_v24 }
 0x539   : > { %v7230_v62 = vpop.f32.mrf.mxu0  ;;  %v7369_v53 = vpop.f32.mrf.mxu1 }
 0x53a   : > { %v7231_v28 = vadd.f32 %v7230_v62, %v7084_v25  ;;  %v6841_v25 = vadd.f32 %v12256_v12, %v12270_v6 }
 0x53b   : > { %v7232_v24 = vpop.f32.mrf.mxu0  ;;  %v7371_v52 = vpop.f32.mrf.mxu1 }
 0x53c   : > { %v7356_v34 = vadd.f32 %v7355_v41, %v7231_v28  ;;  %v7233_v30 = vadd.f32 %v7232_v24, %v7086_v16  ;;  %v6843_v24 = vadd.f32 %v12260_v32, %v12274_v10  ;;  %v6974_v12 = vadd.f32 %v6973_v33, %v6841_v25  ;;  %v8963_v25 = vld [vmem:[%s9509_s25 + $0x38] sm:$0xff] }
 0x53d   : > { %v7237_v50 = vpop.f32.mrf.mxu0  ;;  %v7376_v46 = vpop.f32.mrf.mxu1  ;;  %v6848_v32 = vadd.f32 %v12264_v45, %v12278_v40  ;;  %v7104_v33 = vadd.f32 %v12306_v13, %v6968_v44  ;;  %v13249_v44 = vld [vmem:[#allocation31_spill] sm:$0xff] }
 0x53e   : > { %v7425_v36 = vmul.f32 %v7409_v18, %v7356_v34  ;;  %v7358_v60 = vadd.f32 %v7357_v57, %v7233_v30  ;;  %v7238_v21 = vadd.f32 %v7237_v50, %v7093_v2  ;;  %v6976_v15 = vadd.f32 %v12318_v55, %v6843_v24  ;;  %v8962_v2 = vld [vmem:[%s9509_s25 + $0x30] sm:$0xff]  ;;  %v13254_v24 = vld [vmem:[#allocation37_spill] sm:$0xff] }
 0x53f   : > { %v7239_v41 = vpop.f32.mrf.mxu0  ;;  %v7378_v38 = vpop.f32.mrf.mxu1  ;;  %v6982_v45 = vadd.f32 %v12322_v23, %v6848_v32  ;;  %v7111_v7 = vadd.f32 %v12308_v31, %v6974_v12  ;;  %v7415_v31 = vmul.f32 %v8962_v2, %v12226_v58  ;;  %v13250_v50 = vld [vmem:[#allocation11_spill] sm:$0xff]  ;;  %v13251_v58 = vld [vmem:[#allocation30_spill] sm:$0xff]  ;;  %v13256_v12 = vld [vmem:[#allocation5_spill] sm:$0xff] }
 0x540   : > { %7441 = vst [vmem:[%s12369_s27] sm:$0xff] %v7425_v36  ;;  %v7426_v6 = vmul.f32 %v7410_v11, %v7358_v60  ;;  %v7363_v57 = vadd.f32 %v7362_v51, %v7238_v21  ;;  %v7240_v63 = vadd.f32 %v7239_v41, %v7095_v56  ;;  %v8960_v51 = vld [vmem:[%s9509_s25 + $0x20] sm:$0xff]  ;;  %v6862_v36 = vadd.f32 %v13251_v58, %v13250_v50  ;;  %v13253_v56 = vld [vmem:[#allocation48_spill] sm:$0xff] }
 0x541   : > { %v7244_v10 = vpop.f32.mrf.mxu0  ;;  %v7383_v59 = vpop.f32.mrf.mxu1  ;;  %v7413_v28 = vmul.f32 %v8960_v51, %v12222_v17  ;;  %v6855_v17 = vadd.f32 %v12272_v61, %v12286_v19  ;;  %v7120_v61 = vadd.f32 %v12312_v54, %v6982_v45 }
 0x542   : > { %7442 = vst [vmem:[%s12369_s27 + $0x8] sm:$0xff] %v7426_v6  ;;  %v7427_v1 = vmul.f32 %v7411_v39, %v7363_v57  ;;  %v7365_v62 = vadd.f32 %v7364_v9, %v7240_v63  ;;  %v7245_v20 = vadd.f32 %v7244_v10, %v7102_v37  ;;  %v8961_v9 = vld [vmem:[%s9509_s25 + $0x28] sm:$0xff]  ;;  %v13255_v37 = vld [vmem:[#allocation27_spill] sm:$0xff]  ;;  %v6998_v57 = vadd.f32 %v12338_v29, %v6862_v36 }
 0x543   : > { %v7246_v40 = vpop.f32.mrf.mxu0  ;;  %v7385_v16 = vpop.f32.mrf.mxu1  ;;  %v7414_v3 = vmul.f32 %v8961_v9, %v12224_v43  ;;  %v6857_v43 = vadd.f32 %v12276_v14, %v12290_v48  ;;  %v6990_v19 = vadd.f32 %v12330_v8, %v6855_v17  ;;  %v13252_v14 = vld [vmem:[#allocation15_spill] sm:$0xff]  ;;  %v6864_v6 = vadd.f32 %v13256_v12, %v13255_v37  ;;  %v13263_v9 = vld [vmem:[#allocation17_spill] sm:$0xff] }
 0x544   : > { %7443 = vst [vmem:[%s12369_s27 + $0x10] sm:$0xff] %v7427_v1  ;;  %v7428_v13 = vmul.f32 %v7412_v4, %v7365_v62  ;;  %v7370_v55 = vadd.f32 %v7369_v53, %v7245_v20  ;;  %v7247_v47 = vadd.f32 %v7246_v40, %v7104_v33  ;;  %v7113_v53 = vadd.f32 %v12310_v35, %v6976_v15  ;;  %v13257_v10 = vld [vmem:[#allocation39_spill] sm:$0xff]  ;;  %v8965_v15 = vld [vmem:[%s9509_s25 + $0x48] sm:$0xff]  ;;  %v13259_v62 = vld [vmem:[#allocation12_spill] sm:$0xff] }
 0x545   : > { %v7251_v27 = vpop.f32.mrf.mxu0  ;;  %v7390_v23 = vpop.f32.mrf.mxu1  ;;  %v7416_v35 = vmul.f32 %v8963_v25, %v13249_v44  ;;  %v7122_v48 = vadd.f32 %v13252_v14, %v6984_v49  ;;  %v6992_v54 = vadd.f32 %v13253_v56, %v6857_v43  ;;  %v7129_v33 = vadd.f32 %v13257_v10, %v6990_v19  ;;  %v13260_v20 = vld [vmem:[#allocation26_spill] sm:$0xff]  ;;  %v13264_v17 = vld [vmem:[#allocation35_spill] sm:$0xff]  ;;  %v13270_v44 = vld [vmem:[#allocation41_spill] sm:$0xff] }
 0x546   : > { %7444 = vst [vmem:[%s12369_s27 + $0x18] sm:$0xff] %v7428_v13  ;;  %v7429_v18 = vmul.f32 %v7413_v28, %v7370_v55  ;;  %v7372_v34 = vadd.f32 %v7371_v52, %v7247_v47  ;;  %v7252_v30 = vadd.f32 %v7251_v27, %v7111_v7  ;;  %v6869_v51 = vadd.f32 %v13260_v20, %v13259_v62  ;;  %v13261_v28 = vld [vmem:[#allocation54_spill] sm:$0xff]  ;;  %v8966_v7 = vld [vmem:[%s9509_s25 + $0x50] sm:$0xff]  ;;  %v13275_v10 = vld [vmem:[#allocation9_spill] sm:$0xff] }
 0x547   : > { %v7253_v22 = vpop.f32.mrf.mxu0  ;;  %v7392_v60 = vpop.f32.mrf.mxu1  ;;  %v7000_v26 = vadd.f32 %v13261_v28, %v6864_v6  ;;  %v13265_v49 = vld [vmem:[#allocation6_spill] sm:$0xff]  ;;  %v8971_v20 = vld [vmem:[%s9509_s25 + $0x78] sm:$0xff] }
 0x548   : > { %7445 = vst [vmem:[%s12369_s27 + $0x20] sm:$0xff] %v7429_v18  ;;  %v7430_v42 = vmul.f32 %v7414_v3, %v7372_v34  ;;  %v7377_v11 = vadd.f32 %v7376_v46, %v7252_v30  ;;  %v7254_v52 = vadd.f32 %v7253_v22, %v7113_v53  ;;  %v8964_v46 = vld [vmem:[%s9509_s25 + $0x40] sm:$0xff]  ;;  %v7419_v3 = vmul.f32 %v8966_v7, %v13263_v9  ;;  %v13267_v53 = vld [vmem:[#allocation38_spill] sm:$0xff]  ;;  %v8967_v22 = vld [vmem:[%s9509_s25 + $0x58] sm:$0xff] }
 0x549   : > { %v7258_v21 = vpop.f32.mrf.mxu0  ;;  %v7417_v41 = vmul.f32 %v8964_v46, %v13254_v24  ;;  %v7397_v45 = vpop.f32.mrf.mxu1  ;;  %v6871_v27 = vadd.f32 %v13265_v49, %v13264_v17  ;;  %v13266_v34 = vld [vmem:[#allocation49_spill] sm:$0xff]  ;;  %v7006_v2 = vadd.f32 %v13267_v53, %v6869_v51  ;;  %v13271_v14 = vld [vmem:[#allocation18_spill] sm:$0xff]  ;;  %v13273_v24 = vld [vmem:[#allocation19_spill] sm:$0xff] }
 0x54a   : > { %7446 = vst [vmem:[%s12369_s27 + $0x28] sm:$0xff] %v7430_v42  ;;  %v7431_v8 = vmul.f32 %v7415_v31, %v7377_v11  ;;  %v7379_v5 = vadd.f32 %v7378_v38, %v7254_v52  ;;  %v7259_v39 = vadd.f32 %v7258_v21, %v7120_v61  ;;  %v13258_v38 = vld [vmem:[#allocation94_spill] sm:$0xff]  ;;  %v7138_v30 = vadd.f32 %v13266_v34, %v6998_v57  ;;  %v13268_v61 = vld [vmem:[#allocation21_spill] sm:$0xff]  ;;  %v13276_v51 = vld [vmem:[#allocation20_spill] sm:$0xff] }
 0x54b   : > { %v7260_v63 = vpop.f32.mrf.mxu0  ;;  %v7418_v1 = vmul.f32 %v8965_v15, %v13258_v38  ;;  %v7420_v19 = vmul.f32 %v8967_v22, %v13268_v61  ;;  %v7399_v42 = vpop.f32.mrf.mxu1  ;;  %v13269_v52 = vld [vmem:[#allocation42_spill] sm:$0xff]  ;;  %v8968_v21 = vld [vmem:[%s9509_s25 + $0x60] sm:$0xff]  ;;  %v7424_v28 = vmul.f32 %v8971_v20, %v13276_v51 }
 0x54c   : > { %7447 = vst [vmem:[%s12369_s27 + $0x30] sm:$0xff] %v7431_v8  ;;  %v7432_v0 = vmul.f32 %v7416_v35, %v7379_v5  ;;  %v7384_v4 = vadd.f32 %v7383_v59, %v7259_v39  ;;  %v7261_v32 = vadd.f32 %v7260_v63, %v7122_v48  ;;  %v13262_v59 = vld [vmem:[#allocation22_spill] sm:$0xff]  ;;  %v7140_v25 = vadd.f32 %v13269_v52, %v7000_v26  ;;  %v13272_v5 = vld [vmem:[#allocation23_spill] sm:$0xff] }
 0x54d   : > { %v7265_v40 = vpop.f32.mrf.mxu0  ;;  %v7131_v47 = vadd.f32 %v13262_v59, %v6992_v54  ;;  %v7008_v35 = vadd.f32 %v13270_v44, %v6871_v27  ;;  %v7421_v48 = vmul.f32 %v8968_v21, %v13271_v14  ;;  %v7147_v39 = vadd.f32 %v13272_v5, %v7006_v2  ;;  %v8969_v46 = vld [vmem:[%s9509_s25 + $0x68] sm:$0xff]  ;;  %v7404_v37 = vpop.f32.mrf.mxu1  ;;  %v13274_v63 = vld [vmem:[#allocation51_spill] sm:$0xff] }
 0x54e   : > { %7448 = vst [vmem:[%s12369_s27 + $0x38] sm:$0xff] %v7432_v0  ;;  %v7433_v29 = vmul.f32 %v7417_v41, %v7384_v4  ;;  %v7386_v13 = vadd.f32 %v7385_v16, %v7261_v32  ;;  %v7266_v55 = vadd.f32 %v7265_v40, %v7129_v33  ;;  %v7422_v41 = vmul.f32 %v8969_v46, %v13273_v24  ;;  %v8970_v32 = vld [vmem:[%s9509_s25 + $0x70] sm:$0xff]  ;;  %s8972_s25 = scalar_lea.vmem %s12454_s29, 2048 }
 0x54f   : > { %v7267_v18 = vpop.f32.mrf.mxu0  ;;  %v7149_v0 = vadd.f32 %v13274_v63, %v7008_v35  ;;  %v7423_v33 = vmul.f32 %v8970_v32, %v13275_v10  ;;  %v7406_v62 = vpop.f32.mrf.mxu1  ;;  %p8973_p11 = scmp.ne.s32.totalorder %s12454_s29, %s8972_s25  ;;  %p8980_p1 = scmp.lt.s32.totalorder %s8978_s23, %s8972_s25 }
 0x550   : > { %7449 = vst [vmem:[%s12369_s27 + $0x40] sm:$0xff] %v7433_v29  ;;  %v7434_v31 = vmul.f32 %v7418_v1, %v7386_v13  ;;  %v7391_v16 = vadd.f32 %v7390_v23, %v7266_v55  ;;  %v7268_v43 = vadd.f32 %v7267_v18, %v7131_v47 }
 0x551   : > { %v7272_v11 = vpop.f32.mrf.mxu0  ;;  %p8974_p12 = pnand %p8973_p11, %p9128_p5  ;;  %p8981_p2 = por %p8980_p1, %p8979_p0 }
 0x552   : > { %7450 = vst [vmem:[%s12369_s27 + $0x48] sm:$0xff] %v7434_v31  ;;  %v7435_v50 = vmul.f32 %v7419_v3, %v7391_v16  ;;  %v7393_v58 = vadd.f32 %v7392_v60, %v7268_v43  ;;  %v7273_v36 = vadd.f32 %v7272_v11, %v7138_v30 }
 0x553   : > { %v7274_v23 = vpop.f32.mrf.mxu0  ;;  %p8975_p13 = pneg %p8974_p12 }
 0x554   : > { %7451 = vst [vmem:[%s12369_s27 + $0x50] sm:$0xff] %v7435_v50  ;;  %v7436_v56 = vmul.f32 %v7420_v19, %v7393_v58  ;;  %v7398_v54 = vadd.f32 %v7397_v45, %v7273_v36  ;;  %v7275_v8 = vadd.f32 %v7274_v23, %v7140_v25 }
 0x555   : > { %v7279_v60 = vpop.f32.mrf.mxu0  ;;  %p8982_p3 = pnand %p8981_p2, %p8975_p13 }
 0x556   : > { %7452 = vst [vmem:[%s12369_s27 + $0x58] sm:$0xff] %v7436_v56  ;;  %v7437_v12 = vmul.f32 %v7421_v48, %v7398_v54  ;;  %v7400_v6 = vadd.f32 %v7399_v42, %v7275_v8  ;;  %v7280_v57 = vadd.f32 %v7279_v60, %v7147_v39 }
 0x557   : > { %v7281_v4 = vpop.f32.mrf.mxu0 }
 0x558   : > { %7453 = vst [vmem:[%s12369_s27 + $0x60] sm:$0xff] %v7437_v12  ;;  %v7438_v15 = vmul.f32 %v7422_v41, %v7400_v6  ;;  %v7405_v38 = vadd.f32 %v7404_v37, %v7280_v57  ;;  %v7282_v1 = vadd.f32 %v7281_v4, %v7149_v0 }
 0x55a   : > { %7454 = vst [vmem:[%s12369_s27 + $0x68] sm:$0xff] %v7438_v15  ;;  %v7439_v26 = vmul.f32 %v7423_v33, %v7405_v38  ;;  %v7407_v45 = vadd.f32 %v7406_v62, %v7282_v1 }
 0x55c   : > { %7455 = vst [vmem:[%s12369_s27 + $0x70] sm:$0xff] %v7439_v26  ;;  %v7440_v40 = vmul.f32 %v7424_v28, %v7407_v45 }
 0x55e   : > { %7456 = vst [vmem:[%s12369_s27 + $0x78] sm:$0xff] %v7440_v40 }
 0x55f   : > { %8985 = shalt.err (!%p8982_p3)
}
 0x560   : > { %s8986_s24 = scalar_lea.hbm %s12452_s17, 2048  ;;  %s8990_s28 = scalar_lea.hbm %s12509_s9, 4096 }
 0x561   : > { %p8987_p4 = scmp.ne.s32.totalorder %s12452_s17, %s8986_s24  ;;  %p8991_p9 = scmp.lt.s32.totalorder %s12452_s17, %s12509_s9 }
 0x562   : > { %p8992_p10 = scmp.lt.s32.totalorder %s8990_s28, %s8986_s24 }
 0x563   : > { %p8988_p7 = pnand %p8987_p4, %p9128_p5 }
 0x564   : > { %p8993_p11 = por %p8992_p10, %p8991_p9 }
 0x565   : > { %p8989_p8 = pneg %p8988_p7 }
 0x567   : > { %p8994_p12 = pnand %p8993_p11, %p8989_p8 }
 0x569   : > { %8997 = shalt.err (!%p8994_p12)
}
 0x56a   : > { %s9038_s25 = smov 256   ;;  %s9039_s21 = smov 16  }
 0x56b   : > { %8847 = dma.vmem_to_hbm [thread:$0]  (%p9128_p5), %s12454_s29, 2048, %s12452_s17, %s12460_s13, %s9038_s25, %s9038_s25, %s9039_s21  }
 0x56c PF: > { %p8853_p13 = scmp.ge.s32.totalorder %s9032_s12, 2  ;;  %s7486_s22 = sand.u32 1, %s9020_s30  }
 0x56d   : > { %s7487_s23 = scalar_lea.sflag [#allocation3], %s7486_s22 }
 0x56e   : > { %p8850_p0 = pnand %p8853_p13, %p9132_p6 }
 0x570   : > { %p8851_p1 = pneg %p8850_p0 }
 0x572   : > { %9015 = dma.done.wait (%p8851_p1), %s7487_s23, 2048  }
 0x573   : > { %9017 = vsyncadd (%p8851_p1), %s7487_s23, 4294965248  ;;  %p19_p2 = scmp.ge.s32.totalorder %s9115_s15, 4   ;;  %s13277_s30 = smov %s9024_s10 }
 0x574   : > { %s13278_s10 = smov %s9028_s11  ;;  %s13279_s11 = smov %s9126_s18 }
 0x575   : > { %s13280_s12 = smov %s9115_s15  ;;  %21 = sbr.rel (!%p19_p2) target bundleno = 3 (0x3), region = 91 }
 0x57a   :  { %7492 = vsyncpa [#allocation3], 1 }
 0x57b   :  { %7494 = vsyncpa [#allocation3 + $0x1], 1 }

</bundles_post_ra>
